<compile_context>
chip_gen: v7x
topology: tpu7x:2x2x1
jax: 0.10.0
libtpu: 0.0.40
codegen_flags: <defaults>
</compile_context>

<pallas_src>
import functools

import jax
import jax.numpy as jnp
from jax.experimental import pallas as pl
from jax.experimental.pallas import tpu as pltpu


# ----------------------------------------------------------------------------
# Pallas kernel: fused (pad + patch-extract + per-pixel multiply + k^2 reduce)
# ----------------------------------------------------------------------------
def _local_conv_kernel(x_ref, k_ref, o_ref, xpad_ref, *,
                       ksz, C, H, W, Ht, pad, R0, C0):
    # x_ref    : (C, H, W)        unpadded image plane (input dtype), resident per batch elem
    # k_ref    : (K2, Ht, W)      per-pixel kernels for this row tile (input dtype)
    # o_ref    : (C, Ht, W)       output row tile (f32)
    # xpad_ref : (C, Hs, Ws) f32  zero-padded image plane, built once per batch element
    t = pl.program_id(1)

    # --- once per batch element: build the zero-padded f32 plane in VMEM ---------------
    # The image is placed at the (8,128)-aligned offset (R0, C0) so this store is fully
    # aligned; the surrounding margin provides the 'same' zero padding.
    @pl.when(t == 0)
    def _():
        xpad_ref[...] = jnp.zeros_like(xpad_ref)
        xpad_ref[:, R0:R0 + H, C0:C0 + W] = x_ref[...].astype(jnp.float32)

    row0 = t * Ht
    if Ht % 8 == 0:
        row0 = pl.multiple_of(row0, 8)   # sublane-aligned dynamic row start

    # Aligned dynamic row-window load per channel (covers all k row taps of this tile).
    hwin = Ht + R0 + pad
    xrows = [xpad_ref[c, pl.ds(row0, hwin), :] for c in range(C)]

    # Register-resident per-channel accumulators.
    accs = [jnp.zeros((Ht, W), jnp.float32) for _ in range(C)]

    rbase = R0 - pad   # row  offset of (output row 0, tap i == 0) inside `xrows`
    cbase = C0 - pad   # lane offset of (output col 0, tap j == 0) inside `xrows`

    # TODO(synk): for large k_sz (>= ~9) swap this full k^2 unroll for a rolled
    #             lax.fori_loop over taps to bound generated code size.
    for j in range(ksz):
        # Hoisted lane shift: one static column slice per (j, channel), reused by all k
        # row taps below (k*C lane relayouts per tile instead of k^2*C).
        xcols = [xr[:, cbase + j:cbase + j + W] for xr in xrows]
        for i in range(ksz):
            # Per-pixel weight for tap p = i*k + j, loaded once, reused across channels.
            w = k_ref[i * ksz + j].astype(jnp.float32)
            for c in range(C):
                x_sh = xcols[c][rbase + i:rbase + i + Ht, :]   # static sublane slice only
                accs[c] = accs[c] + x_sh * w

    for c in range(C):
        o_ref[c] = accs[c].astype(o_ref.dtype)


def _pick_row_tile(H, W):
    """Largest multiple-of-8 divisor of H keeping a per-channel (Ht, W) f32 accumulator
    register-resident (<= ~8K elements), preferring >= 2 row tiles for pipelining."""
    max_elems = 8192
    max_ht = max(8, max_elems // max(W, 1))
    cands = [ht for ht in range(8, min(H, max_ht) + 1, 8) if H % ht == 0]
    if not cands:
        return H                       # degenerate small / odd H: single full-height tile
    multi = [ht for ht in cands if H // ht >= 2]
    return max(multi) if multi else max(cands)


def local_conv_ds(img, kernel_2d, *, k_sz):
    """Per-pixel local convolution.

    img       : (B, C, H, W)          NCHW image (f32 or bf16)
    kernel_2d : (B, k_sz*k_sz, H, W)  per-pixel kernels, row-major (i, j) tap order
    returns   : (B, C, H, W) float32
    """
    B, C, H, W = img.shape
    K2 = k_sz * k_sz
    assert k_sz % 2 == 1, "same-padding local conv assumes odd k_sz"
    assert kernel_2d.shape == (B, K2, H, W)
    pad = (k_sz - 1) // 2

    Ht = _pick_row_tile(H, W)
    nT = H // Ht

    # Padded-plane scratch geometry: image lives at an (8, 128)-aligned offset so the
    # once-per-batch fill store is aligned; the margins hold the 'same' zero padding.
    R0 = max(8, -(-pad // 8) * 8)          # sublane-aligned top margin >= pad
    C0 = max(128, -(-pad // 128) * 128)    # lane-aligned left margin  >= pad
    Hs = R0 + H + pad
    Ws = C0 + W + pad

    kernel_fn = functools.partial(
        _local_conv_kernel,
        ksz=k_sz, C=C, H=H, W=W, Ht=Ht, pad=pad, R0=R0, C0=C0)

    x_bytes = img.dtype.itemsize
    k_bytes = kernel_2d.dtype.itemsize
    work = (2 * C * H * W * x_bytes        # full image block (double-buffered)
            + 2 * K2 * Ht * W * k_bytes    # kernel_2d row tile (double-buffered)
            + 2 * C * Ht * W * 4           # output row tile (double-buffered, f32)
            + C * Hs * Ws * 4)             # padded-plane scratch (f32)
    vmem_limit = int(min(64 * 1024 * 1024, max(32 * 1024 * 1024, 2 * work)))
    # TODO(synk): for very large C*H*W (image plane itself > ~16 MiB) also row-tile the
    #             image with a (k_sz-1)-row halo instead of keeping a full plane resident.

    cost = pl.CostEstimate(
        flops=2 * B * C * K2 * H * W,
        transcendentals=0,
        bytes_accessed=(B * C * H * W * x_bytes
                        + B * K2 * H * W * k_bytes
                        + B * C * H * W * 4))

    return pl.pallas_call(
        kernel_fn,
        out_shape=jax.ShapeDtypeStruct((B, C, H, W), jnp.float32),
        grid_spec=pltpu.PrefetchScalarGridSpec(
            num_scalar_prefetch=0,
            grid=(B, nT),
            in_specs=[
                # Full unpadded image plane; block index ignores t, so it is DMA'd only
                # when the batch index changes.
                pl.BlockSpec((None, C, H, W), lambda b, t: (b, 0, 0, 0)),
                # Per-pixel kernels: one row tile per step (the dominant HBM stream).
                pl.BlockSpec((None, K2, Ht, W), lambda b, t: (b, 0, t, 0)),
            ],
            out_specs=pl.BlockSpec((None, C, Ht, W), lambda b, t: (b, 0, t, 0)),
            scratch_shapes=[pltpu.VMEM((C, Hs, Ws), jnp.float32)],
        ),
        compiler_params=pltpu.CompilerParams(
            # Row axis must stay "arbitrary": the padded-plane scratch is filled at t == 0
            # and reused by all row tiles of the same batch element.
            dimension_semantics=("parallel", "arbitrary"),
            vmem_limit_bytes=vmem_limit),
        cost_estimate=cost,
    )(img, kernel_2d)


# ----------------------------------------------------------------------------
# Pure-JAX reference (correctness check only)
# ----------------------------------------------------------------------------
def local_conv_ds_ref(img, kernel_2d, k_sz):
    B, C, H, W = img.shape
    pad = (k_sz - 1) // 2
    xp = jnp.pad(img.astype(jnp.float32),
                 ((0, 0), (0, 0), (pad, pad), (pad, pad)))
    ker = kernel_2d.astype(jnp.float32)
    out = jnp.zeros((B, C, H, W), jnp.float32)
    for i in range(k_sz):
        for j in range(k_sz):
            p = i * k_sz + j
            out = out + xp[:, :, i:i + H, j:j + W] * ker[:, p][:, None, :, :]
    return out


# ----------------------------------------------------------------------------
if __name__ == "__main__":
    # LocalConvDs(ch=3, k_sz=5) at a small but lane-dense spatial size (W = 128).
    B, C, H, W = 2, 3, 16, 128
    K = 5

    key = jax.random.PRNGKey(0)
    k_img, k_ker = jax.random.split(key)
    img_f32 = jax.random.normal(k_img, (B, C, H, W), jnp.float32)
    ker_f32 = jax.nn.softmax(
        jax.random.normal(k_ker, (B, K * K, H, W), jnp.float32), axis=1)

    # bf16 HBM storage (perf review): halves HBM traffic; kernel accumulates in f32.
    img = img_f32.astype(jnp.bfloat16)
    kernel_2d = ker_f32.astype(jnp.bfloat16)

    fwd = jax.jit(functools.partial(local_conv_ds, k_sz=K))
    y = fwd(img, kernel_2d)
    jax.block_until_ready(y)

    y_ref = local_conv_ds_ref(img, kernel_2d, K)   # same bf16 inputs, f32 math
    assert y.shape == (B, C, H, W)
    max_err = float(jnp.max(jnp.abs(y - y_ref)))
    assert max_err < 1e-4, f"mismatch vs reference: max abs err = {max_err}"

    print("KERNEL_OK")
</pallas_src>

<mosaic_0001>
module attributes {stable_mosaic.version = 11 : i64} {
  func.func @_local_conv_kernel(%arg0: i32, %arg1: i32, %arg2: memref<1x3x16x128xbf16, #tpu.memory_space<vmem>>, %arg3: memref<1x25x8x128xbf16, #tpu.memory_space<vmem>>, %arg4: memref<1x3x8x128xf32, #tpu.memory_space<vmem>>, %arg5: memref<3x26x258xf32, #tpu.memory_space<vmem>>) attributes {dimension_semantics = [#tpu.dimension_semantics<parallel>, #tpu.dimension_semantics<arbitrary>], iteration_bounds = array<i64: 2, 2>, scalar_prefetch = 0 : i64, scratch_operands = 1 : i64, tpu.core_type = #tpu.core_type<tc>, window_params = [{transform_indices = @transform_0, window_bounds = array<i64: 1, 3, 16, 128>}, {transform_indices = @transform_1, window_bounds = array<i64: 1, 25, 8, 128>}, {transform_indices = @transform_2, window_bounds = array<i64: 1, 3, 8, 128>}]} {
    %c0_i32 = arith.constant 0 : i32
    %0 = arith.cmpi eq, %arg1, %c0_i32 : i32
    %1 = arith.extui %0 : i1 to i32
    %c0_i32_0 = arith.constant 0 : i32
    %2 = arith.cmpi ne, %1, %c0_i32_0 : i32
    scf.if %2 {
      %cst_96 = arith.constant 0.000000e+00 : f32
      %341 = vector.broadcast %cst_96 : f32 to vector<3x26x258xf32>
      %c0_97 = arith.constant 0 : index
      %c0_98 = arith.constant 0 : index
      %c0_99 = arith.constant 0 : index
      %342 = vector.load %arg5[%c0_97, %c0_98, %c0_99] : memref<3x26x258xf32, #tpu.memory_space<vmem>>, vector<3x26x258xf32>
      tpu.vector_store %arg5[%c0_97, %c0_98, %c0_99], %341 {strides = array<i32>} : memref<3x26x258xf32, #tpu.memory_space<vmem>>, vector<3x26x258xf32>,
      %c0_100 = arith.constant 0 : index
      %c0_101 = arith.constant 0 : index
      %c0_102 = arith.constant 0 : index
      %c0_103 = arith.constant 0 : index
      %343 = vector.load %arg2[%c0_100, %c0_101, %c0_102, %c0_103] : memref<1x3x16x128xbf16, #tpu.memory_space<vmem>>, vector<1x3x16x128xbf16>
      %344 = vector.shape_cast %343 : vector<1x3x16x128xbf16> to vector<3x16x128xbf16>
      %345 = arith.extf %344 : vector<3x16x128xbf16> to vector<3x16x128xf32>
      %c0_104 = arith.constant 0 : index
      %c8_105 = arith.constant 8 : index
      %c128 = arith.constant 128 : index
      %346 = vector.load %arg5[%c0_104, %c8_105, %c128] : memref<3x26x258xf32, #tpu.memory_space<vmem>>, vector<3x16x128xf32>
      tpu.vector_store %arg5[%c0_104, %c8_105, %c128], %345 {strides = array<i32>} : memref<3x26x258xf32, #tpu.memory_space<vmem>>, vector<3x16x128xf32>,
    } else {
    }
    %c8_i32 = arith.constant 8 : i32
    %3 = arith.muli %arg1, %c8_i32 : i32
    %4 = tpu.assume_multiple %3, 8 : i32
    %c0 = arith.constant 0 : index
    %5 = arith.index_cast %4 : i32 to index
    %c0_1 = arith.constant 0 : index
    %6 = vector.load %arg5[%c0, %5, %c0_1] : memref<3x26x258xf32, #tpu.memory_space<vmem>>, vector<1x18x258xf32>
    %7 = vector.shape_cast %6 : vector<1x18x258xf32> to vector<18x258xf32>
    %c1 = arith.constant 1 : index
    %8 = arith.index_cast %4 : i32 to index
    %c0_2 = arith.constant 0 : index
    %9 = vector.load %arg5[%c1, %8, %c0_2] : memref<3x26x258xf32, #tpu.memory_space<vmem>>, vector<1x18x258xf32>
    %10 = vector.shape_cast %9 : vector<1x18x258xf32> to vector<18x258xf32>
    %c2 = arith.constant 2 : index
    %11 = arith.index_cast %4 : i32 to index
    %c0_3 = arith.constant 0 : index
    %12 = vector.load %arg5[%c2, %11, %c0_3] : memref<3x26x258xf32, #tpu.memory_space<vmem>>, vector<1x18x258xf32>
    %13 = vector.shape_cast %12 : vector<1x18x258xf32> to vector<18x258xf32>
    %cst = arith.constant 0.000000e+00 : f32
    %14 = vector.broadcast %cst : f32 to vector<8x128xf32>
    %cst_4 = arith.constant 0.000000e+00 : f32
    %15 = vector.broadcast %cst_4 : f32 to vector<8x128xf32>
    %cst_5 = arith.constant 0.000000e+00 : f32
    %16 = vector.broadcast %cst_5 : f32 to vector<8x128xf32>
    %17 = vector.extract_strided_slice %7 {offsets = [0, 126], sizes = [18, 128], strides = [1, 1]} : vector<18x258xf32> to vector<18x128xf32>
    %18 = vector.extract_strided_slice %10 {offsets = [0, 126], sizes = [18, 128], strides = [1, 1]} : vector<18x258xf32> to vector<18x128xf32>
    %19 = vector.extract_strided_slice %13 {offsets = [0, 126], sizes = [18, 128], strides = [1, 1]} : vector<18x258xf32> to vector<18x128xf32>
    %c0_6 = arith.constant 0 : index
    %c0_7 = arith.constant 0 : index
    %c0_8 = arith.constant 0 : index
    %c0_9 = arith.constant 0 : index
    %20 = vector.load %arg3[%c0_6, %c0_7, %c0_8, %c0_9] : memref<1x25x8x128xbf16, #tpu.memory_space<vmem>>, vector<1x1x8x128xbf16>
    %21 = vector.shape_cast %20 : vector<1x1x8x128xbf16> to vector<8x128xbf16>
    %22 = arith.extf %21 : vector<8x128xbf16> to vector<8x128xf32>
    %23 = vector.extract_strided_slice %17 {offsets = [6, 0], sizes = [8, 128], strides = [1, 1]} : vector<18x128xf32> to vector<8x128xf32>
    %24 = arith.mulf %23, %22 : vector<8x128xf32>
    %25 = arith.addf %14, %24 : vector<8x128xf32>
    %26 = vector.extract_strided_slice %18 {offsets = [6, 0], sizes = [8, 128], strides = [1, 1]} : vector<18x128xf32> to vector<8x128xf32>
    %27 = arith.mulf %26, %22 : vector<8x128xf32>
    %28 = arith.addf %15, %27 : vector<8x128xf32>
    %29 = vector.extract_strided_slice %19 {offsets = [6, 0], sizes = [8, 128], strides = [1, 1]} : vector<18x128xf32> to vector<8x128xf32>
    %30 = arith.mulf %29, %22 : vector<8x128xf32>
    %31 = arith.addf %16, %30 : vector<8x128xf32>
    %c0_10 = arith.constant 0 : index
    %c5 = arith.constant 5 : index
    %c0_11 = arith.constant 0 : index
    %c0_12 = arith.constant 0 : index
    %32 = vector.load %arg3[%c0_10, %c5, %c0_11, %c0_12] : memref<1x25x8x128xbf16, #tpu.memory_space<vmem>>, vector<1x1x8x128xbf16>
    %33 = vector.shape_cast %32 : vector<1x1x8x128xbf16> to vector<8x128xbf16>
    %34 = arith.extf %33 : vector<8x128xbf16> to vector<8x128xf32>
    %35 = vector.extract_strided_slice %17 {offsets = [7, 0], sizes = [8, 128], strides = [1, 1]} : vector<18x128xf32> to vector<8x128xf32>
    %36 = arith.mulf %35, %34 : vector<8x128xf32>
    %37 = arith.addf %25, %36 : vector<8x128xf32>
    %38 = vector.extract_strided_slice %18 {offsets = [7, 0], sizes = [8, 128], strides = [1, 1]} : vector<18x128xf32> to vector<8x128xf32>
    %39 = arith.mulf %38, %34 : vector<8x128xf32>
    %40 = arith.addf %28, %39 : vector<8x128xf32>
    %41 = vector.extract_strided_slice %19 {offsets = [7, 0], sizes = [8, 128], strides = [1, 1]} : vector<18x128xf32> to vector<8x128xf32>
    %42 = arith.mulf %41, %34 : vector<8x128xf32>
    %43 = arith.addf %31, %42 : vector<8x128xf32>
    %c0_13 = arith.constant 0 : index
    %c10 = arith.constant 10 : index
    %c0_14 = arith.constant 0 : index
    %c0_15 = arith.constant 0 : index
    %44 = vector.load %arg3[%c0_13, %c10, %c0_14, %c0_15] : memref<1x25x8x128xbf16, #tpu.memory_space<vmem>>, vector<1x1x8x128xbf16>
    %45 = vector.shape_cast %44 : vector<1x1x8x128xbf16> to vector<8x128xbf16>
    %46 = arith.extf %45 : vector<8x128xbf16> to vector<8x128xf32>
    %47 = vector.extract_strided_slice %17 {offsets = [8, 0], sizes = [8, 128], strides = [1, 1]} : vector<18x128xf32> to vector<8x128xf32>
    %48 = arith.mulf %47, %46 : vector<8x128xf32>
    %49 = arith.addf %37, %48 : vector<8x128xf32>
    %50 = vector.extract_strided_slice %18 {offsets = [8, 0], sizes = [8, 128], strides = [1, 1]} : vector<18x128xf32> to vector<8x128xf32>
    %51 = arith.mulf %50, %46 : vector<8x128xf32>
    %52 = arith.addf %40, %51 : vector<8x128xf32>
    %53 = vector.extract_strided_slice %19 {offsets = [8, 0], sizes = [8, 128], strides = [1, 1]} : vector<18x128xf32> to vector<8x128xf32>
    %54 = arith.mulf %53, %46 : vector<8x128xf32>
    %55 = arith.addf %43, %54 : vector<8x128xf32>
    %c0_16 = arith.constant 0 : index
    %c15 = arith.constant 15 : index
    %c0_17 = arith.constant 0 : index
    %c0_18 = arith.constant 0 : index
    %56 = vector.load %arg3[%c0_16, %c15, %c0_17, %c0_18] : memref<1x25x8x128xbf16, #tpu.memory_space<vmem>>, vector<1x1x8x128xbf16>
    %57 = vector.shape_cast %56 : vector<1x1x8x128xbf16> to vector<8x128xbf16>
    %58 = arith.extf %57 : vector<8x128xbf16> to vector<8x128xf32>
    %59 = vector.extract_strided_slice %17 {offsets = [9, 0], sizes = [8, 128], strides = [1, 1]} : vector<18x128xf32> to vector<8x128xf32>
    %60 = arith.mulf %59, %58 : vector<8x128xf32>
    %61 = arith.addf %49, %60 : vector<8x128xf32>
    %62 = vector.extract_strided_slice %18 {offsets = [9, 0], sizes = [8, 128], strides = [1, 1]} : vector<18x128xf32> to vector<8x128xf32>
    %63 = arith.mulf %62, %58 : vector<8x128xf32>
    %64 = arith.addf %52, %63 : vector<8x128xf32>
    %65 = vector.extract_strided_slice %19 {offsets = [9, 0], sizes = [8, 128], strides = [1, 1]} : vector<18x128xf32> to vector<8x128xf32>
    %66 = arith.mulf %65, %58 : vector<8x128xf32>
    %67 = arith.addf %55, %66 : vector<8x128xf32>
    %c0_19 = arith.constant 0 : index
    %c20 = arith.constant 20 : index
    %c0_20 = arith.constant 0 : index
    %c0_21 = arith.constant 0 : index
    %68 = vector.load %arg3[%c0_19, %c20, %c0_20, %c0_21] : memref<1x25x8x128xbf16, #tpu.memory_space<vmem>>, vector<1x1x8x128xbf16>
    %69 = vector.shape_cast %68 : vector<1x1x8x128xbf16> to vector<8x128xbf16>
    %70 = arith.extf %69 : vector<8x128xbf16> to vector<8x128xf32>
    %71 = vector.extract_strided_slice %17 {offsets = [10, 0], sizes = [8, 128], strides = [1, 1]} : vector<18x128xf32> to vector<8x128xf32>
    %72 = arith.mulf %71, %70 : vector<8x128xf32>
    %73 = arith.addf %61, %72 : vector<8x128xf32>
    %74 = vector.extract_strided_slice %18 {offsets = [10, 0], sizes = [8, 128], strides = [1, 1]} : vector<18x128xf32> to vector<8x128xf32>
    %75 = arith.mulf %74, %70 : vector<8x128xf32>
    %76 = arith.addf %64, %75 : vector<8x128xf32>
    %77 = vector.extract_strided_slice %19 {offsets = [10, 0], sizes = [8, 128], strides = [1, 1]} : vector<18x128xf32> to vector<8x128xf32>
    %78 = arith.mulf %77, %70 : vector<8x128xf32>
    %79 = arith.addf %67, %78 : vector<8x128xf32>
    %80 = vector.extract_strided_slice %7 {offsets = [0, 127], sizes = [18, 128], strides = [1, 1]} : vector<18x258xf32> to vector<18x128xf32>
    %81 = vector.extract_strided_slice %10 {offsets = [0, 127], sizes = [18, 128], strides = [1, 1]} : vector<18x258xf32> to vector<18x128xf32>
    %82 = vector.extract_strided_slice %13 {offsets = [0, 127], sizes = [18, 128], strides = [1, 1]} : vector<18x258xf32> to vector<18x128xf32>
    %c0_22 = arith.constant 0 : index
    %c1_23 = arith.constant 1 : index
    %c0_24 = arith.constant 0 : index
    %c0_25 = arith.constant 0 : index
    %83 = vector.load %arg3[%c0_22, %c1_23, %c0_24, %c0_25] : memref<1x25x8x128xbf16, #tpu.memory_space<vmem>>, vector<1x1x8x128xbf16>
    %84 = vector.shape_cast %83 : vector<1x1x8x128xbf16> to vector<8x128xbf16>
    %85 = arith.extf %84 : vector<8x128xbf16> to vector<8x128xf32>
    %86 = vector.extract_strided_slice %80 {offsets = [6, 0], sizes = [8, 128], strides = [1, 1]} : vector<18x128xf32> to vector<8x128xf32>
    %87 = arith.mulf %86, %85 : vector<8x128xf32>
    %88 = arith.addf %73, %87 : vector<8x128xf32>
    %89 = vector.extract_strided_slice %81 {offsets = [6, 0], sizes = [8, 128], strides = [1, 1]} : vector<18x128xf32> to vector<8x128xf32>
    %90 = arith.mulf %89, %85 : vector<8x128xf32>
    %91 = arith.addf %76, %90 : vector<8x128xf32>
    %92 = vector.extract_strided_slice %82 {offsets = [6, 0], sizes = [8, 128], strides = [1, 1]} : vector<18x128xf32> to vector<8x128xf32>
    %93 = arith.mulf %92, %85 : vector<8x128xf32>
    %94 = arith.addf %79, %93 : vector<8x128xf32>
    %c0_26 = arith.constant 0 : index
    %c6 = arith.constant 6 : index
    %c0_27 = arith.constant 0 : index
    %c0_28 = arith.constant 0 : index
    %95 = vector.load %arg3[%c0_26, %c6, %c0_27, %c0_28] : memref<1x25x8x128xbf16, #tpu.memory_space<vmem>>, vector<1x1x8x128xbf16>
    %96 = vector.shape_cast %95 : vector<1x1x8x128xbf16> to vector<8x128xbf16>
    %97 = arith.extf %96 : vector<8x128xbf16> to vector<8x128xf32>
    %98 = vector.extract_strided_slice %80 {offsets = [7, 0], sizes = [8, 128], strides = [1, 1]} : vector<18x128xf32> to vector<8x128xf32>
    %99 = arith.mulf %98, %97 : vector<8x128xf32>
    %100 = arith.addf %88, %99 : vector<8x128xf32>
    %101 = vector.extract_strided_slice %81 {offsets = [7, 0], sizes = [8, 128], strides = [1, 1]} : vector<18x128xf32> to vector<8x128xf32>
    %102 = arith.mulf %101, %97 : vector<8x128xf32>
    %103 = arith.addf %91, %102 : vector<8x128xf32>
    %104 = vector.extract_strided_slice %82 {offsets = [7, 0], sizes = [8, 128], strides = [1, 1]} : vector<18x128xf32> to vector<8x128xf32>
    %105 = arith.mulf %104, %97 : vector<8x128xf32>
    %106 = arith.addf %94, %105 : vector<8x128xf32>
    %c0_29 = arith.constant 0 : index
    %c11 = arith.constant 11 : index
    %c0_30 = arith.constant 0 : index
    %c0_31 = arith.constant 0 : index
    %107 = vector.load %arg3[%c0_29, %c11, %c0_30, %c0_31] : memref<1x25x8x128xbf16, #tpu.memory_space<vmem>>, vector<1x1x8x128xbf16>
    %108 = vector.shape_cast %107 : vector<1x1x8x128xbf16> to vector<8x128xbf16>
    %109 = arith.extf %108 : vector<8x128xbf16> to vector<8x128xf32>
    %110 = vector.extract_strided_slice %80 {offsets = [8, 0], sizes = [8, 128], strides = [1, 1]} : vector<18x128xf32> to vector<8x128xf32>
    %111 = arith.mulf %110, %109 : vector<8x128xf32>
    %112 = arith.addf %100, %111 : vector<8x128xf32>
    %113 = vector.extract_strided_slice %81 {offsets = [8, 0], sizes = [8, 128], strides = [1, 1]} : vector<18x128xf32> to vector<8x128xf32>
    %114 = arith.mulf %113, %109 : vector<8x128xf32>
    %115 = arith.addf %103, %114 : vector<8x128xf32>
    %116 = vector.extract_strided_slice %82 {offsets = [8, 0], sizes = [8, 128], strides = [1, 1]} : vector<18x128xf32> to vector<8x128xf32>
    %117 = arith.mulf %116, %109 : vector<8x128xf32>
    %118 = arith.addf %106, %117 : vector<8x128xf32>
    %c0_32 = arith.constant 0 : index
    %c16 = arith.constant 16 : index
    %c0_33 = arith.constant 0 : index
    %c0_34 = arith.constant 0 : index
    %119 = vector.load %arg3[%c0_32, %c16, %c0_33, %c0_34] : memref<1x25x8x128xbf16, #tpu.memory_space<vmem>>, vector<1x1x8x128xbf16>
    %120 = vector.shape_cast %119 : vector<1x1x8x128xbf16> to vector<8x128xbf16>
    %121 = arith.extf %120 : vector<8x128xbf16> to vector<8x128xf32>
    %122 = vector.extract_strided_slice %80 {offsets = [9, 0], sizes = [8, 128], strides = [1, 1]} : vector<18x128xf32> to vector<8x128xf32>
    %123 = arith.mulf %122, %121 : vector<8x128xf32>
    %124 = arith.addf %112, %123 : vector<8x128xf32>
    %125 = vector.extract_strided_slice %81 {offsets = [9, 0], sizes = [8, 128], strides = [1, 1]} : vector<18x128xf32> to vector<8x128xf32>
    %126 = arith.mulf %125, %121 : vector<8x128xf32>
    %127 = arith.addf %115, %126 : vector<8x128xf32>
    %128 = vector.extract_strided_slice %82 {offsets = [9, 0], sizes = [8, 128], strides = [1, 1]} : vector<18x128xf32> to vector<8x128xf32>
    %129 = arith.mulf %128, %121 : vector<8x128xf32>
    %130 = arith.addf %118, %129 : vector<8x128xf32>
    %c0_35 = arith.constant 0 : index
    %c21 = arith.constant 21 : index
    %c0_36 = arith.constant 0 : index
    %c0_37 = arith.constant 0 : index
    %131 = vector.load %arg3[%c0_35, %c21, %c0_36, %c0_37] : memref<1x25x8x128xbf16, #tpu.memory_space<vmem>>, vector<1x1x8x128xbf16>
    %132 = vector.shape_cast %131 : vector<1x1x8x128xbf16> to vector<8x128xbf16>
    %133 = arith.extf %132 : vector<8x128xbf16> to vector<8x128xf32>
    %134 = vector.extract_strided_slice %80 {offsets = [10, 0], sizes = [8, 128], strides = [1, 1]} : vector<18x128xf32> to vector<8x128xf32>
    %135 = arith.mulf %134, %133 : vector<8x128xf32>
    %136 = arith.addf %124, %135 : vector<8x128xf32>
    %137 = vector.extract_strided_slice %81 {offsets = [10, 0], sizes = [8, 128], strides = [1, 1]} : vector<18x128xf32> to vector<8x128xf32>
    %138 = arith.mulf %137, %133 : vector<8x128xf32>
    %139 = arith.addf %127, %138 : vector<8x128xf32>
    %140 = vector.extract_strided_slice %82 {offsets = [10, 0], sizes = [8, 128], strides = [1, 1]} : vector<18x128xf32> to vector<8x128xf32>
    %141 = arith.mulf %140, %133 : vector<8x128xf32>
    %142 = arith.addf %130, %141 : vector<8x128xf32>
    %143 = vector.extract_strided_slice %7 {offsets = [0, 128], sizes = [18, 128], strides = [1, 1]} : vector<18x258xf32> to vector<18x128xf32>
    %144 = vector.extract_strided_slice %10 {offsets = [0, 128], sizes = [18, 128], strides = [1, 1]} : vector<18x258xf32> to vector<18x128xf32>
    %145 = vector.extract_strided_slice %13 {offsets = [0, 128], sizes = [18, 128], strides = [1, 1]} : vector<18x258xf32> to vector<18x128xf32>
    %c0_38 = arith.constant 0 : index
    %c2_39 = arith.constant 2 : index
    %c0_40 = arith.constant 0 : index
    %c0_41 = arith.constant 0 : index
    %146 = vector.load %arg3[%c0_38, %c2_39, %c0_40, %c0_41] : memref<1x25x8x128xbf16, #tpu.memory_space<vmem>>, vector<1x1x8x128xbf16>
    %147 = vector.shape_cast %146 : vector<1x1x8x128xbf16> to vector<8x128xbf16>
    %148 = arith.extf %147 : vector<8x128xbf16> to vector<8x128xf32>
    %149 = vector.extract_strided_slice %143 {offsets = [6, 0], sizes = [8, 128], strides = [1, 1]} : vector<18x128xf32> to vector<8x128xf32>
    %150 = arith.mulf %149, %148 : vector<8x128xf32>
    %151 = arith.addf %136, %150 : vector<8x128xf32>
    %152 = vector.extract_strided_slice %144 {offsets = [6, 0], sizes = [8, 128], strides = [1, 1]} : vector<18x128xf32> to vector<8x128xf32>
    %153 = arith.mulf %152, %148 : vector<8x128xf32>
    %154 = arith.addf %139, %153 : vector<8x128xf32>
    %155 = vector.extract_strided_slice %145 {offsets = [6, 0], sizes = [8, 128], strides = [1, 1]} : vector<18x128xf32> to vector<8x128xf32>
    %156 = arith.mulf %155, %148 : vector<8x128xf32>
    %157 = arith.addf %142, %156 : vector<8x128xf32>
    %c0_42 = arith.constant 0 : index
    %c7 = arith.constant 7 : index
    %c0_43 = arith.constant 0 : index
    %c0_44 = arith.constant 0 : index
    %158 = vector.load %arg3[%c0_42, %c7, %c0_43, %c0_44] : memref<1x25x8x128xbf16, #tpu.memory_space<vmem>>, vector<1x1x8x128xbf16>
    %159 = vector.shape_cast %158 : vector<1x1x8x128xbf16> to vector<8x128xbf16>
    %160 = arith.extf %159 : vector<8x128xbf16> to vector<8x128xf32>
    %161 = vector.extract_strided_slice %143 {offsets = [7, 0], sizes = [8, 128], strides = [1, 1]} : vector<18x128xf32> to vector<8x128xf32>
    %162 = arith.mulf %161, %160 : vector<8x128xf32>
    %163 = arith.addf %151, %162 : vector<8x128xf32>
    %164 = vector.extract_strided_slice %144 {offsets = [7, 0], sizes = [8, 128], strides = [1, 1]} : vector<18x128xf32> to vector<8x128xf32>
    %165 = arith.mulf %164, %160 : vector<8x128xf32>
    %166 = arith.addf %154, %165 : vector<8x128xf32>
    %167 = vector.extract_strided_slice %145 {offsets = [7, 0], sizes = [8, 128], strides = [1, 1]} : vector<18x128xf32> to vector<8x128xf32>
    %168 = arith.mulf %167, %160 : vector<8x128xf32>
    %169 = arith.addf %157, %168 : vector<8x128xf32>
    %c0_45 = arith.constant 0 : index
    %c12 = arith.constant 12 : index
    %c0_46 = arith.constant 0 : index
    %c0_47 = arith.constant 0 : index
    %170 = vector.load %arg3[%c0_45, %c12, %c0_46, %c0_47] : memref<1x25x8x128xbf16, #tpu.memory_space<vmem>>, vector<1x1x8x128xbf16>
    %171 = vector.shape_cast %170 : vector<1x1x8x128xbf16> to vector<8x128xbf16>
    %172 = arith.extf %171 : vector<8x128xbf16> to vector<8x128xf32>
    %173 = vector.extract_strided_slice %143 {offsets = [8, 0], sizes = [8, 128], strides = [1, 1]} : vector<18x128xf32> to vector<8x128xf32>
    %174 = arith.mulf %173, %172 : vector<8x128xf32>
    %175 = arith.addf %163, %174 : vector<8x128xf32>
    %176 = vector.extract_strided_slice %144 {offsets = [8, 0], sizes = [8, 128], strides = [1, 1]} : vector<18x128xf32> to vector<8x128xf32>
    %177 = arith.mulf %176, %172 : vector<8x128xf32>
    %178 = arith.addf %166, %177 : vector<8x128xf32>
    %179 = vector.extract_strided_slice %145 {offsets = [8, 0], sizes = [8, 128], strides = [1, 1]} : vector<18x128xf32> to vector<8x128xf32>
    %180 = arith.mulf %179, %172 : vector<8x128xf32>
    %181 = arith.addf %169, %180 : vector<8x128xf32>
    %c0_48 = arith.constant 0 : index
    %c17 = arith.constant 17 : index
    %c0_49 = arith.constant 0 : index
    %c0_50 = arith.constant 0 : index
    %182 = vector.load %arg3[%c0_48, %c17, %c0_49, %c0_50] : memref<1x25x8x128xbf16, #tpu.memory_space<vmem>>, vector<1x1x8x128xbf16>
    %183 = vector.shape_cast %182 : vector<1x1x8x128xbf16> to vector<8x128xbf16>
    %184 = arith.extf %183 : vector<8x128xbf16> to vector<8x128xf32>
    %185 = vector.extract_strided_slice %143 {offsets = [9, 0], sizes = [8, 128], strides = [1, 1]} : vector<18x128xf32> to vector<8x128xf32>
    %186 = arith.mulf %185, %184 : vector<8x128xf32>
    %187 = arith.addf %175, %186 : vector<8x128xf32>
    %188 = vector.extract_strided_slice %144 {offsets = [9, 0], sizes = [8, 128], strides = [1, 1]} : vector<18x128xf32> to vector<8x128xf32>
    %189 = arith.mulf %188, %184 : vector<8x128xf32>
    %190 = arith.addf %178, %189 : vector<8x128xf32>
    %191 = vector.extract_strided_slice %145 {offsets = [9, 0], sizes = [8, 128], strides = [1, 1]} : vector<18x128xf32> to vector<8x128xf32>
    %192 = arith.mulf %191, %184 : vector<8x128xf32>
    %193 = arith.addf %181, %192 : vector<8x128xf32>
    %c0_51 = arith.constant 0 : index
    %c22 = arith.constant 22 : index
    %c0_52 = arith.constant 0 : index
    %c0_53 = arith.constant 0 : index
    %194 = vector.load %arg3[%c0_51, %c22, %c0_52, %c0_53] : memref<1x25x8x128xbf16, #tpu.memory_space<vmem>>, vector<1x1x8x128xbf16>
    %195 = vector.shape_cast %194 : vector<1x1x8x128xbf16> to vector<8x128xbf16>
    %196 = arith.extf %195 : vector<8x128xbf16> to vector<8x128xf32>
    %197 = vector.extract_strided_slice %143 {offsets = [10, 0], sizes = [8, 128], strides = [1, 1]} : vector<18x128xf32> to vector<8x128xf32>
    %198 = arith.mulf %197, %196 : vector<8x128xf32>
    %199 = arith.addf %187, %198 : vector<8x128xf32>
    %200 = vector.extract_strided_slice %144 {offsets = [10, 0], sizes = [8, 128], strides = [1, 1]} : vector<18x128xf32> to vector<8x128xf32>
    %201 = arith.mulf %200, %196 : vector<8x128xf32>
    %202 = arith.addf %190, %201 : vector<8x128xf32>
    %203 = vector.extract_strided_slice %145 {offsets = [10, 0], sizes = [8, 128], strides = [1, 1]} : vector<18x128xf32> to vector<8x128xf32>
    %204 = arith.mulf %203, %196 : vector<8x128xf32>
    %205 = arith.addf %193, %204 : vector<8x128xf32>
    %206 = vector.extract_strided_slice %7 {offsets = [0, 129], sizes = [18, 128], strides = [1, 1]} : vector<18x258xf32> to vector<18x128xf32>
    %207 = vector.extract_strided_slice %10 {offsets = [0, 129], sizes = [18, 128], strides = [1, 1]} : vector<18x258xf32> to vector<18x128xf32>
    %208 = vector.extract_strided_slice %13 {offsets = [0, 129], sizes = [18, 128], strides = [1, 1]} : vector<18x258xf32> to vector<18x128xf32>
    %c0_54 = arith.constant 0 : index
    %c3 = arith.constant 3 : index
    %c0_55 = arith.constant 0 : index
    %c0_56 = arith.constant 0 : index
    %209 = vector.load %arg3[%c0_54, %c3, %c0_55, %c0_56] : memref<1x25x8x128xbf16, #tpu.memory_space<vmem>>, vector<1x1x8x128xbf16>
    %210 = vector.shape_cast %209 : vector<1x1x8x128xbf16> to vector<8x128xbf16>
    %211 = arith.extf %210 : vector<8x128xbf16> to vector<8x128xf32>
    %212 = vector.extract_strided_slice %206 {offsets = [6, 0], sizes = [8, 128], strides = [1, 1]} : vector<18x128xf32> to vector<8x128xf32>
    %213 = arith.mulf %212, %211 : vector<8x128xf32>
    %214 = arith.addf %199, %213 : vector<8x128xf32>
    %215 = vector.extract_strided_slice %207 {offsets = [6, 0], sizes = [8, 128], strides = [1, 1]} : vector<18x128xf32> to vector<8x128xf32>
    %216 = arith.mulf %215, %211 : vector<8x128xf32>
    %217 = arith.addf %202, %216 : vector<8x128xf32>
    %218 = vector.extract_strided_slice %208 {offsets = [6, 0], sizes = [8, 128], strides = [1, 1]} : vector<18x128xf32> to vector<8x128xf32>
    %219 = arith.mulf %218, %211 : vector<8x128xf32>
    %220 = arith.addf %205, %219 : vector<8x128xf32>
    %c0_57 = arith.constant 0 : index
    %c8 = arith.constant 8 : index
    %c0_58 = arith.constant 0 : index
    %c0_59 = arith.constant 0 : index
    %221 = vector.load %arg3[%c0_57, %c8, %c0_58, %c0_59] : memref<1x25x8x128xbf16, #tpu.memory_space<vmem>>, vector<1x1x8x128xbf16>
    %222 = vector.shape_cast %221 : vector<1x1x8x128xbf16> to vector<8x128xbf16>
    %223 = arith.extf %222 : vector<8x128xbf16> to vector<8x128xf32>
    %224 = vector.extract_strided_slice %206 {offsets = [7, 0], sizes = [8, 128], strides = [1, 1]} : vector<18x128xf32> to vector<8x128xf32>
    %225 = arith.mulf %224, %223 : vector<8x128xf32>
    %226 = arith.addf %214, %225 : vector<8x128xf32>
    %227 = vector.extract_strided_slice %207 {offsets = [7, 0], sizes = [8, 128], strides = [1, 1]} : vector<18x128xf32> to vector<8x128xf32>
    %228 = arith.mulf %227, %223 : vector<8x128xf32>
    %229 = arith.addf %217, %228 : vector<8x128xf32>
    %230 = vector.extract_strided_slice %208 {offsets = [7, 0], sizes = [8, 128], strides = [1, 1]} : vector<18x128xf32> to vector<8x128xf32>
    %231 = arith.mulf %230, %223 : vector<8x128xf32>
    %232 = arith.addf %220, %231 : vector<8x128xf32>
    %c0_60 = arith.constant 0 : index
    %c13 = arith.constant 13 : index
    %c0_61 = arith.constant 0 : index
    %c0_62 = arith.constant 0 : index
    %233 = vector.load %arg3[%c0_60, %c13, %c0_61, %c0_62] : memref<1x25x8x128xbf16, #tpu.memory_space<vmem>>, vector<1x1x8x128xbf16>
    %234 = vector.shape_cast %233 : vector<1x1x8x128xbf16> to vector<8x128xbf16>
    %235 = arith.extf %234 : vector<8x128xbf16> to vector<8x128xf32>
    %236 = vector.extract_strided_slice %206 {offsets = [8, 0], sizes = [8, 128], strides = [1, 1]} : vector<18x128xf32> to vector<8x128xf32>
    %237 = arith.mulf %236, %235 : vector<8x128xf32>
    %238 = arith.addf %226, %237 : vector<8x128xf32>
    %239 = vector.extract_strided_slice %207 {offsets = [8, 0], sizes = [8, 128], strides = [1, 1]} : vector<18x128xf32> to vector<8x128xf32>
    %240 = arith.mulf %239, %235 : vector<8x128xf32>
    %241 = arith.addf %229, %240 : vector<8x128xf32>
    %242 = vector.extract_strided_slice %208 {offsets = [8, 0], sizes = [8, 128], strides = [1, 1]} : vector<18x128xf32> to vector<8x128xf32>
    %243 = arith.mulf %242, %235 : vector<8x128xf32>
    %244 = arith.addf %232, %243 : vector<8x128xf32>
    %c0_63 = arith.constant 0 : index
    %c18 = arith.constant 18 : index
    %c0_64 = arith.constant 0 : index
    %c0_65 = arith.constant 0 : index
    %245 = vector.load %arg3[%c0_63, %c18, %c0_64, %c0_65] : memref<1x25x8x128xbf16, #tpu.memory_space<vmem>>, vector<1x1x8x128xbf16>
    %246 = vector.shape_cast %245 : vector<1x1x8x128xbf16> to vector<8x128xbf16>
    %247 = arith.extf %246 : vector<8x128xbf16> to vector<8x128xf32>
    %248 = vector.extract_strided_slice %206 {offsets = [9, 0], sizes = [8, 128], strides = [1, 1]} : vector<18x128xf32> to vector<8x128xf32>
    %249 = arith.mulf %248, %247 : vector<8x128xf32>
    %250 = arith.addf %238, %249 : vector<8x128xf32>
    %251 = vector.extract_strided_slice %207 {offsets = [9, 0], sizes = [8, 128], strides = [1, 1]} : vector<18x128xf32> to vector<8x128xf32>
    %252 = arith.mulf %251, %247 : vector<8x128xf32>
    %253 = arith.addf %241, %252 : vector<8x128xf32>
    %254 = vector.extract_strided_slice %208 {offsets = [9, 0], sizes = [8, 128], strides = [1, 1]} : vector<18x128xf32> to vector<8x128xf32>
    %255 = arith.mulf %254, %247 : vector<8x128xf32>
    %256 = arith.addf %244, %255 : vector<8x128xf32>
    %c0_66 = arith.constant 0 : index
    %c23 = arith.constant 23 : index
    %c0_67 = arith.constant 0 : index
    %c0_68 = arith.constant 0 : index
    %257 = vector.load %arg3[%c0_66, %c23, %c0_67, %c0_68] : memref<1x25x8x128xbf16, #tpu.memory_space<vmem>>, vector<1x1x8x128xbf16>
    %258 = vector.shape_cast %257 : vector<1x1x8x128xbf16> to vector<8x128xbf16>
    %259 = arith.extf %258 : vector<8x128xbf16> to vector<8x128xf32>
    %260 = vector.extract_strided_slice %206 {offsets = [10, 0], sizes = [8, 128], strides = [1, 1]} : vector<18x128xf32> to vector<8x128xf32>
    %261 = arith.mulf %260, %259 : vector<8x128xf32>
    %262 = arith.addf %250, %261 : vector<8x128xf32>
    %263 = vector.extract_strided_slice %207 {offsets = [10, 0], sizes = [8, 128], strides = [1, 1]} : vector<18x128xf32> to vector<8x128xf32>
    %264 = arith.mulf %263, %259 : vector<8x128xf32>
    %265 = arith.addf %253, %264 : vector<8x128xf32>
    %266 = vector.extract_strided_slice %208 {offsets = [10, 0], sizes = [8, 128], strides = [1, 1]} : vector<18x128xf32> to vector<8x128xf32>
    %267 = arith.mulf %266, %259 : vector<8x128xf32>
    %268 = arith.addf %256, %267 : vector<8x128xf32>
    %269 = vector.extract_strided_slice %7 {offsets = [0, 130], sizes = [18, 128], strides = [1, 1]} : vector<18x258xf32> to vector<18x128xf32>
    %270 = vector.extract_strided_slice %10 {offsets = [0, 130], sizes = [18, 128], strides = [1, 1]} : vector<18x258xf32> to vector<18x128xf32>
    %271 = vector.extract_strided_slice %13 {offsets = [0, 130], sizes = [18, 128], strides = [1, 1]} : vector<18x258xf32> to vector<18x128xf32>
    %c0_69 = arith.constant 0 : index
    %c4 = arith.constant 4 : index
    %c0_70 = arith.constant 0 : index
    %c0_71 = arith.constant 0 : index
    %272 = vector.load %arg3[%c0_69, %c4, %c0_70, %c0_71] : memref<1x25x8x128xbf16, #tpu.memory_space<vmem>>, vector<1x1x8x128xbf16>
    %273 = vector.shape_cast %272 : vector<1x1x8x128xbf16> to vector<8x128xbf16>
    %274 = arith.extf %273 : vector<8x128xbf16> to vector<8x128xf32>
    %275 = vector.extract_strided_slice %269 {offsets = [6, 0], sizes = [8, 128], strides = [1, 1]} : vector<18x128xf32> to vector<8x128xf32>
    %276 = arith.mulf %275, %274 : vector<8x128xf32>
    %277 = arith.addf %262, %276 : vector<8x128xf32>
    %278 = vector.extract_strided_slice %270 {offsets = [6, 0], sizes = [8, 128], strides = [1, 1]} : vector<18x128xf32> to vector<8x128xf32>
    %279 = arith.mulf %278, %274 : vector<8x128xf32>
    %280 = arith.addf %265, %279 : vector<8x128xf32>
    %281 = vector.extract_strided_slice %271 {offsets = [6, 0], sizes = [8, 128], strides = [1, 1]} : vector<18x128xf32> to vector<8x128xf32>
    %282 = arith.mulf %281, %274 : vector<8x128xf32>
    %283 = arith.addf %268, %282 : vector<8x128xf32>
    %c0_72 = arith.constant 0 : index
    %c9 = arith.constant 9 : index
    %c0_73 = arith.constant 0 : index
    %c0_74 = arith.constant 0 : index
    %284 = vector.load %arg3[%c0_72, %c9, %c0_73, %c0_74] : memref<1x25x8x128xbf16, #tpu.memory_space<vmem>>, vector<1x1x8x128xbf16>
    %285 = vector.shape_cast %284 : vector<1x1x8x128xbf16> to vector<8x128xbf16>
    %286 = arith.extf %285 : vector<8x128xbf16> to vector<8x128xf32>
    %287 = vector.extract_strided_slice %269 {offsets = [7, 0], sizes = [8, 128], strides = [1, 1]} : vector<18x128xf32> to vector<8x128xf32>
    %288 = arith.mulf %287, %286 : vector<8x128xf32>
    %289 = arith.addf %277, %288 : vector<8x128xf32>
    %290 = vector.extract_strided_slice %270 {offsets = [7, 0], sizes = [8, 128], strides = [1, 1]} : vector<18x128xf32> to vector<8x128xf32>
    %291 = arith.mulf %290, %286 : vector<8x128xf32>
    %292 = arith.addf %280, %291 : vector<8x128xf32>
    %293 = vector.extract_strided_slice %271 {offsets = [7, 0], sizes = [8, 128], strides = [1, 1]} : vector<18x128xf32> to vector<8x128xf32>
    %294 = arith.mulf %293, %286 : vector<8x128xf32>
    %295 = arith.addf %283, %294 : vector<8x128xf32>
    %c0_75 = arith.constant 0 : index
    %c14 = arith.constant 14 : index
    %c0_76 = arith.constant 0 : index
    %c0_77 = arith.constant 0 : index
    %296 = vector.load %arg3[%c0_75, %c14, %c0_76, %c0_77] : memref<1x25x8x128xbf16, #tpu.memory_space<vmem>>, vector<1x1x8x128xbf16>
    %297 = vector.shape_cast %296 : vector<1x1x8x128xbf16> to vector<8x128xbf16>
    %298 = arith.extf %297 : vector<8x128xbf16> to vector<8x128xf32>
    %299 = vector.extract_strided_slice %269 {offsets = [8, 0], sizes = [8, 128], strides = [1, 1]} : vector<18x128xf32> to vector<8x128xf32>
    %300 = arith.mulf %299, %298 : vector<8x128xf32>
    %301 = arith.addf %289, %300 : vector<8x128xf32>
    %302 = vector.extract_strided_slice %270 {offsets = [8, 0], sizes = [8, 128], strides = [1, 1]} : vector<18x128xf32> to vector<8x128xf32>
    %303 = arith.mulf %302, %298 : vector<8x128xf32>
    %304 = arith.addf %292, %303 : vector<8x128xf32>
    %305 = vector.extract_strided_slice %271 {offsets = [8, 0], sizes = [8, 128], strides = [1, 1]} : vector<18x128xf32> to vector<8x128xf32>
    %306 = arith.mulf %305, %298 : vector<8x128xf32>
    %307 = arith.addf %295, %306 : vector<8x128xf32>
    %c0_78 = arith.constant 0 : index
    %c19 = arith.constant 19 : index
    %c0_79 = arith.constant 0 : index
    %c0_80 = arith.constant 0 : index
    %308 = vector.load %arg3[%c0_78, %c19, %c0_79, %c0_80] : memref<1x25x8x128xbf16, #tpu.memory_space<vmem>>, vector<1x1x8x128xbf16>
    %309 = vector.shape_cast %308 : vector<1x1x8x128xbf16> to vector<8x128xbf16>
    %310 = arith.extf %309 : vector<8x128xbf16> to vector<8x128xf32>
    %311 = vector.extract_strided_slice %269 {offsets = [9, 0], sizes = [8, 128], strides = [1, 1]} : vector<18x128xf32> to vector<8x128xf32>
    %312 = arith.mulf %311, %310 : vector<8x128xf32>
    %313 = arith.addf %301, %312 : vector<8x128xf32>
    %314 = vector.extract_strided_slice %270 {offsets = [9, 0], sizes = [8, 128], strides = [1, 1]} : vector<18x128xf32> to vector<8x128xf32>
    %315 = arith.mulf %314, %310 : vector<8x128xf32>
    %316 = arith.addf %304, %315 : vector<8x128xf32>
    %317 = vector.extract_strided_slice %271 {offsets = [9, 0], sizes = [8, 128], strides = [1, 1]} : vector<18x128xf32> to vector<8x128xf32>
    %318 = arith.mulf %317, %310 : vector<8x128xf32>
    %319 = arith.addf %307, %318 : vector<8x128xf32>
    %c0_81 = arith.constant 0 : index
    %c24 = arith.constant 24 : index
    %c0_82 = arith.constant 0 : index
    %c0_83 = arith.constant 0 : index
    %320 = vector.load %arg3[%c0_81, %c24, %c0_82, %c0_83] : memref<1x25x8x128xbf16, #tpu.memory_space<vmem>>, vector<1x1x8x128xbf16>
    %321 = vector.shape_cast %320 : vector<1x1x8x128xbf16> to vector<8x128xbf16>
    %322 = arith.extf %321 : vector<8x128xbf16> to vector<8x128xf32>
    %323 = vector.extract_strided_slice %269 {offsets = [10, 0], sizes = [8, 128], strides = [1, 1]} : vector<18x128xf32> to vector<8x128xf32>
    %324 = arith.mulf %323, %322 : vector<8x128xf32>
    %325 = arith.addf %313, %324 : vector<8x128xf32>
    %326 = vector.extract_strided_slice %270 {offsets = [10, 0], sizes = [8, 128], strides = [1, 1]} : vector<18x128xf32> to vector<8x128xf32>
    %327 = arith.mulf %326, %322 : vector<8x128xf32>
    %328 = arith.addf %316, %327 : vector<8x128xf32>
    %329 = vector.extract_strided_slice %271 {offsets = [10, 0], sizes = [8, 128], strides = [1, 1]} : vector<18x128xf32> to vector<8x128xf32>
    %330 = arith.mulf %329, %322 : vector<8x128xf32>
    %331 = arith.addf %319, %330 : vector<8x128xf32>
    %c0_84 = arith.constant 0 : index
    %c0_85 = arith.constant 0 : index
    %c0_86 = arith.constant 0 : index
    %c0_87 = arith.constant 0 : index
    %332 = vector.load %arg4[%c0_84, %c0_85, %c0_86, %c0_87] : memref<1x3x8x128xf32, #tpu.memory_space<vmem>>, vector<1x1x8x128xf32>
    %333 = vector.shape_cast %332 : vector<1x1x8x128xf32> to vector<8x128xf32>
    %334 = vector.shape_cast %325 : vector<8x128xf32> to vector<1x1x8x128xf32>
    tpu.vector_store %arg4[%c0_84, %c0_85, %c0_86, %c0_87], %334 {strides = array<i32>} : memref<1x3x8x128xf32, #tpu.memory_space<vmem>>, vector<1x1x8x128xf32>,
    %c0_88 = arith.constant 0 : index
    %c1_89 = arith.constant 1 : index
    %c0_90 = arith.constant 0 : index
    %c0_91 = arith.constant 0 : index
    %335 = vector.load %arg4[%c0_88, %c1_89, %c0_90, %c0_91] : memref<1x3x8x128xf32, #tpu.memory_space<vmem>>, vector<1x1x8x128xf32>
    %336 = vector.shape_cast %335 : vector<1x1x8x128xf32> to vector<8x128xf32>
    %337 = vector.shape_cast %328 : vector<8x128xf32> to vector<1x1x8x128xf32>
    tpu.vector_store %arg4[%c0_88, %c1_89, %c0_90, %c0_91], %337 {strides = array<i32>} : memref<1x3x8x128xf32, #tpu.memory_space<vmem>>, vector<1x1x8x128xf32>,
    %c0_92 = arith.constant 0 : index
    %c2_93 = arith.constant 2 : index
    %c0_94 = arith.constant 0 : index
    %c0_95 = arith.constant 0 : index
    %338 = vector.load %arg4[%c0_92, %c2_93, %c0_94, %c0_95] : memref<1x3x8x128xf32, #tpu.memory_space<vmem>>, vector<1x1x8x128xf32>
    %339 = vector.shape_cast %338 : vector<1x1x8x128xf32> to vector<8x128xf32>
    %340 = vector.shape_cast %331 : vector<8x128xf32> to vector<1x1x8x128xf32>
    tpu.vector_store %arg4[%c0_92, %c2_93, %c0_94, %c0_95], %340 {strides = array<i32>} : memref<1x3x8x128xf32, #tpu.memory_space<vmem>>, vector<1x1x8x128xf32>,
    return
  }
  func.func @transform_0(%arg0: i32, %arg1: i32) -> (i32, i32, i32, i32) {
    %c0_i32 = arith.constant 0 : i32
    %c0_i32_0 = arith.constant 0 : i32
    %c0_i32_1 = arith.constant 0 : i32
    %c0_i32_2 = arith.constant 0 : i32
    return %arg0, %c0_i32, %c0_i32_0, %c0_i32_1 : i32, i32, i32, i32
  }
  func.func @transform_1(%arg0: i32, %arg1: i32) -> (i32, i32, i32, i32) {
    %c0_i32 = arith.constant 0 : i32
    %c0_i32_0 = arith.constant 0 : i32
    %c0_i32_1 = arith.constant 0 : i32
    return %arg0, %c0_i32, %arg1, %c0_i32_0 : i32, i32, i32, i32
  }
  func.func @transform_2(%arg0: i32, %arg1: i32) -> (i32, i32, i32, i32) {
    %c0_i32 = arith.constant 0 : i32
    %c0_i32_0 = arith.constant 0 : i32
    %c0_i32_1 = arith.constant 0 : i32
    return %arg0, %c0_i32, %arg1, %c0_i32_0 : i32, i32, i32, i32
  }
}

</mosaic_0001>

<bundles_post_ra>
// kernel: local_conv_ds.1
= control target key start
LH: loop header
LB: loop body
LE: loop exit
PB: predicated region body
PF: predicated region fallthrough
CT: control target
= control target key end

     0   :  { %s4884_s0 = inlined_call_operand.hbm [shape: bf16[2,3,16,128], index: 0, kind: input, shape index: {}]   ;;  %s4885_s1 = inlined_call_operand.hbm [shape: bf16[2,25,16,128], index: 1, kind: input, shape index: {}]   ;;  %s4886_s2 = inlined_call_operand.hbm [shape: f32[2,3,16,128], index: 2, kind: output, shape index: {}]  }
   0x1   :  { %4999 = sst [smem:[#allocation109_spill]] %s4884_s0 }
   0x2   :  { %7 = vsyncpa [#allocation4], 0 }
   0x3   :  { %9 = vsyncpa [#allocation4 + $0x1], 0 }
   0x4   :  { %10 = vsyncpa [#allocation7], 0 }
   0x5   :  { %12 = vsyncpa [#allocation7 + $0x1], 0 }
   0x6   :  { %13 = vsyncpa [#allocation5], 0 }
   0x7   :  { %15 = vsyncpa [#allocation5 + $0x1], 0  ;;  %s2915_s9 = smov 0   ;;  %s2917_s10 = smov 0  }
   0x8   :  { %s2919_s11 = smov 0   ;;  %s2921_s12 = smov 0  }
   0x9   :  { %s2923_s13 = smov 0   ;;  %s2925_s14 = smov 0  }
   0xa   :  { %s2927_s15 = smov 0   ;;  %s2929_s16 = smov 0  }
   0xb   :  { %s2931_s17 = smov 0   ;;  %s2933_s18 = smov 0  }
   0xc   :  { %s2935_s19 = smov 0  }
   0xd LB: > { %s2433_s20 = sadd.s32 4294967295, %s2882_s19   ;;  %s33_s21 = sadd.s32 1, %s2878_s18  ;;  %s2882_s19 = sphi %s2935_s19, %s21_s19   ;;  %s2878_s18 = sphi %s2933_s18, %s5277_s18   ;;  %s2874_s17 = sphi %s2931_s17, %s5276_s17   ;;  %s2870_s16 = sphi %s2929_s16, %s5275_s16   ;;  %s2866_s15 = sphi %s2927_s15, %s5274_s15   ;;  %s2862_s14 = sphi %s2925_s14, %s5273_s14   ;;  %s2858_s13 = sphi %s2923_s13, %s5272_s13   ;;  %s2854_s12 = sphi %s2921_s12, %s5271_s12   ;;  %s2850_s11 = sphi %s2919_s11, %s5270_s11   ;;  %s2846_s10 = sphi %s2917_s10, %s5269_s10   ;;  %s2842_s9 = sphi %s2915_s9, %s5268_s9  }
   0xe   : > { %s40_s22 = sadd.s32 1, %s2862_s14  ;;  %p47_p0 = scmp.ne.s32.totalorder %s2862_s14, %s2858_s13 }
   0xf   : > { %p4888_p1 = scmp.eq.s32.totalorder %s2882_s19, 0  ;;  %p53_p2 = scmp.ne.s32.totalorder %s2858_s13, %s2854_s12 }
  0x10   : > { %p2977_p3 = scmp.eq.s32.totalorder %s2433_s20, 0  ;;  %p4887_p5 = scmp.lt.s32.totalorder %s2882_s19, 4 }
  0x11   : > { %p49_p4 = por %p4888_p1, %p47_p0  ;;  %s133_s25 = sand.u32 1, %s2862_s14  }
  0x12   : > { %p2986_p6 = por %p2977_p3, %p53_p2  ;;  %s2509_s26 = smul.u32 24, %s133_s25 }
  0x13   : > { %s2510_s27 = smul.u32 384, %s2878_s18  ;;  %p2994_p7 = pnand %p4887_p5, %p49_p4 }
  0x14   : > { %s5001_s24 = scalar_select %p2986_p6, 1, 0 }
  0x15   : > { %s5003_s0 = sld [smem:[#allocation109_spill]]  ;;  %s137_s4 = scalar_lea.vmem [#allocation3], %s2509_s26 }
  0x16   : > { %s144_s5 = sshll.u32 %s137_s4, 4  ;;  %s3006_s6 = scalar_lea.sflag [#allocation4], %s133_s25  ;;  %s3003_s5 = int_to_ptr.vmem [resolvable:$true] %s144_s5 }
  0x17   : > { %p2698_p10 = pneg %p2994_p7 }
  0x1b   : > { %s3001_s3 = scalar_lea.hbm %s5003_s0, %s2510_s27  ;;  %s2701_s27 = scalar_lea.hbm %s5003_s0, 768 }
  0x1c   : > { %s2696_s7 = scalar_lea.hbm %s3001_s3, 384  ;;  %p2702_p13 = scmp.lt.u32.totalorder %s3001_s3, %s5003_s0 }
  0x1d   : > { %p2697_p9 = scmp.ne.s32.totalorder %s3001_s3, %s2696_s7  ;;  %p2703_p0 = scmp.lt.u32.totalorder %s2701_s27, %s2696_s7 }
  0x1e   : > { %p2705_p4 = scmp.lt.u32.totalorder %s2696_s7, %s3001_s3 }
  0x1f   : > { %p2699_p11 = pnand %p2698_p10, %p2697_p9  ;;  %p2704_p2 = por %p2703_p0, %p2702_p13 }
  0x21   : > { %p2700_p12 = pneg %p2699_p11  ;;  %p2706_p5 = por %p2705_p4, %p2704_p2 }
  0x23   : > { %p2707_p1 = pnand %p2706_p5, %p2700_p12 }
  0x25   : > { %2710 = shalt.err (!%p2707_p1)
}
  0x26   : > { %s2711_s25 = scalar_lea.vmem %s3003_s5, 384  ;;  %s2884_s30 = smov [#allocation3]  }
  0x27   : > { %p2712_p9 = scmp.ne.s32.totalorder %s3003_s5, %s2711_s25  ;;  %s2716_s4 = sshll.u32 %s2884_s30, 4  ;;  %s2717_s4 = int_to_ptr.vmem [resolvable:$false] %s2716_s4 }
  0x28   : > { %s2718_s8 = scalar_lea.vmem %s2717_s4, 768  ;;  %p2719_p6 = scmp.lt.s32.totalorder %s3003_s5, %s2717_s4 }
  0x29   : > { %p2714_p11 = pnand %p2712_p9, %p2698_p10  ;;  %p2720_p13 = scmp.lt.s32.totalorder %s2718_s8, %s2711_s25 }
  0x2b   : > { %p2715_p8 = pneg %p2714_p11  ;;  %p2721_p0 = por %p2720_p13, %p2719_p6 }
  0x2d   : > { %p2722_p2 = pnand %p2721_p0, %p2715_p8 }
  0x2f   : > { %2725 = shalt.err (!%p2722_p2)
}
  0x30   : > { %s4890_s7 = smov 64   ;;  %s4891_s12 = smov 4  }
  0x31   : > { %2526 = dma.hbm_to_vmem [thread:$0]  (!%p2994_p7), %s3001_s3, 384, %s3003_s5, %s3006_s6, %s4890_s7, %s4890_s7, %s4891_s12  }
  0x32   : > { %p174_p1 = scmp.lt.s32.totalorder %s2882_s19, 5  ;;  %p5004_p5 = scmp.ge.s32.totalorder %s2882_s19, 1 }
  0x33   : > { %s2434_s29 = sadd.s32 4294967294, %s2882_s19   ;;  %s30_s26 = sadd.s32 1, %s2874_s17 }
  0x34   : > { %p3040_p6 = pnand %p5004_p5, %p174_p1  ;;  %p31_p8 = scmp.ge.s32.totalorder %s30_s26, 2 }
  0x35   : > { %s68_s25 = sadd.s32 1, %s2850_s11  ;;  %p75_p10 = scmp.ne.s32.totalorder %s2850_s11, %s2846_s10 }
  0x36   : > { %p81_p12 = scmp.ne.s32.totalorder %s2846_s10, %s2842_s9  ;;  %s5279_s26 = smov (%p31_p8, %s30_s26), 0 }
  0x37   : > { %5006 = sst [smem:[#allocation12_spill]] %s5279_s26  ;;  %s5281_s21 = smov (!%p31_p8, %s33_s21), %s2878_s18 }
  0x38   : > { %s64_s28 = ssub.s32 %s2874_s17, %s5279_s26  ;;  %p5007_p7 = scmp.eq.s32.totalorder %s2882_s19, 0 }
  0x39   : > { %p35_p9 = scmp.ge.s32.totalorder %s5281_s21, 2  ;;  %p3066_p11 = por %p81_p12, %p2977_p3 }
  0x3a   : > { %p3060_p4 = por %p75_p10, %p5007_p7  ;;  %p107_p13 = scmp.eq.s32.totalorder %s2433_s20, 3 }
  0x3b   : > { %s5009_s5 = scalar_select %p3066_p11, 1, 0 }
  0x3c   : > { %p113_p0 = scmp.eq.s32.totalorder %s2434_s29, 3  ;;  %s5283_s21 = smov (%p35_p9, %s5281_s21), 0 }
  0x3d   : > { %5010 = sst [smem:[#allocation13_spill]] %s5283_s21  ;;  %p3074_p2 = por %p107_p13, %p75_p10 }
  0x3e   : > { %p3078_p1 = por %p113_p0, %p81_p12  ;;  %s37_s23 = ssub.s32 %s2878_s18, %s5283_s21 }
  0x3f   : > { %s5011_s6 = scalar_select %p3074_p2, 1, 0 }
  0x40   : > { %s5012_s30 = scalar_select %p3078_p1, 1, 0 }
  0x41   : > { %s154_s4 = sand.u32 1, %s2850_s11   ;;  %p38_p3 = scmp.eq.s32.totalorder %s37_s23, 0 }
  0x42   : > { %5013 = sst [smem:[#allocation14_spill]] %s5012_s30  ;;  %s65_s8 = sor.u32 %s64_s28, %s37_s23 }
  0x43   : > { %p66_p5 = scmp.eq.s32.totalorder %s65_s8, 0  ;;  %s2511_s29 = smul.u32 100, %s154_s4 }
  0x44   : > { %s3088_s7 = scalar_select %p38_p3, %s2862_s14, %s40_s22  }
  0x45   : > { %s3091_s20 = scalar_select %p66_p5, %s2850_s11, %s68_s25  }
  0x46   : > { %p5014_p8 = scmp.lt.s32.totalorder %s2882_s19, 4  ;;  %s2512_s0 = smul.u32 50, %s2878_s18 }
  0x47   : > { %s158_s26 = scalar_lea.vmem [#allocation6], %s2511_s29  ;;  %s3110_s3 = scalar_lea.sflag [#allocation7], %s154_s4 }
  0x48   : > { %p3097_p10 = pnand %p5014_p8, %p3060_p4  ;;  %s163_s21 = sadd.s32 %s2874_s17, %s2512_s0 }
  0x49   : > { %s166_s30 = sshll.u32 %s158_s26, 4  ;;  %s2438_s28 = sshll.u32 %s163_s21, 6  ;;  %s3103_s30 = int_to_ptr.vmem [resolvable:$true] %s166_s30 }
  0x4a   : > { %s3108_s25 = scalar_lea.hbm %s4885_s1, %s2438_s28  ;;  %p2728_p7 = pneg %p3097_p10 }
  0x4b   : > { %s2726_s8 = scalar_lea.hbm %s3108_s25, 1600  ;;  %s2731_s26 = scalar_lea.hbm %s4885_s1, 6400 }
  0x4c   : > { %p2727_p12 = scmp.ne.s32.totalorder %s3108_s25, %s2726_s8  ;;  %p2732_p13 = scmp.lt.u32.totalorder %s3108_s25, %s4885_s1 }
  0x4d   : > { %p2733_p0 = scmp.lt.u32.totalorder %s2731_s26, %s2726_s8  ;;  %p2735_p5 = scmp.lt.u32.totalorder %s2726_s8, %s3108_s25 }
  0x4e   : > { %p2729_p4 = pnand %p2728_p7, %p2727_p12 }
  0x4f   : > { %p2734_p3 = por %p2733_p0, %p2732_p13 }
  0x50   : > { %p2730_p9 = pneg %p2729_p4 }
  0x51   : > { %p2736_p8 = por %p2735_p5, %p2734_p3 }
  0x53   : > { %p2737_p1 = pnand %p2736_p8, %p2730_p9 }
  0x55   : > { %2740 = shalt.err (!%p2737_p1)
}
  0x56   : > { %s2741_s4 = scalar_lea.vmem %s3103_s30, 1600  ;;  %s2887_s22 = smov [#allocation6]  }
  0x57   : > { %p2742_p12 = scmp.ne.s32.totalorder %s3103_s30, %s2741_s4  ;;  %s2746_s23 = sshll.u32 %s2887_s22, 4  ;;  %s2747_s23 = int_to_ptr.vmem [resolvable:$false] %s2746_s23 }
  0x58   : > { %s2748_s0 = scalar_lea.vmem %s2747_s23, 3200  ;;  %p2749_p11 = scmp.lt.s32.totalorder %s3103_s30, %s2747_s23 }
  0x59   : > { %p2744_p4 = pnand %p2742_p12, %p2728_p7  ;;  %p2750_p13 = scmp.lt.s32.totalorder %s2748_s0, %s2741_s4 }
  0x5b   : > { %p2745_p2 = pneg %p2744_p4  ;;  %p2751_p0 = por %p2750_p13, %p2749_p11 }
  0x5d   : > { %p2752_p3 = pnand %p2751_p0, %p2745_p2 }
  0x5f   : > { %2755 = shalt.err (!%p2752_p3)
}
  0x60   : > { %s2888_s8 = smov 128   ;;  %s5016_s21 = smov 4  }
  0x61   : > { %s5017_s26 = smov 64   ;;  %178 = sbr.rel (%p3040_p6) target bundleno = 1207 (0x4b7), region = 28 }
  0x62   : > { %2529 = dma.hbm_to_vmem [thread:$0]  (!%p3097_p10), %s3108_s25, 1600, %s3103_s30, %s3110_s3, %s2888_s8, %s5017_s26, %s5016_s21  }
  0x68   : > { %s180_s29 = sand.u32 1, %s2858_s13   ;;  %p5018_p11 = scmp.ne.s32.totalorder %s5001_s24, 0 }
  0x69   : > { %s2513_s28 = smul.u32 24, %s180_s29  ;;  %s181_s4 = scalar_lea.sflag [#allocation4], %s180_s29 }
  0x6b   : > { %s184_s22 = scalar_lea.vmem [#allocation3], %s2513_s28 }
  0x6c   : > { %2829 = dma.done.wait (%p5018_p11), %s181_s4, 384  }
  0x6d   : > { %2831 = vsyncadd (%p5018_p11), %s181_s4, 4294966912  ;;  %s3148_s12 = sand.u32 1, %s2846_s10   ;;  %p5019_p6 = scmp.ne.s32.totalorder %s5009_s5, 0 }
  0x6e   : > { %s2514_s30 = smul.u32 100, %s3148_s12  ;;  %s190_s27 = scalar_lea.sflag [#allocation7], %s3148_s12 }
  0x70   : > { %s3152_s25 = scalar_lea.vmem [#allocation6], %s2514_s30 }
  0x71   : > { %2833 = dma.done.wait (%p5019_p6), %s190_s27, 1600  }
  0x72   : > { %2835 = vsyncadd (%p5019_p6), %s190_s27, 4294965696  ;;  %s2515_s3 = smul.u32 24, %s3148_s12  ;;  %p2440_p2 = scmp.ne.s32.totalorder %s2866_s15, 0 }
  0x73   : > { %vm225_vm0 = vcmask (!%p2440_p2), 15360   ;;  %vm235_vm1 = vcmask (!%p2440_p2), 9216   ;;  %v2496_v0 = vld [vmem:[%s184_s22] sm:$0xff] (!%p2440_p2)   ;;  %v2507_v1 = vld [vmem:[%s184_s22 + $0x8] sm:$0xff] (!%p2440_p2)   ;;  %v2508_v2 = vld [vmem:[%s184_s22 + $0x10] sm:$0xff] (!%p2440_p2)   ;;  %v2889_v3 = vmov (!%p2440_p2), 0.0  }
  0x74   : > { %s3159_s23 = scalar_lea.vmem [#allocation8], %s2515_s3  ;;  %222 = sbr.rel (%p2440_p2) target bundleno = 134 (0x86), region = 40  ;;  %223 = vst [vmem:[#allocation2] sm:$0xff] (!%p2440_p2), %v2889_v3  ;;  %224 = vst [vmem:[#allocation2 + $0x8] sm:$0xff] (!%p2440_p2), %v2889_v3  ;;  %v2497_v4 = vunpack.c.l.bf16 (!%p2440_p2), %v2496_v0  ;;  %v2498_v5 = vunpack.c.h.bf16 (!%p2440_p2), %v2496_v0  ;;  %v2501_v6 = vunpack.c.l.bf16 (!%p2440_p2), %v2507_v1  ;;  %v2502_v7 = vunpack.c.h.bf16 (!%p2440_p2), %v2507_v1 }
  0x75   : > { %227 = vst [vmem:[#allocation2 + $0x18] sm:$0xff] (!%p2440_p2), %v2889_v3  ;;  %230 = vst [vmem:[#allocation2 + $0x30] sm:$0xff] (!%p2440_p2), %v2889_v3  ;;  %v2505_v8 = vunpack.c.l.bf16 (!%p2440_p2), %v2508_v2  ;;  %v2506_v9 = vunpack.c.h.bf16 (!%p2440_p2), %v2508_v2 }
  0x76   : > { %233 = vst [vmem:[#allocation2 + $0x48] sm:$0x3] (!%p2440_p2), %v2889_v3  ;;  %234 = vst [vmem:[#allocation2 + $0x50] sm:$0x3] (!%p2440_p2), %v2889_v3 }
  0x77   : > { %237 = vst [vmem:[#allocation2 + $0x60] sm:$0xff] (!%p2440_p2), %v2889_v3  ;;  %238 = vst [vmem:[#allocation2 + $0x68] sm:$0xff] (!%p2440_p2), %v2889_v3 }
  0x78   : > { %240 = vst [vmem:[#allocation2 + $0x78] sm:$0xff] (!%p2440_p2), %v2889_v3  ;;  %243 = vst [vmem:[#allocation2 + $0x90] sm:$0xff] (!%p2440_p2), %v2889_v3 }
  0x79   : > { %246 = vst [vmem:[#allocation2 + $0xa8] sm:$0x3] (!%p2440_p2), %v2889_v3  ;;  %247 = vst [vmem:[#allocation2 + $0xb0] sm:$0x3] (!%p2440_p2), %v2889_v3 }
  0x7a   : > { %249 = vst [vmem:[#allocation2 + $0xc0] sm:$0xff] (!%p2440_p2), %v2889_v3  ;;  %250 = vst [vmem:[#allocation2 + $0xc8] sm:$0xff] (!%p2440_p2), %v2889_v3 }
  0x7b   : > { %252 = vst [vmem:[#allocation2 + $0xd8] sm:$0xff] %v2889_v3  ;;  %255 = vst [vmem:[#allocation2 + $0xf0] sm:$0xff] %v2889_v3 }
  0x7c   : > { %258 = vst [vmem:[#allocation2 + $0x108] sm:$0x3] %v2889_v3  ;;  %259 = vst [vmem:[#allocation2 + $0x110] sm:$0x3] %v2889_v3 }
  0x7d   : > { %226 = vst.msk [vmem:[#allocation2 + $0x10] sm:$0xff] %vm225_vm0, %v2889_v3  ;;  %229 = vst.msk [vmem:[#allocation2 + $0x28] sm:$0xff] %vm225_vm0, %v2889_v3 }
  0x7e   : > { %232 = vst.msk [vmem:[#allocation2 + $0x40] sm:$0xff] %vm225_vm0, %v2889_v3  ;;  %239 = vst.msk [vmem:[#allocation2 + $0x70] sm:$0xff] %vm225_vm0, %v2889_v3 }
  0x7f   : > { %242 = vst.msk [vmem:[#allocation2 + $0x88] sm:$0xff] %vm225_vm0, %v2889_v3  ;;  %245 = vst.msk [vmem:[#allocation2 + $0xa0] sm:$0xff] %vm225_vm0, %v2889_v3 }
  0x80   : > { %251 = vst.msk [vmem:[#allocation2 + $0xd0] sm:$0xff] %vm225_vm0, %v2889_v3  ;;  %254 = vst.msk [vmem:[#allocation2 + $0xe8] sm:$0xff] %vm225_vm0, %v2889_v3 }
  0x81   : > { %257 = vst.msk [vmem:[#allocation2 + $0x100] sm:$0xff] %vm225_vm0, %v2889_v3  ;;  %273 = vst [vmem:[#allocation2 + $0x20] sm:$0xff] %v2497_v4 }
  0x82   : > { %236 = vst.msk [vmem:[#allocation2 + $0x58] sm:$0x3] %vm235_vm1, %v2889_v3  ;;  %248 = vst.msk [vmem:[#allocation2 + $0xb8] sm:$0x3] %vm235_vm1, %v2889_v3 }
  0x83   : > { %260 = vst.msk [vmem:[#allocation2 + $0x118] sm:$0x3] %vm235_vm1, %v2889_v3  ;;  %274 = vst [vmem:[#allocation2 + $0x38] sm:$0xff] %v2498_v5 }
  0x84   : > { %275 = vst [vmem:[#allocation2 + $0x80] sm:$0xff] %v2501_v6  ;;  %276 = vst [vmem:[#allocation2 + $0x98] sm:$0xff] %v2502_v7 }
  0x85   : > { %277 = vst [vmem:[#allocation2 + $0xe0] sm:$0xff] %v2505_v8  ;;  %278 = vst [vmem:[#allocation2 + $0xf8] sm:$0xff] %v2506_v9 }
  0x86 PF: > { %v2466_v10 = vld [vmem:[%s3152_s25 + $0x50] sm:$0xff]   ;;  %v318_v11 = vld [vmem:[%s3152_s25] sm:$0xff]   ;;  %v2464_v17 = vld [vmem:[%s3152_s25 + $0x28] sm:$0xff]   ;;  %s2441_s24 = sshll.u32 %s2866_s15, 3  ;;  %s2890_s8 = smov 126   ;;  %vm365_vm2 = vcmask 1046528  }
  0x87   : > { %v2463_v12 = vld [vmem:[%s3152_s25 + $0x14] sm:$0xff]   ;;  %v544_v13 = vunpack.c.l.bf16 %v2466_v10  ;;  %v319_v14 = vunpack.c.l.bf16 %v318_v11  ;;  %v619_v16 = vunpack.c.h.bf16 %v318_v11  ;;  %v2465_v18 = vld [vmem:[%s3152_s25 + $0x3c] sm:$0xff]   ;;  %v426_v20 = vunpack.c.l.bf16 %v2464_v17  ;;  %s280_s5 = sshra.s32 %s2441_s24, 3  ;;  %s2891_s21 = smov 127  }
  0x88   : > { %v351_v15 = vunpack.c.l.bf16 %v2463_v12  ;;  %v706_v19 = vunpack.c.h.bf16 %v2463_v12  ;;  %v469_v21 = vunpack.c.l.bf16 %v2465_v18  ;;  %v3181_v22 = vld [vmem:[%s3152_s25 + $0x8] ss:$20 sps:$4 sm:$0xff]   ;;  %s2494_s0 = smul.u32 24, %s280_s5  ;;  %v868_v29 = vunpack.c.h.bf16 %v2465_v18  ;;  %s2892_s29 = smov 1  }
  0x89   : > { %v546_v23 = vrot.slane %v544_v13, 6  ;;  %v321_v24 = vrot.slane %v319_v14, 2  ;;  %v621_v26 = vrot.slane %v619_v16, 2  ;;  %v972_v31 = vunpack.c.h.bf16 %v2466_v10  ;;  %s2893_s28 = smov 125   ;;  %s2894_s4 = smov 2  }
  0x8a   : > { %v353_v25 = vrot.slane %v351_v15, 1  ;;  %v708_v27 = vrot.slane %v706_v19, 1  ;;  %v471_v28 = vrot.slane %v469_v21, 7  ;;  %v1076_v32 = vunpack.c.l.bf16 %v3181_v22  ;;  %s3189_s26 = scalar_lea.vmem [#allocation2], %s2494_s0  ;;  %s2895_s22 = smov 124  }
  0x8b   : > { %547 = vrot.lane.b32.xlu1 %v546_v23, %s2890_s8  ;;  %v810_v35 = vunpack.c.h.bf16 %v2464_v17  ;;  %v870_v36 = vrot.slane %v868_v29, 7  ;;  %v974_v37 = vrot.slane %v972_v31, 6  ;;  %vm558_vm3 = vcmask 1043456   ;;  %s2516_s30 = smul.u32 6, %s2870_s16  ;;  %p5263_p10 = scmp.ne.s32.totalorder %s5011_s6, 0 }
  0x8c   : > { %v2637_v30 = vpack.i.bf16 %v353_v25, %v321_v24  ;;  %v2647_v33 = vpack.i.bf16 %v708_v27, %v621_v26  ;;  %v2642_v34 = vpack.i.bf16 %v471_v28, %v426_v20  ;;  %v3187_v38 = vrot.slane %v1076_v32, 2  ;;  %v3192_v39 = vld [vmem:[%s3189_s26 + $0x20] sm:$0xff]  ;;  %v3196_v41 = vld [vmem:[%s3189_s26 + $0x8] sm:$0xff]  ;;  %v3228_v55 = vld [vmem:[%s3189_s26 + $0x18] sm:$0xff] }
  0x8d   : > { %v2652_v40 = vpack.i.bf16 %v870_v36, %v810_v35  ;;  %v3205_v44 = vld [vmem:[%s3189_s26 + $0x80] sm:$0xff]  ;;  %v3208_v45 = vld [vmem:[%s3189_s26 + $0x68] sm:$0xff]  ;;  %v3242_v62 = vld [vmem:[%s3189_s26 + $0x78] sm:$0xff]  ;;  %vm483_vm4 = vcmask 1044480   ;;  %vm641_vm5 = vcmask 1039360   ;;  %vm1350_vm6 = vcmask 1022976   ;;  %s2309_s27 = sadd.s32 %s2866_s15, %s2516_s30 }
  0x8e   : > { %2638 = vrot.lane.b32.xlu0 %v2637_v30, %s2890_s8  ;;  %v1081_v42 = vmul.f32 %v3187_v38, %v3192_v39  ;;  %v1080_v43 = vmul.f32 %v3187_v38, %v3196_v41  ;;  %v1095_v46 = vmul.f32 %v3205_v44, %v3187_v38  ;;  %v1094_v47 = vmul.f32 %v3208_v45, %v3187_v38  ;;  %v3221_v50 = vld [vmem:[%s3189_s26] sm:$0xff]  ;;  %v3249_v2 = vld [vmem:[%s3189_s26 + $0xc8] sm:$0xff]  ;;  %v3267_v10 = vld [vmem:[%s3189_s26 + $0xd8] sm:$0xff]  ;;  %s2491_s3 = sshll.u32 %s2309_s27, 7  ;;  %s2298_s15 = scalar_lea.sflag [#allocation5], %s3148_s12 }
  0x8f   : > { %2648 = vrot.lane.b32.xlu1 %v2647_v33, %s2891_s21  ;;  %v3233_v58 = vld [vmem:[%s3189_s26 + $0x60] sm:$0xff]  ;;  %v3280_v18 = vld [vmem:[%s3189_s26 + $0x30] sm:$0x3]  ;;  %vm1807_vm7 = vcmask 1014784   ;;  %vm2252_vm8 = vcmask 15360   ;;  %s4819_s5 = scalar_lea.hbm %s4886_s2, %s2491_s3 }
  0x90   : > { %v3252_v3 = vld [vmem:[%s3189_s26 + $0xc0] sm:$0xff] }
  0x91   : > { %v3264_v9 = vld [vmem:[%s3189_s26 + $0xe0] sm:$0xff] }
  0x92   : > { %2643 = vrot.lane.b32.xlu0 %v2642_v34, %s2890_s8 }
  0x93   : > { %975 = vrot.lane.b32.xlu1 %v974_v37, %s2891_s21 }
  0x96   : > { %2653 = vrot.lane.b32.xlu0 %v2652_v40, %s2891_s21 }
  0x97   : > { %1086 = vrot.lane.b32.xlu1 %v1081_v42, %s2890_s8 }
  0x9a   : > { %1084 = vrot.lane.b32.xlu0 %v1080_v43, %s2890_s8 }
  0x9b   : > { %1100 = vrot.lane.b32.xlu1 %v1095_v46, %s2890_s8 }
  0x9e   : > { %1098 = vrot.lane.b32.xlu0 %v1094_v47, %s2890_s8 }
  0xfd   : > { %v3218_v48 = vpop.permute.xlu1 %547 }
  0xfe   : > { %5020 = vst [vmem:[#allocation15_spill] sm:$0xff] %v3218_v48  ;;  %v550_v21 = vmul.f32 %v3218_v48, %v3228_v55  ;;  %v552_v30 = vmul.f32 %v3218_v48, %v3280_v18 }
 0x100   : > { %v2639_v54 = vpop.permute.xlu0 %2638  ;;  %v559_v33 = vrot.slane %v550_v21, 4  ;;  %v561_v46 = vrot.slane %v552_v30, 4 }
 0x101   : > { %v2649_v49 = vpop.permute.xlu1 %2648  ;;  %v3273_v15 = vunpack.i.h.bf16 %v2639_v54  ;;  %v3290_v27 = vunpack.i.l.bf16 %v2639_v54 }
 0x102   : > { %v2650_v51 = vunpack.i.l.bf16 %v2649_v49  ;;  %v3282_v19 = vunpack.i.h.bf16 %v2649_v49 }
 0x103   : > { %5021 = vst [vmem:[#allocation16_spill] sm:$0xff] %v3273_v15  ;;  %v357_v20 = vmul.f32 %v3273_v15, %v3221_v50  ;;  %5022 = vst [vmem:[#allocation17_spill] sm:$0xff] %v3290_v27  ;;  %v359_v37 = vmul.f32 %v3273_v15, %v3228_v55  ;;  %v325_v40 = vmul.f32 %v3290_v27, %v3221_v50 }
 0x104   : > { %v626_v52 = vmul.f32 %v2650_v51, %v3196_v41  ;;  %v625_v53 = vmul.f32 %v2650_v51, %v3221_v50  ;;  %v628_v56 = vmul.f32 %v2650_v51, %v3192_v39  ;;  %v627_v57 = vmul.f32 %v2650_v51, %v3228_v55  ;;  %v2644_v59 = vpop.permute.xlu0 %2643 }
 0x105   : > { %v653_v60 = vmul.f32 %v2650_v51, %v3208_v45  ;;  %v652_v61 = vmul.f32 %v2650_v51, %v3233_v58  ;;  %v655_v0 = vmul.f32 %v2650_v51, %v3205_v44  ;;  %v654_v1 = vmul.f32 %v2650_v51, %v3242_v62 }
 0x106   : > { %635 = vrot.lane.b32.xlu1 %v626_v52, %s2891_s21  ;;  %633 = vrot.lane.b32.xlu0 %v625_v53, %s2891_s21  ;;  %v679_v5 = vmul.f32 %v2650_v51, %v3249_v2  ;;  %v678_v6 = vmul.f32 %v2650_v51, %v3252_v3  ;;  %v681_v11 = vmul.f32 %v2650_v51, %v3264_v9  ;;  %v3292_v28 = vunpack.i.h.bf16 %v2644_v59 }
 0x107   : > { %v680_v12 = vmul.f32 %v2650_v51, %v3267_v10  ;;  %v3294_v29 = vunpack.i.l.bf16 %v2644_v59  ;;  %v366_v31 = vrot.slane %v357_v20, 1  ;;  %v3302_v32 = vmul.f32 %v3282_v19, %v3192_v39 }
 0x108   : > { %v3244_v63 = vpop.permute.xlu0 %2653  ;;  %5023 = vst [vmem:[#allocation18_spill] sm:$0xff] %v3292_v28  ;;  %v3306_v36 = vmul.f32 %v3282_v19, %v3228_v55  ;;  %v475_v43 = vmul.f32 %v3292_v28, %v3228_v55  ;;  %v367_v47 = vrot.slane %v359_v37, 1  ;;  %v327_v49 = vmul.f32 %v3290_v27, %v3228_v55 }
 0x109   : > { %v2655_v4 = vunpack.i.l.bf16 %v3244_v63  ;;  %5024 = vst [vmem:[#allocation19_spill] sm:$0xff] %v3294_v29  ;;  %v431_v42 = vmul.f32 %v3294_v29, %v3228_v55  ;;  %v3322_v51 = vmul.f32 %v3282_v19, %v3205_v44  ;;  %v3326_v52 = vmul.f32 %v3282_v19, %v3242_v62 }
 0x10a   : > { %639 = vrot.lane.b32.xlu1 %v628_v56, %s2891_s21  ;;  %637 = vrot.lane.b32.xlu0 %v627_v57, %s2891_s21  ;;  %v4911_v54 = vrot.slane %v3302_v32, 1  ;;  %v4909_v56 = vrot.slane %v3306_v36, 1  ;;  %v368_v57 = vsel %vm365_vm2, %v366_v31, %v367_v47  ;;  %v378_v59 = vadd.f32 %v367_v47, %v327_v49  ;;  %v3401_v47 = vld [vmem:[%s3189_s26 + $0x90] sm:$0x3] }
 0x10b   : > { %v815_v7 = vmul.f32 %v2655_v4, %v3228_v55  ;;  %v816_v8 = vmul.f32 %v2655_v4, %v3192_v39  ;;  %v832_v16 = vmul.f32 %v2655_v4, %v3242_v62  ;;  %v833_v17 = vmul.f32 %v2655_v4, %v3205_v44 }
 0x10c   : > { %v849_v25 = vmul.f32 %v2655_v4, %v3267_v10  ;;  %v850_v26 = vmul.f32 %v2655_v4, %v3264_v9  ;;  %v435_v53 = vrot.slane %v431_v42, 2  ;;  %v380_v4 = vmul.f32 %v3273_v15, %v3233_v58 }
 0x10d   : > { %v819_v13 = vrot.slane %v815_v7, 2  ;;  %v820_v14 = vrot.slane %v816_v8, 2  ;;  %v836_v23 = vrot.slane %v832_v16, 2  ;;  %v837_v24 = vrot.slane %v833_v17, 2 }
 0x10e   : > { %662 = vrot.lane.b32.xlu1 %v653_v60, %s2891_s21  ;;  %660 = vrot.lane.b32.xlu0 %v652_v61, %s2891_s21  ;;  %v853_v34 = vrot.slane %v849_v25, 2  ;;  %v854_v35 = vrot.slane %v850_v26, 2  ;;  %v484_v60 = vrot.slane %v475_v43, 3  ;;  %v376_v61 = vadd.f32 %v368_v57, %v325_v40 }
 0x10f   : > { %v3347_v7 = vunpack.i.h.bf16 %v3244_v63  ;;  %v333_v20 = vmul.f32 %v3290_v27, %v3233_v58  ;;  %v388_v21 = vrot.slane %v380_v4, 1  ;;  %v382_v30 = vmul.f32 %v3273_v15, %v3242_v62 }
 0x110   : > { %v439_v8 = vadd.f32 %v435_v53, %v376_v61  ;;  %v498_v37 = vmul.f32 %v3292_v28, %v3242_v62  ;;  %v573_v42 = vmul.f32 %v3242_v62, %v3218_v48  ;;  %v335_v61 = vmul.f32 %v3290_v27, %v3242_v62 }
 0x111   : > { %v3371_v25 = vmul.f32 %v3347_v7, %v3192_v39  ;;  %v389_v40 = vrot.slane %v382_v30, 1  ;;  %v3394_v43 = vmul.f32 %v3347_v7, %v3242_v62 }
 0x112   : > { %666 = vrot.lane.b32.xlu1 %v655_v0, %s2891_s21  ;;  %664 = vrot.lane.b32.xlu0 %v654_v1, %s2891_s21  ;;  %v477_v0 = vmul.f32 %v3292_v28, %v3280_v18  ;;  %v562_v1 = vsel %vm558_vm3, %v559_v33, %v561_v46  ;;  %v494_v16 = vadd.f32 %v484_v60, %v439_v8  ;;  %v581_v4 = vrot.slane %v573_v42, 4 }
 0x113   : > { %v3398_v46 = vmul.f32 %v3347_v7, %v3205_v44  ;;  %v390_v49 = vsel %vm365_vm2, %v388_v21, %v389_v40  ;;  %v4902_v57 = vrot.slane %v3371_v25, 3  ;;  %v575_v8 = vmul.f32 %v3401_v47, %v3218_v48 }
 0x114   : > { %v3373_v26 = vadd.f32 %v559_v33, %v494_v16  ;;  %v3423_v16 = vmul.f32 %v3347_v7, %v3267_v10 }
 0x115   : > { %v4899_v21 = vrot.slane %v3398_v46, 3 }
 0x116   : > { %688 = vrot.lane.b32.xlu1 %v679_v5, %s2891_s21  ;;  %686 = vrot.lane.b32.xlu0 %v678_v6, %s2891_s21  ;;  %v3344_v5 = vmul.f32 %v3282_v19, %v3264_v9  ;;  %v441_v6 = vadd.f32 %v435_v53, %v378_v59  ;;  %5025 = vst [vmem:[#allocation20_spill] sm:$0xff] %v3373_v26 }
 0x117   : > { %v398_v59 = vadd.f32 %v390_v49, %v333_v20  ;;  %v400_v20 = vadd.f32 %v389_v40, %v335_v61 }
 0x118   : > { %v4906_v63 = vrot.slane %v3344_v5, 1 }
 0x11a   : > { %692 = vrot.lane.b32.xlu1 %v681_v11, %s2891_s21  ;;  %690 = vrot.lane.b32.xlu0 %v680_v12, %s2891_s21  ;;  %v486_v11 = vrot.slane %v477_v0, 3  ;;  %v4908_v12 = vrot.slane %v3322_v51, 1  ;;  %v3414_v0 = vpop.permute.xlu1 %975 }
 0x11b   : > { %v3434_v42 = vmul.f32 %v3414_v0, %v3192_v39  ;;  %v3438_v49 = vmul.f32 %v3414_v0, %v3228_v55 }
 0x11c   : > { %v487_v17 = vsel %vm483_vm4, %v484_v60, %v486_v11  ;;  %v506_v60 = vrot.slane %v498_v37, 3  ;;  %v4901_v11 = vrot.slane %v3394_v43, 3  ;;  %v402_v37 = vmul.f32 %v3273_v15, %v3252_v3 }
 0x11e   : > { %821 = vrot.lane.b32.xlu1 %v819_v13, %s2891_s21  ;;  %823 = vrot.lane.b32.xlu0 %v820_v14, %s2891_s21  ;;  %v4907_v13 = vrot.slane %v3326_v52, 1  ;;  %v3353_v14 = vmul.f32 %v3282_v19, %v3267_v10 }
 0x120   : > { %v4905_v31 = vrot.slane %v3353_v14, 1 }
 0x122   : > { %838 = vrot.lane.b32.xlu1 %v836_v23, %s2891_s21  ;;  %840 = vrot.lane.b32.xlu0 %v837_v24, %s2891_s21  ;;  %v496_v23 = vadd.f32 %v487_v17, %v441_v6  ;;  %v3367_v24 = vmul.f32 %v3347_v7, %v3228_v55  ;;  %v500_v6 = vmul.f32 %v3292_v28, %v3401_v47 }
 0x123   : > { %v3427_v17 = vmul.f32 %v3347_v7, %v3264_v9 }
 0x124   : > { %v4904_v53 = vrot.slane %v3367_v24, 3  ;;  %v508_v30 = vrot.slane %v500_v6, 3 }
 0x125   : > { %v4897_v55 = vrot.slane %v3427_v17, 3 }
 0x126   : > { %855 = vrot.lane.b32.xlu1 %v853_v34, %s2891_s21  ;;  %857 = vrot.lane.b32.xlu0 %v854_v35, %s2891_s21  ;;  %v3378_v34 = vadd.f32 %v562_v1, %v496_v23  ;;  %v443_v35 = vmul.f32 %v3294_v29, %v3242_v62  ;;  %v509_v61 = vsel %vm483_vm4, %v506_v60, %v508_v30 }
 0x127   : > { %v3468_v30 = vmul.f32 %v3242_v62, %v3414_v0  ;;  %v3486_v62 = vmul.f32 %v3264_v9, %v3414_v0 }
 0x128   : > { %5026 = vst [vmem:[#allocation21_spill] sm:$0xff] %v3378_v34  ;;  %v447_v33 = vrot.slane %v443_v35, 2  ;;  %v583_v35 = vrot.slane %v575_v8, 4  ;;  %v4898_v8 = vrot.slane %v3423_v16, 3  ;;  %v3828_v34 = vld [vmem:[%s3189_s26 + $0x10] sm:$0xff] }
 0x129   : > { %5087 = vst [vmem:[#allocation65_spill] sm:$0xff] %v3828_v34 }
 0x12a   : > { %732 = vrot.lane.b32.xlu1 %v4911_v54, %s2891_s21  ;;  %730 = vrot.lane.b32.xlu0 %v4909_v56, %s2891_s21  ;;  %v451_v1 = vadd.f32 %v447_v33, %v398_v59  ;;  %v453_v59 = vadd.f32 %v447_v33, %v400_v20  ;;  %v410_v20 = vrot.slane %v402_v37, 1  ;;  %v455_v37 = vmul.f32 %v3294_v29, %v3267_v10 }
 0x12c   : > { %v516_v23 = vadd.f32 %v506_v60, %v451_v1  ;;  %v584_v1 = vsel %vm558_vm3, %v581_v4, %v583_v35  ;;  %v518_v6 = vadd.f32 %v509_v61, %v453_v59  ;;  %v4900_v60 = vrot.slane %v3434_v42, 4 }
 0x12d   : > { %v404_v35 = vmul.f32 %v3273_v15, %v3267_v10  ;;  %v341_v59 = vmul.f32 %v3290_v27, %v3252_v3  ;;  %v520_v61 = vmul.f32 %v3292_v28, %v3267_v10 }
 0x12e   : > { %764 = vrot.lane.b32.xlu1 %v4908_v12, %s2891_s21  ;;  %762 = vrot.lane.b32.xlu0 %v4907_v13, %s2891_s21  ;;  %v3446_v40 = vadd.f32 %v581_v4, %v516_v23  ;;  %v3452_v33 = vadd.f32 %v584_v1, %v518_v6  ;;  %v4903_v4 = vrot.slane %v3438_v49, 4  ;;  %v3464_v23 = vmul.f32 %v3205_v44, %v3414_v0 }
 0x12f   : > { %v411_v1 = vrot.slane %v404_v35, 1  ;;  %v459_v6 = vrot.slane %v455_v37, 2  ;;  %v3492_v35 = vmul.f32 %v3267_v10, %v3414_v0  ;;  %v343_v37 = vmul.f32 %v3290_v27, %v3267_v10 }
 0x132   : > { %796 = vrot.lane.b32.xlu1 %v4906_v63, %s2891_s21  ;;  %794 = vrot.lane.b32.xlu0 %v4905_v31, %s2891_s21  ;;  %v712_v31 = vmul.f32 %v3282_v19, %v3221_v50  ;;  %v422_v50 = vadd.f32 %v411_v1, %v343_v37 }
 0x134   : > { %v720_v54 = vrot.slane %v712_v31, 1 }
 0x136   : > { %888 = vrot.lane.b32.xlu1 %v4904_v53, %s2891_s21  ;;  %890 = vrot.lane.b32.xlu0 %v4902_v57, %s2891_s21  ;;  %v528_v57 = vrot.slane %v520_v61, 3  ;;  %v713_v53 = vmul.f32 %v3282_v19, %v3196_v41 }
 0x13a   : > { %920 = vrot.lane.b32.xlu1 %v4901_v11, %s2891_s21  ;;  %922 = vrot.lane.b32.xlu0 %v4899_v21, %s2891_s21  ;;  %v412_v21 = vsel %vm365_vm2, %v410_v20, %v411_v1  ;;  %v4913_v20 = vrot.slane %v3492_v35, 4 }
 0x13b   : > { %v420_v11 = vadd.f32 %v412_v21, %v341_v59  ;;  %v745_v59 = vmul.f32 %v3282_v19, %v3208_v45 }
 0x13d   : > { %v463_v21 = vadd.f32 %v459_v6, %v420_v11  ;;  %v465_v11 = vadd.f32 %v459_v6, %v422_v50  ;;  %v755_v31 = vrot.slane %v745_v59, 1  ;;  %v776_v6 = vmul.f32 %v3282_v19, %v3252_v3 }
 0x13e   : > { %952 = vrot.lane.b32.xlu1 %v4898_v8, %s2891_s21  ;;  %954 = vrot.lane.b32.xlu0 %v4897_v55, %s2891_s21  ;;  %v4910_v55 = vrot.slane %v3464_v23, 4  ;;  %v4912_v8 = vrot.slane %v3468_v30, 4  ;;  %v876_v3 = vmul.f32 %v3347_v7, %v3280_v18 }
 0x13f   : > { %v538_v61 = vadd.f32 %v528_v57, %v463_v21  ;;  %v5027_v21 = vrot.slane %v3302_v32, 1  ;;  %v5029_v32 = vrot.slane %v3322_v51, 1 }
 0x142   : > { %994 = vrot.lane.b32.xlu1 %v4900_v60, %s2891_s21  ;;  %992 = vrot.lane.b32.xlu0 %v4903_v4, %s2891_s21  ;;  %v3496_v60 = vld [vmem:[%s3189_s26 + $0xf0] sm:$0x3]  ;;  %v595_v4 = vmul.f32 %v3267_v10, %v3218_v48  ;;  %v1051_v10 = vrot.slane %v3486_v62, 4 }
 0x143   : > { %v522_v63 = vmul.f32 %v3292_v28, %v3496_v60  ;;  %v597_v56 = vmul.f32 %v3496_v60, %v3218_v48 }
 0x144   : > { %v603_v13 = vrot.slane %v595_v4, 4 }
 0x145   : > { %v530_v12 = vrot.slane %v522_v63, 3  ;;  %v605_v1 = vrot.slane %v597_v56, 4 }
 0x146   : > { %1026 = vrot.lane.b32.xlu1 %v4910_v55, %s2891_s21  ;;  %1024 = vrot.lane.b32.xlu0 %v4912_v8, %s2891_s21  ;;  %v723_v55 = vrot.slane %v713_v53, 1  ;;  %v744_v8 = vmul.f32 %v3282_v19, %v3233_v58  ;;  %v3528_v4 = vadd.f32 %v603_v13, %v538_v61  ;;  %v777_v58 = vmul.f32 %v3282_v19, %v3249_v2 }
 0x147   : > { %v531_v63 = vsel %vm483_vm4, %v528_v57, %v530_v12  ;;  %v606_v37 = vsel %vm558_vm3, %v603_v13, %v605_v1  ;;  %v5028_v61 = vrot.slane %v3306_v36, 1  ;;  %v3547_v57 = vld [vmem:[%s3189_s26 + $0x38] sm:$0x3]  ;;  %v757_v36 = vsel %vm365_vm2, %v755_v31, %v5029_v32 }
 0x148   : > { %v540_v53 = vadd.f32 %v531_v63, %v465_v11  ;;  %v725_v50 = vsel %vm365_vm2, %v723_v55, %v5027_v21  ;;  %v752_v56 = vrot.slane %v744_v8, 1  ;;  %v877_v19 = vmul.f32 %v3347_v7, %v3547_v57  ;;  %v3562_v11 = vld [vmem:[%s3189_s26 + $0x98] sm:$0x3] }
 0x149   : > { %v787_v8 = vrot.slane %v777_v58, 1  ;;  %v784_v55 = vrot.slane %v776_v6, 1  ;;  %v5031_v63 = vrot.slane %v3344_v5, 1  ;;  %v5032_v1 = vrot.slane %v3353_v14, 1 }
 0x14a   : > { %1058 = vrot.lane.b32.xlu1 %v1051_v10, %s2891_s21  ;;  %1056 = vrot.lane.b32.xlu0 %v4913_v20, %s2891_s21  ;;  %v722_v20 = vsel %vm365_vm2, %v720_v54, %v5028_v61  ;;  %v3542_v12 = vadd.f32 %v606_v37, %v540_v53  ;;  %v5030_v54 = vrot.slane %v3326_v52, 1  ;;  %v886_v59 = vrot.slane %v877_v19, 3  ;;  %v3583_v37 = vld [vmem:[%s3189_s26 + $0xf8] sm:$0x3] }
 0x14b   : > { %v789_v51 = vsel %vm365_vm2, %v787_v8, %v5031_v63  ;;  %v786_v52 = vsel %vm365_vm2, %v784_v55, %v5032_v1  ;;  %v908_v53 = vmul.f32 %v3347_v7, %v3401_v47  ;;  %v909_v31 = vmul.f32 %v3347_v7, %v3562_v11 }
 0x14c   : > { %v754_v13 = vsel %vm365_vm2, %v752_v56, %v5030_v54  ;;  %v5033_v58 = vrot.slane %v3367_v24, 3  ;;  %v5034_v6 = vrot.slane %v3371_v25, 3  ;;  %v940_v61 = vmul.f32 %v3347_v7, %v3496_v60 }
 0x14d   : > { %v916_v21 = vrot.slane %v908_v53, 3  ;;  %v941_v56 = vmul.f32 %v3347_v7, %v3583_v37  ;;  %v981_v24 = vmul.f32 %v3414_v0, %v3547_v57  ;;  %v980_v25 = vmul.f32 %v3414_v0, %v3280_v18 }
 0x14e   : > { %728 = vrot.lane.b32.xlu1 %v725_v50, %s2891_s21  ;;  %726 = vrot.lane.b32.xlu0 %v722_v20, %s2891_s21  ;;  %v884_v20 = vrot.slane %v876_v3, 3  ;;  %v887_v14 = vsel %vm483_vm4, %v5034_v6, %v886_v59  ;;  %v918_v50 = vrot.slane %v909_v31, 3  ;;  %v5035_v3 = vrot.slane %v3394_v43, 3 }
 0x14f   : > { %v5036_v32 = vrot.slane %v3398_v46, 3  ;;  %v948_v54 = vrot.slane %v940_v61, 3  ;;  %v950_v7 = vrot.slane %v941_v56, 3  ;;  %v1012_v18 = vmul.f32 %v3401_v47, %v3414_v0 }
 0x150   : > { %v885_v5 = vsel %vm483_vm4, %v5033_v58, %v884_v20  ;;  %v917_v19 = vsel %vm483_vm4, %v5035_v3, %v916_v21  ;;  %v5037_v43 = vrot.slane %v3423_v16, 3  ;;  %v5038_v46 = vrot.slane %v3427_v17, 3  ;;  %v3638_v21 = vpop.permute.xlu1 %1086 }
 0x151   : > { %v990_v20 = vrot.slane %v981_v24, 4  ;;  %v988_v59 = vrot.slane %v980_v25, 4  ;;  %v1124_v63 = vunpack.c.h.bf16 %v3181_v22  ;;  %v1020_v1 = vrot.slane %v1012_v18, 4  ;;  %5043 = vst [vmem:[#allocation22_spill] sm:$0xff] %v3638_v21 }
 0x152   : > { %760 = vrot.lane.b32.xlu1 %v757_v36, %s2891_s21  ;;  %758 = vrot.lane.b32.xlu0 %v754_v13, %s2891_s21  ;;  %v919_v36 = vsel %vm483_vm4, %v5036_v32, %v918_v50  ;;  %v1013_v13 = vmul.f32 %v3562_v11, %v3414_v0  ;;  %v949_v8 = vsel %vm483_vm4, %v5037_v43, %v948_v54  ;;  %v5039_v47 = vrot.slane %v3434_v42, 4  ;;  %v2474_v54 = vld [vmem:[%s3152_s25 + $0x30] ss:$20 sps:$4 sm:$0xff]  }
 0x153   : > { %v951_v55 = vsel %vm483_vm4, %v5038_v46, %v950_v7  ;;  %v1045_v53 = vmul.f32 %v3583_v37, %v3414_v0  ;;  %v1044_v31 = vmul.f32 %v3496_v60, %v3414_v0  ;;  %v1126_v22 = vrot.slane %v1124_v63, 1 }
 0x154   : > { %v991_v16 = vsel %vm558_vm3, %v5039_v47, %v990_v20  ;;  %v5041_v58 = vrot.slane %v3464_v23, 4  ;;  %v1109_v61 = vmul.f32 %v3264_v9, %v3187_v38  ;;  %v1108_v56 = vmul.f32 %v3249_v2, %v3187_v38 }
 0x155   : > { %v1054_v6 = vrot.slane %v1045_v53, 4  ;;  %v1129_v0 = vmul.f32 %v1126_v22, %v3192_v39  ;;  %v1128_v60 = vmul.f32 %v1126_v22, %v3196_v41  ;;  %v1146_v62 = vmul.f32 %v3205_v44, %v1126_v22  ;;  %v2476_v53 = vld [vmem:[%s3152_s25 + $0xc] ss:$76 sps:$4 sm:$0xff]  }
 0x156   : > { %792 = vrot.lane.b32.xlu1 %v789_v51, %s2891_s21  ;;  %790 = vrot.lane.b32.xlu0 %v786_v52, %s2891_s21  ;;  %v1022_v51 = vrot.slane %v1013_v13, 4  ;;  %v5040_v52 = vrot.slane %v3438_v49, 4  ;;  %v1162_v38 = vmul.f32 %v3249_v2, %v1126_v22  ;;  %v1181_v7 = vunpack.c.l.bf16 %v2474_v54 }
 0x157   : > { %v1055_v23 = vsel %vm558_vm3, %v1051_v10, %v1054_v6  ;;  %v1133_v24 = vrot.slane %v1129_v0, 1  ;;  %v1132_v25 = vrot.slane %v1128_v60, 1  ;;  %v1145_v10 = vmul.f32 %v3208_v45, %v1126_v22 }
 0x158   : > { %v989_v17 = vsel %vm558_vm3, %v5040_v52, %v988_v59  ;;  %v1023_v42 = vsel %vm558_vm3, %v5041_v58, %v1022_v51  ;;  %v1214_v13 = vunpack.c.h.bf16 %v2474_v54  ;;  %v1182_v20 = vmul.f32 %v1181_v7, %v3192_v39 }
 0x159   : > { %v1134_v3 = vsel %vm365_vm2, %v1132_v25, %v1133_v24  ;;  %v1149_v32 = vrot.slane %v1145_v10, 1  ;;  %v1202_v52 = vmul.f32 %v3264_v9, %v1181_v7 }
 0x15a   : > { %892 = vrot.lane.b32.xlu1 %v885_v5, %s2891_s21  ;;  %894 = vrot.lane.b32.xlu0 %v887_v14, %s2891_s21  ;;  %v5042_v5 = vrot.slane %v3468_v30, 4  ;;  %v1052_v14 = vrot.slane %v1044_v31, 4  ;;  %v5044_v30 = vrot.slane %v3492_v35, 4  ;;  %v3656_v35 = vpop.permute.xlu1 %1100  ;;  %v1216_v59 = vrot.slane %v1214_v13, 7  ;;  %v2478_v13 = vld [vmem:[%s3152_s25 + $0x20] sm:$0xf] }
 0x15b   : > { %5045 = vst [vmem:[#allocation23_spill] sm:$0xff] %v3656_v35  ;;  %v1184_v47 = vrot.slane %v1182_v20, 2  ;;  %v1204_v58 = vrot.slane %v1202_v52, 2  ;;  %v1415_v20 = vunpack.c.l.bf16 %v2478_v13 }
 0x15c   : > { %v1021_v49 = vsel %vm558_vm3, %v5042_v5, %v1020_v1  ;;  %v1053_v50 = vsel %vm558_vm3, %v5044_v30, %v1052_v14  ;;  %v1271_v5 = vunpack.c.h.bf16 %v2476_v53  ;;  %v1236_v6 = vmul.f32 %v3562_v11, %v1216_v59 }
 0x15d   : > { %v1252_v60 = vmul.f32 %v3264_v9, %v1216_v59 }
 0x15e   : > { %924 = vrot.lane.b32.xlu1 %v917_v19, %s2891_s21  ;;  %926 = vrot.lane.b32.xlu0 %v919_v36, %s2891_s21  ;;  %v1150_v19 = vrot.slane %v1146_v62, 1  ;;  %v1163_v36 = vmul.f32 %v3264_v9, %v1126_v22 }
 0x160   : > { %v1151_v18 = vsel %vm365_vm2, %v1149_v32, %v1150_v19  ;;  %v1167_v43 = vrot.slane %v1163_v36, 1 }
 0x162   : > { %956 = vrot.lane.b32.xlu1 %v949_v8, %s2891_s21  ;;  %958 = vrot.lane.b32.xlu0 %v951_v55, %s2891_s21  ;;  %v1166_v8 = vrot.slane %v1162_v38, 1  ;;  %v1192_v55 = vmul.f32 %v3205_v44, %v1181_v7 }
 0x164   : > { %v1168_v63 = vsel %vm365_vm2, %v1166_v8, %v1167_v43  ;;  %v1194_v1 = vrot.slane %v1192_v55, 2  ;;  %v1328_v55 = vunpack.c.l.bf16 %v2476_v53 }
 0x166   : > { %998 = vrot.lane.b32.xlu1 %v991_v16, %s2891_s21  ;;  %996 = vrot.lane.b32.xlu0 %v989_v17, %s2891_s21  ;;  %v1218_v16 = vmul.f32 %v1216_v59, %v3192_v39  ;;  %v1219_v17 = vmul.f32 %v1216_v59, %v3547_v57 }
 0x168   : > { %v1222_v22 = vrot.slane %v1218_v16, 3 }
 0x16a   : > { %1030 = vrot.lane.b32.xlu1 %v1023_v42, %s2891_s21  ;;  %1028 = vrot.lane.b32.xlu0 %v1021_v49, %s2891_s21  ;;  %v1235_v42 = vmul.f32 %v3205_v44, %v1216_v59  ;;  %v1223_v49 = vrot.slane %v1219_v17, 3  ;;  %v1330_v17 = vrot.slane %v1328_v55, 2 }
 0x16c   : > { %v1239_v0 = vrot.slane %v1235_v42, 3  ;;  %v1224_v30 = vsel %vm483_vm4, %v1222_v22, %v1223_v49 }
 0x16e   : > { %1062 = vrot.lane.b32.xlu1 %v1055_v23, %s2891_s21  ;;  %1060 = vrot.lane.b32.xlu0 %v1053_v50, %s2891_s21  ;;  %v1273_v23 = vrot.slane %v1271_v5, 6  ;;  %v1240_v50 = vrot.slane %v1236_v6, 3 }
 0x170   : > { %v1275_v25 = vmul.f32 %v1273_v23, %v3192_v39  ;;  %v1241_v62 = vsel %vm483_vm4, %v1239_v0, %v1240_v50  ;;  %v1292_v36 = vmul.f32 %v3205_v44, %v1273_v23  ;;  %v1293_v7 = vmul.f32 %v3562_v11, %v1273_v23 }
 0x171   : > { %v1309_v8 = vmul.f32 %v3264_v9, %v1273_v23 }
 0x172   : > { %1114 = vrot.lane.b32.xlu1 %v1109_v61, %s2890_s8  ;;  %1112 = vrot.lane.b32.xlu0 %v1108_v56, %s2890_s8  ;;  %v1253_v61 = vmul.f32 %v3583_v37, %v1216_v59  ;;  %v1279_v32 = vrot.slane %v1275_v25, 4  ;;  %v3713_v59 = vpop.permute.xlu0 %1084 }
 0x173   : > { %5050 = vst [vmem:[#allocation28_spill] sm:$0xff] %v3713_v59  ;;  %v1313_v52 = vrot.slane %v1309_v8, 4 }
 0x174   : > { %v1257_v10 = vrot.slane %v1253_v61, 3 }
 0x176   : > { %1137 = vrot.lane.b32.xlu1 %v1133_v24, %s2890_s8  ;;  %1135 = vrot.lane.b32.xlu0 %v1134_v3, %s2890_s8  ;;  %v1256_v24 = vrot.slane %v1252_v60, 3  ;;  %v1276_v3 = vmul.f32 %v1273_v23, %v3547_v57  ;;  %v3724_v5 = vpop.permute.xlu0 %1098 }
 0x177   : > { %5052 = vst [vmem:[#allocation30_spill] sm:$0xff] %v3724_v5 }
 0x178   : > { %v3665_v46 = vpop.permute.xlu1 %635  ;;  %v1258_v38 = vsel %vm483_vm4, %v1256_v24, %v1257_v10  ;;  %v1280_v54 = vrot.slane %v1276_v3, 4 }
 0x179   : > { %5046 = vst [vmem:[#allocation24_spill] sm:$0xff] %v3665_v46 }
 0x17a   : > { %1154 = vrot.lane.b32.xlu1 %v1150_v19, %s2890_s8  ;;  %1152 = vrot.lane.b32.xlu0 %v1151_v18, %s2890_s8  ;;  %v3733_v60 = vpop.permute.xlu0 %633 }
 0x17c   : > { %v3672_v51 = vpop.permute.xlu1 %639 }
 0x17d   : > { %5047 = vst [vmem:[#allocation25_spill] sm:$0xff] %v3672_v51 }
 0x17e   : > { %1171 = vrot.lane.b32.xlu1 %v1167_v43, %s2890_s8  ;;  %1169 = vrot.lane.b32.xlu0 %v1168_v63, %s2890_s8  ;;  %v1296_v43 = vrot.slane %v1292_v36, 4  ;;  %v1281_v63 = vsel %vm558_vm3, %v1279_v32, %v1280_v54  ;;  %v3739_v50 = vpop.permute.xlu0 %637 }
 0x17f   : > { %5055 = vst [vmem:[#allocation33_spill] sm:$0xff] %v3739_v50 }
 0x180   : > { %v3680_v31 = vpop.permute.xlu1 %662 }
 0x182   : > { %1195 = vrot.lane.b32.xlu1 %v1194_v1, %s2890_s8  ;;  %1185 = vrot.lane.b32.xlu0 %v1184_v47, %s2890_s8  ;;  %v1297_v1 = vrot.slane %v1293_v7, 4  ;;  %v1310_v47 = vmul.f32 %v3583_v37, %v1273_v23 }
 0x184   : > { %v3686_v14 = vpop.permute.xlu1 %666  ;;  %v1314_v53 = vrot.slane %v1310_v47, 4 }
 0x186   : > { %1225 = vrot.lane.b32.xlu1 %v1222_v22, %s2890_s8  ;;  %1205 = vrot.lane.b32.xlu0 %v1204_v58, %s2890_s8  ;;  %v1417_v22 = vrot.slane %v1415_v20, 1  ;;  %v1298_v58 = vsel %vm558_vm3, %v1296_v43, %v1297_v1  ;;  %v1315_v6 = vsel %vm558_vm3, %v1313_v52, %v1314_v53 }
 0x188   : > { %v3693_v56 = vpop.permute.xlu1 %688  ;;  %v2657_v49 = vpack.i.bf16 %v1417_v22, %v1330_v17 }
 0x18a   : > { %1242 = vrot.lane.b32.xlu1 %v1239_v0, %s2890_s8  ;;  %1227 = vrot.lane.b32.xlu0 %v1224_v30, %s2890_s8 }
 0x18c   : > { %v3700_v19 = vpop.permute.xlu1 %692 }
 0x18d   : > { %5048 = vst [vmem:[#allocation26_spill] sm:$0xff] %v3700_v19 }
 0x18e   : > { %1259 = vrot.lane.b32.xlu1 %v1256_v24, %s2890_s8  ;;  %1244 = vrot.lane.b32.xlu0 %v1241_v62, %s2890_s8  ;;  %v3743_v24 = vpop.permute.xlu0 %660 }
 0x190   : > { %v3708_v18 = vpop.permute.xlu1 %821 }
 0x191   : > { %5049 = vst [vmem:[#allocation27_spill] sm:$0xff] %v3708_v18 }
 0x192   : > { %1282 = vrot.lane.b32.xlu1 %v1279_v32, %s2890_s8  ;;  %1261 = vrot.lane.b32.xlu0 %v1258_v38, %s2890_s8  ;;  %v3749_v10 = vpop.permute.xlu0 %664 }
 0x194   : > { %v3717_v16 = vpop.permute.xlu1 %838 }
 0x196   : > { %1299 = vrot.lane.b32.xlu1 %v1296_v43, %s2890_s8  ;;  %1284 = vrot.lane.b32.xlu0 %v1281_v63, %s2890_s8  ;;  %v3753_v32 = vpop.permute.xlu0 %686 }
 0x198   : > { %v3722_v42 = vpop.permute.xlu1 %855 }
 0x199   : > { %5051 = vst [vmem:[#allocation29_spill] sm:$0xff] %v3722_v42 }
 0x19a   : > { %1316 = vrot.lane.b32.xlu1 %v1313_v52, %s2890_s8  ;;  %1301 = vrot.lane.b32.xlu0 %v1298_v58, %s2890_s8  ;;  %v3759_v54 = vpop.permute.xlu0 %690 }
 0x19c   : > { %v3729_v0 = vpop.permute.xlu1 %732 }
 0x19d   : > { %5053 = vst [vmem:[#allocation31_spill] sm:$0xff] %v3729_v0  ;;  %v3844_v0 = vld [vmem:[%s3189_s26 + $0x70] sm:$0xff] }
 0x19e   : > { %2658 = vrot.lane.b32.xlu1 %v2657_v49, %s2892_s29  ;;  %1318 = vrot.lane.b32.xlu0 %v1315_v6, %s2890_s8  ;;  %v3763_v13 = vpop.permute.xlu0 %823  ;;  %5088 = vst [vmem:[#allocation66_spill] sm:$0xff] %v3844_v0  ;;  %s2896_s8 = smov [#allocation8]  }
 0x19f   : > { %5062 = vst [vmem:[#allocation40_spill] sm:$0xff] %v3763_v13  ;;  %s2760_s21 = sshll.u32 %s2896_s8, 4  ;;  %s2761_s21 = int_to_ptr.vmem [resolvable:$false] %s2760_s21 }
 0x1a0   : > { %v3735_v23 = vpop.permute.xlu1 %764 }
 0x1a2   : > { %v3769_v55 = vpop.permute.xlu0 %840 }
 0x1a4   : > { %v3737_v30 = vpop.permute.xlu1 %796 }
 0x1a5   : > { %5054 = vst [vmem:[#allocation32_spill] sm:$0xff] %v3737_v30 }
 0x1a6   : > { %v3773_v63 = vpop.permute.xlu0 %857 }
 0x1a7   : > { %5064 = vst [vmem:[#allocation42_spill] sm:$0xff] %v3773_v63 }
 0x1a8   : > { %v3741_v61 = vpop.permute.xlu1 %888 }
 0x1a9   : > { %5056 = vst [vmem:[#allocation34_spill] sm:$0xff] %v3741_v61 }
 0x1aa   : > { %v3779_v52 = vpop.permute.xlu0 %730 }
 0x1ab   : > { %5066 = vst [vmem:[#allocation44_spill] sm:$0xff] %v3779_v52  ;;  %v3835_v52 = vld [vmem:[%s3189_s26 + $0x28] sm:$0xff] }
 0x1ac   : > { %v3745_v25 = vpop.permute.xlu1 %920 }
 0x1ae   : > { %v3783_v22 = vpop.permute.xlu0 %762 }
 0x1b0   : > { %v3747_v62 = vpop.permute.xlu1 %952 }
 0x1b1   : > { %5057 = vst [vmem:[#allocation35_spill] sm:$0xff] %v3747_v62  ;;  %v3851_v62 = vld [vmem:[%s3189_s26 + $0x88] sm:$0xff] }
 0x1b2   : > { %v3789_v49 = vpop.permute.xlu0 %794 }
 0x1b4   : > { %v3751_v3 = vpop.permute.xlu1 %994 }
 0x1b5   : > { %5058 = vst [vmem:[#allocation36_spill] sm:$0xff] %v3751_v3 }
 0x1b6   : > { %v3793_v21 = vpop.permute.xlu0 %890 }
 0x1b7   : > { %5071 = vst [vmem:[#allocation49_spill] sm:$0xff] %v3793_v21 }
 0x1b8   : > { %v3755_v36 = vpop.permute.xlu1 %1026 }
 0x1b9   : > { %5059 = vst [vmem:[#allocation37_spill] sm:$0xff] %v3755_v36 }
 0x1bc   : > { %v3757_v38 = vpop.permute.xlu1 %1058 }
 0x1bd   : > { %5060 = vst [vmem:[#allocation38_spill] sm:$0xff] %v3757_v38 }
 0x1c0   : > { %v3761_v7 = vpop.permute.xlu1 %728 }
 0x1c1   : > { %5061 = vst [vmem:[#allocation39_spill] sm:$0xff] %v3761_v7 }
 0x1c4   : > { %v3765_v43 = vpop.permute.xlu1 %760 }
 0x1c8   : > { %v3767_v8 = vpop.permute.xlu1 %792 }
 0x1cc   : > { %v3771_v20 = vpop.permute.xlu1 %892 }
 0x1cd   : > { %5063 = vst [vmem:[#allocation41_spill] sm:$0xff] %v3771_v20  ;;  %v3799_v20 = vpop.permute.xlu0 %922 }
 0x1d0   : > { %v3775_v1 = vpop.permute.xlu1 %924 }
 0x1d1   : > { %v3803_v61 = vpop.permute.xlu0 %954 }
 0x1d2   : > { %5075 = vst [vmem:[#allocation53_spill] sm:$0xff] %v3803_v61 }
 0x1d4   : > { %v3777_v47 = vpop.permute.xlu1 %956 }
 0x1d5   : > { %5065 = vst [vmem:[#allocation43_spill] sm:$0xff] %v3777_v47  ;;  %v3809_v38 = vpop.permute.xlu0 %992 }
 0x1d6   : > { %5078 = vst [vmem:[#allocation56_spill] sm:$0xff] %v3809_v38 }
 0x1d8   : > { %v3781_v17 = vpop.permute.xlu1 %998 }
 0x1d9   : > { %5067 = vst [vmem:[#allocation45_spill] sm:$0xff] %v3781_v17  ;;  %v3813_v21 = vpop.permute.xlu0 %1024 }
 0x1da   : > { %5080 = vst [vmem:[#allocation58_spill] sm:$0xff] %v3813_v21  ;;  %v3860_v21 = vld [vmem:[%s3189_s26 + $0xd0] sm:$0xff] }
 0x1db   : > { %5090 = vst [vmem:[#allocation68_spill] sm:$0xff] %v3860_v21 }
 0x1dc   : > { %v3785_v58 = vpop.permute.xlu1 %1030 }
 0x1dd   : > { %5068 = vst [vmem:[#allocation46_spill] sm:$0xff] %v3785_v58  ;;  %v3819_v18 = vpop.permute.xlu0 %1056 }
 0x1de   : > { %5083 = vst [vmem:[#allocation61_spill] sm:$0xff] %v3819_v18 }
 0x1e0   : > { %v3787_v53 = vpop.permute.xlu1 %1062 }
 0x1e1   : > { %5069 = vst [vmem:[#allocation47_spill] sm:$0xff] %v3787_v53  ;;  %v3823_v13 = vpop.permute.xlu0 %726 }
 0x1e2   : > { %5085 = vst [vmem:[#allocation63_spill] sm:$0xff] %v3823_v13 }
 0x1e4   : > { %v3791_v6 = vpop.permute.xlu1 %1114 }
 0x1e5   : > { %5070 = vst [vmem:[#allocation48_spill] sm:$0xff] %v3791_v6  ;;  %v3830_v38 = vpop.permute.xlu0 %758 }
 0x1e8   : > { %v3795_v59 = vpop.permute.xlu1 %1137 }
 0x1e9   : > { %5072 = vst [vmem:[#allocation50_spill] sm:$0xff] %v3795_v59 }
 0x1ec   : > { %v3797_v3 = vpop.permute.xlu1 %1154 }
 0x1ed   : > { %5073 = vst [vmem:[#allocation51_spill] sm:$0xff] %v3797_v3 }
 0x1f0   : > { %v3801_v17 = vpop.permute.xlu1 %1171 }
 0x1f1   : > { %5074 = vst [vmem:[#allocation52_spill] sm:$0xff] %v3801_v17 }
 0x1f4   : > { %v3805_v5 = vpop.permute.xlu1 %1195 }
 0x1f5   : > { %5076 = vst [vmem:[#allocation54_spill] sm:$0xff] %v3805_v5 }
 0x1f8   : > { %v3807_v35 = vpop.permute.xlu1 %1225 }
 0x1f9   : > { %5077 = vst [vmem:[#allocation55_spill] sm:$0xff] %v3807_v35 }
 0x1fc   : > { %v3811_v6 = vpop.permute.xlu1 %1242 }
 0x1fd   : > { %5079 = vst [vmem:[#allocation57_spill] sm:$0xff] %v3811_v6 }
 0x200   : > { %v3815_v59 = vpop.permute.xlu1 %1259 }
 0x201   : > { %5081 = vst [vmem:[#allocation59_spill] sm:$0xff] %v3815_v59 }
 0x204   : > { %v3817_v3 = vpop.permute.xlu1 %1282 }
 0x205   : > { %5082 = vst [vmem:[#allocation60_spill] sm:$0xff] %v3817_v3 }
 0x208   : > { %v3821_v17 = vpop.permute.xlu1 %1299 }
 0x209   : > { %5084 = vst [vmem:[#allocation62_spill] sm:$0xff] %v3821_v17 }
 0x20c   : > { %v3825_v5 = vpop.permute.xlu1 %1316 }
 0x20d   : > { %5086 = vst [vmem:[#allocation64_spill] sm:$0xff] %v3825_v5  ;;  %v3839_v5 = vpop.permute.xlu0 %790 }
 0x210   : > { %v2659_v35 = vpop.permute.xlu1 %2658 }
 0x211   : > { %v2660_v6 = vunpack.i.l.bf16 %v2659_v35 }
 0x213   : > { %v1335_v59 = vmul.f32 %v2660_v6, %v3828_v34  ;;  %v1334_v3 = vmul.f32 %v2660_v6, %v3196_v41  ;;  %v1337_v17 = vmul.f32 %v2660_v6, %v3835_v52  ;;  %v1336_v18 = vmul.f32 %v2660_v6, %v3192_v39 }
 0x214   : > { %v1362_v53 = vmul.f32 %v2660_v6, %v3844_v0  ;;  %v1364_v61 = vmul.f32 %v2660_v6, %v3851_v62  ;;  %v1363_v47 = vmul.f32 %v2660_v6, %v3205_v44  ;;  %v1388_v36 = vmul.f32 %v2660_v6, %v3860_v21 }
 0x215   : > { %1344 = vrot.lane.b32.xlu1 %v1335_v59, %s2893_s28  ;;  %1342 = vrot.lane.b32.xlu0 %v1334_v3, %s2893_s28  ;;  %v1361_v59 = vmul.f32 %v2660_v6, %v3208_v45  ;;  %v3853_v3 = vpop.permute.xlu0 %894 }
 0x216   : > { %5089 = vst [vmem:[#allocation67_spill] sm:$0xff] %v3853_v3  ;;  %v1387_v3 = vmul.f32 %v2660_v6, %v3249_v2 }
 0x219   : > { %1348 = vrot.lane.b32.xlu1 %v1337_v17, %s2893_s28  ;;  %1346 = vrot.lane.b32.xlu0 %v1336_v18, %s2893_s28  ;;  %v2661_v17 = vunpack.i.h.bf16 %v2659_v35  ;;  %v3864_v18 = vpop.permute.xlu0 %926 }
 0x21b   : > { %v1424_v50 = vmul.f32 %v2661_v17, %v3835_v52  ;;  %v1421_v35 = vmul.f32 %v2661_v17, %v3196_v41  ;;  %v1423_v51 = vmul.f32 %v2661_v17, %v3192_v39  ;;  %v1454_v39 = vmul.f32 %v2661_v17, %v3844_v0 }
 0x21c   : > { %v1456_v41 = vmul.f32 %v2661_v17, %v3851_v62 }
 0x21d   : > { %1371 = vrot.lane.b32.xlu1 %v1362_v53, %s2893_s28  ;;  %1369 = vrot.lane.b32.xlu0 %v1361_v59, %s2893_s28  ;;  %v3869_v53 = vld [vmem:[%s3189_s26 + $0xe8] sm:$0xff]  ;;  %v1422_v59 = vmul.f32 %v2661_v17, %v3828_v34  ;;  %v1433_v13 = vrot.slane %v1424_v50, 1  ;;  %v1429_v7 = vrot.slane %v1421_v35, 1  ;;  %v1430_v58 = vrot.slane %v1423_v51, 1  ;;  %v3879_v42 = vpop.permute.xlu0 %958 }
 0x21e   : > { %5091 = vst [vmem:[#allocation69_spill] sm:$0xff] %v3879_v42  ;;  %v1455_v50 = vmul.f32 %v2661_v17, %v3205_v44  ;;  %v1465_v35 = vrot.slane %v1456_v41, 1 }
 0x21f   : > { %v1432_v26 = vrot.slane %v1422_v59, 1  ;;  %v1464_v59 = vrot.slane %v1454_v39, 1  ;;  %v1487_v39 = vmul.f32 %v2661_v17, %v3264_v9 }
 0x221   : > { %1375 = vrot.lane.b32.xlu1 %v1364_v61, %s2893_s28  ;;  %1373 = vrot.lane.b32.xlu0 %v1363_v47, %s2893_s28  ;;  %v1390_v61 = vmul.f32 %v2660_v6, %v3869_v53  ;;  %v1389_v47 = vmul.f32 %v2660_v6, %v3264_v9  ;;  %v1453_v6 = vmul.f32 %v2661_v17, %v3208_v45  ;;  %v3891_v51 = vpop.permute.xlu0 %996 }
 0x222   : > { %5092 = vst [vmem:[#allocation70_spill] sm:$0xff] %v3891_v51  ;;  %v1488_v45 = vmul.f32 %v2661_v17, %v3869_v53  ;;  %v1466_v44 = vsel %vm365_vm2, %v1464_v59, %v1465_v35  ;;  %v3912_v59 = vld [vmem:[%s3152_s25 + $0x34] sm:$0xff]  }
 0x225   : > { %1397 = vrot.lane.b32.xlu1 %v1388_v36, %s2893_s28  ;;  %1395 = vrot.lane.b32.xlu0 %v1387_v3, %s2893_s28  ;;  %v1434_v36 = vsel %vm365_vm2, %v1432_v26, %v1433_v13  ;;  %v1431_v3 = vsel %vm365_vm2, %v1429_v7, %v1430_v58  ;;  %v1486_v26 = vmul.f32 %v2661_v17, %v3860_v21  ;;  %v3901_v41 = vpop.permute.xlu0 %1028 }
 0x226   : > { %5093 = vst [vmem:[#allocation71_spill] sm:$0xff] %v3901_v41 }
 0x229   : > { %1401 = vrot.lane.b32.xlu1 %v1390_v61, %s2893_s28  ;;  %1399 = vrot.lane.b32.xlu0 %v1389_v47, %s2893_s28  ;;  %v1461_v61 = vrot.slane %v1453_v6, 1  ;;  %v1462_v47 = vrot.slane %v1455_v50, 1  ;;  %v1494_v50 = vrot.slane %v1487_v39, 1  ;;  %v3914_v9 = vpop.permute.xlu0 %1060 }
 0x22a   : > { %5094 = vst [vmem:[#allocation72_spill] sm:$0xff] %v3914_v9 }
 0x22b   : > { %v1463_v7 = vsel %vm365_vm2, %v1461_v61, %v1462_v47 }
 0x22d   : > { %1437 = vrot.lane.b32.xlu1 %v1434_v36, %s2893_s28  ;;  %1435 = vrot.lane.b32.xlu0 %v1431_v3, %s2893_s28  ;;  %v1485_v36 = vmul.f32 %v2661_v17, %v3249_v2  ;;  %v1497_v3 = vrot.slane %v1488_v45, 1 }
 0x22f   : > { %v1493_v6 = vrot.slane %v1485_v36, 1 }
 0x231   : > { %1441 = vrot.lane.b32.xlu1 %v1433_v13, %s2893_s28  ;;  %1439 = vrot.lane.b32.xlu0 %v1430_v58, %s2893_s28  ;;  %v3906_v13 = vld [vmem:[%s3152_s25 + $0x48] sm:$0xff]   ;;  %v1496_v58 = vrot.slane %v1486_v26, 1  ;;  %v1495_v61 = vsel %vm365_vm2, %v1493_v6, %v1494_v50  ;;  %v1519_v26 = vunpack.c.l.bf16 %v3912_v59 }
 0x232   : > { %v1577_v2 = vunpack.c.l.bf16 %v3906_v13 }
 0x233   : > { %v1498_v17 = vsel %vm365_vm2, %v1496_v58, %v1497_v3 }
 0x234   : > { %v1579_v45 = vrot.slane %v1577_v2, 7 }
 0x235   : > { %1469 = vrot.lane.b32.xlu1 %v1466_v44, %s2893_s28  ;;  %1467 = vrot.lane.b32.xlu0 %v1463_v7, %s2893_s28 }
 0x239   : > { %1473 = vrot.lane.b32.xlu1 %v1465_v35, %s2893_s28  ;;  %1471 = vrot.lane.b32.xlu0 %v1462_v47, %s2893_s28  ;;  %v3921_v35 = vpop.permute.xlu0 %1112  ;;  %v2662_v47 = vpack.i.bf16 %v1579_v45, %v1519_v26 }
 0x23a   : > { %5095 = vst [vmem:[#allocation73_spill] sm:$0xff] %v3921_v35  ;;  %v3987_v35 = vld [vmem:[%s3189_s26 + $0xe0] sm:$0xff] }
 0x23d   : > { %1501 = vrot.lane.b32.xlu1 %v1498_v17, %s2893_s28  ;;  %1499 = vrot.lane.b32.xlu0 %v1495_v61, %s2893_s28  ;;  %v3926_v44 = vpop.permute.xlu0 %1135 }
 0x23e   : > { %5096 = vst [vmem:[#allocation74_spill] sm:$0xff] %v3926_v44 }
 0x241   : > { %1505 = vrot.lane.b32.xlu1 %v1497_v3, %s2893_s28  ;;  %1503 = vrot.lane.b32.xlu0 %v1494_v50, %s2893_s28  ;;  %v3928_v7 = vpop.permute.xlu0 %1152 }
 0x242   : > { %5097 = vst [vmem:[#allocation75_spill] sm:$0xff] %v3928_v7 }
 0x245   : > { %2663 = vrot.lane.b32.xlu0 %v2662_v47, %s2892_s29  ;;  %v3930_v36 = vpop.permute.xlu0 %1169 }
 0x246   : > { %5098 = vst [vmem:[#allocation76_spill] sm:$0xff] %v3930_v36 }
 0x249   : > { %v3932_v39 = vpop.permute.xlu0 %1185 }
 0x24a   : > { %5099 = vst [vmem:[#allocation77_spill] sm:$0xff] %v3932_v39 }
 0x24d   : > { %v3934_v58 = vpop.permute.xlu0 %1205 }
 0x24e   : > { %5100 = vst [vmem:[#allocation78_spill] sm:$0xff] %v3934_v58 }
 0x251   : > { %v3936_v6 = vpop.permute.xlu0 %1227 }
 0x252   : > { %5101 = vst [vmem:[#allocation79_spill] sm:$0xff] %v3936_v6 }
 0x255   : > { %v3938_v2 = vpop.permute.xlu0 %1244 }
 0x256   : > { %5102 = vst [vmem:[#allocation80_spill] sm:$0xff] %v3938_v2 }
 0x259   : > { %v3940_v3 = vpop.permute.xlu0 %1261 }
 0x25a   : > { %5103 = vst [vmem:[#allocation81_spill] sm:$0xff] %v3940_v3  ;;  %v2482_v3 = vld [vmem:[%s3152_s25 + $0x10] ss:$20 sps:$4 sm:$0xff]  }
 0x25b   : > { %v1785_v51 = vunpack.c.l.bf16 %v2482_v3  ;;  %v1872_v58 = vunpack.c.h.bf16 %v2482_v3 }
 0x25d   : > { %v3942_v50 = vpop.permute.xlu0 %1284  ;;  %v1787_v7 = vrot.slane %v1785_v51, 2  ;;  %v1874_v9 = vrot.slane %v1872_v58, 1 }
 0x25e   : > { %5104 = vst [vmem:[#allocation82_spill] sm:$0xff] %v3942_v50 }
 0x261   : > { %v3944_v17 = vpop.permute.xlu0 %1301 }
 0x262   : > { %5105 = vst [vmem:[#allocation83_spill] sm:$0xff] %v3944_v17 }
 0x265   : > { %v3946_v61 = vpop.permute.xlu0 %1318 }
 0x266   : > { %5106 = vst [vmem:[#allocation84_spill] sm:$0xff] %v3946_v61 }
 0x287   : > { %v3948_v26 = vpop.permute.xlu0 %1342 }
 0x288   : > { %5107 = vst [vmem:[#allocation85_spill] sm:$0xff] %v3948_v26 }
 0x28b   : > { %v3950_v45 = vpop.permute.xlu0 %1346 }
 0x28c   : > { %5108 = vst [vmem:[#allocation86_spill] sm:$0xff] %v3950_v45 }
 0x28f   : > { %v3952_v47 = vpop.permute.xlu0 %1369 }
 0x290   : > { %5109 = vst [vmem:[#allocation87_spill] sm:$0xff] %v3952_v47 }
 0x293   : > { %v3954_v21 = vpop.permute.xlu0 %1373 }
 0x294   : > { %5110 = vst [vmem:[#allocation88_spill] sm:$0xff] %v3954_v21 }
 0x297   : > { %v3956_v0 = vpop.permute.xlu0 %1395 }
 0x298   : > { %5111 = vst [vmem:[#allocation89_spill] sm:$0xff] %v3956_v0  ;;  %v3974_v0 = vld [vmem:[%s3189_s26 + $0x20] sm:$0xff] }
 0x299   : > { %5119 = vst [vmem:[#allocation97_spill] sm:$0xff] %v3974_v0 }
 0x29b   : > { %v3958_v34 = vpop.permute.xlu0 %1399 }
 0x29c   : > { %5112 = vst [vmem:[#allocation90_spill] sm:$0xff] %v3958_v34  ;;  %v2481_v34 = vld [vmem:[%s3152_s25 + $0x5c] sm:$0xff]   ;;  %s2312_s25 = sshll.u32 %s3159_s23, 4  ;;  %s4814_s25 = int_to_ptr.vmem [resolvable:$true] %s2312_s25 }
 0x29d   : > { %v2138_v3 = vunpack.c.h.bf16 %v2481_v34  ;;  %s2756_s0 = scalar_lea.vmem %s4814_s25, 384  ;;  %p2763_p5 = scmp.lt.s32.totalorder %s4814_s25, %s2761_s21 }
 0x29e   : > { %p2757_p1 = scmp.ne.s32.totalorder %s4814_s25, %s2756_s0 }
 0x29f   : > { %v3960_v50 = vpop.permute.xlu0 %1435  ;;  %v2140_v51 = vrot.slane %v2138_v3, 6 }
 0x2a0   : > { %5113 = vst [vmem:[#allocation91_spill] sm:$0xff] %v3960_v50  ;;  %p2758_p7 = pnand %p2757_p1, %p5263_p10 }
 0x2a2   : > { %p2759_p9 = pneg %p2758_p7 }
 0x2a3   : > { %v3962_v6 = vpop.permute.xlu0 %1439 }
 0x2a4   : > { %5114 = vst [vmem:[#allocation92_spill] sm:$0xff] %v3962_v6 }
 0x2a7   : > { %v3964_v39 = vpop.permute.xlu0 %1467 }
 0x2a8   : > { %5115 = vst [vmem:[#allocation93_spill] sm:$0xff] %v3964_v39 }
 0x2ab   : > { %v3966_v26 = vpop.permute.xlu0 %1471 }
 0x2ac   : > { %5116 = vst [vmem:[#allocation94_spill] sm:$0xff] %v3966_v26  ;;  %v3981_v26 = vld [vmem:[%s3189_s26 + $0x80] sm:$0xff] }
 0x2af   : > { %v3968_v45 = vpop.permute.xlu0 %1499 }
 0x2b0   : > { %5117 = vst [vmem:[#allocation95_spill] sm:$0xff] %v3968_v45 }
 0x2b3   : > { %v3970_v44 = vpop.permute.xlu0 %1503 }
 0x2b4   : > { %5118 = vst [vmem:[#allocation96_spill] sm:$0xff] %v3970_v44  ;;  %v1681_v44 = vunpack.c.l.bf16 %v2481_v34 }
 0x2b7   : > { %v2664_v61 = vpop.permute.xlu0 %2663 }
 0x2b8   : > { %v2665_v47 = vunpack.i.l.bf16 %v2664_v61  ;;  %v2666_v41 = vunpack.i.h.bf16 %v2664_v61 }
 0x2ba   : > { %v1525_v21 = vmul.f32 %v2665_v47, %v3835_v52  ;;  %v1524_v50 = vmul.f32 %v3974_v0, %v2665_v47  ;;  %v1542_v39 = vmul.f32 %v2665_v47, %v3851_v62  ;;  %v1541_v45 = vmul.f32 %v3981_v26, %v2665_v47 }
 0x2bb   : > { %v1559_v42 = vmul.f32 %v2665_v47, %v3869_v53  ;;  %v1584_v58 = vmul.f32 %v2666_v41, %v3835_v52  ;;  %v1617_v3 = vmul.f32 %v2666_v41, %v3562_v11 }
 0x2bc   : > { %v1529_v6 = vrot.slane %v1525_v21, 2  ;;  %v1528_v17 = vrot.slane %v1524_v50, 2  ;;  %v1546_v2 = vrot.slane %v1542_v39, 2  ;;  %v1545_v36 = vrot.slane %v1541_v45, 2 }
 0x2bd   : > { %v1558_v21 = vmul.f32 %v3987_v35, %v2665_v47  ;;  %v1683_v50 = vrot.slane %v1681_v44, 6  ;;  %v2667_v39 = vpack.i.bf16 %v1787_v7, %v1874_v9  ;;  %v1976_v45 = vunpack.c.h.bf16 %v3912_v59  ;;  %v4000_v44 = vld [vmem:[%s3189_s26 + $0x40] sm:$0x3] }
 0x2be   : > { %1532 = vrot.lane.b32.xlu0 %v1529_v6, %s2893_s28  ;;  %1530 = vrot.lane.b32.xlu1 %v1528_v17, %s2893_s28  ;;  %v2034_v6 = vunpack.c.h.bf16 %v3906_v13  ;;  %5120 = vst [vmem:[#allocation98_spill] sm:$0xff] %v4000_v44  ;;  %v1583_v9 = vmul.f32 %v3974_v0, %v2666_v41  ;;  %v1586_v34 = vmul.f32 %v2666_v41, %v4000_v44 }
 0x2bf   : > { %v1562_v17 = vrot.slane %v1558_v21, 2  ;;  %v1585_v59 = vmul.f32 %v2666_v41, %v3547_v57  ;;  %v4011_v21 = vld [vmem:[%s3189_s26 + $0xa0] sm:$0x3] }
 0x2c0   : > { %v1591_v7 = vrot.slane %v1583_v9, 3  ;;  %v1595_v61 = vrot.slane %v1586_v34, 3  ;;  %v1647_v9 = vmul.f32 %v3987_v35, %v2666_v41 }
 0x2c1   : > { %v1593_v47 = vrot.slane %v1585_v59, 3 }
 0x2c2   : > { %1549 = vrot.lane.b32.xlu0 %v1546_v2, %s2893_s28  ;;  %1547 = vrot.lane.b32.xlu1 %v1545_v36, %s2893_s28  ;;  %v2036_v2 = vrot.slane %v2034_v6, 7  ;;  %v1563_v36 = vrot.slane %v1559_v42, 2  ;;  %v1592_v42 = vrot.slane %v1584_v58, 3  ;;  %v1615_v6 = vmul.f32 %v3981_v26, %v2666_v41 }
 0x2c3   : > { %v1648_v58 = vmul.f32 %v2666_v41, %v3869_v53 }
 0x2c4   : > { %v2672_v13 = vpack.i.bf16 %v2036_v2, %v1976_v45  ;;  %v1596_v57 = vsel %vm483_vm4, %v1592_v42, %v1595_v61  ;;  %v1623_v2 = vrot.slane %v1615_v6, 3 }
 0x2c5   : > { %v1656_v61 = vrot.slane %v1648_v58, 3 }
 0x2c6   : > { %1684 = vrot.lane.b32.xlu0 %v1683_v50, %s2892_s29  ;;  %1564 = vrot.lane.b32.xlu1 %v1562_v17, %s2893_s28  ;;  %v1616_v50 = vmul.f32 %v2666_v41, %v3851_v62  ;;  %v1594_v17 = vsel %vm483_vm4, %v1591_v7, %v1593_v47  ;;  %v1655_v47 = vrot.slane %v1647_v9, 3 }
 0x2c8   : > { %v1624_v45 = vrot.slane %v1616_v50, 3 }
 0x2ca   : > { %2668 = vrot.lane.b32.xlu0 %v2667_v39, %s2894_s4  ;;  %1566 = vrot.lane.b32.xlu1 %v1563_v36, %s2893_s28  ;;  %v1618_v39 = vmul.f32 %v2666_v41, %v4011_v21 }
 0x2cc   : > { %v1627_v36 = vrot.slane %v1618_v39, 3 }
 0x2ce   : > { %2141 = vrot.lane.b32.xlu0 %v2140_v51, %s2894_s4  ;;  %2673 = vrot.lane.b32.xlu1 %v2672_v13, %s2894_s4  ;;  %v1625_v51 = vrot.slane %v1617_v3, 3  ;;  %v4024_v13 = vld [vmem:[%s3189_s26 + $0x100] sm:$0x3]  ;;  %v1628_v34 = vsel %vm483_vm4, %v1624_v45, %v1627_v36 }
 0x2d0   : > { %v1626_v59 = vsel %vm483_vm4, %v1623_v2, %v1625_v51  ;;  %v383_v51 = vmul.f32 %v3981_v26, %v3273_v15 }
 0x2d2   : > { %1599 = vrot.lane.b32.xlu0 %v1592_v42, %s2893_s28  ;;  %1597 = vrot.lane.b32.xlu1 %v1591_v7, %s2893_s28  ;;  %v1650_v42 = vmul.f32 %v2666_v41, %v4024_v13  ;;  %v1649_v7 = vmul.f32 %v2666_v41, %v3583_v37  ;;  %v4040_v37 = vpop.permute.xlu1 %1344 }
 0x2d3   : > { %5121 = vst [vmem:[#allocation99_spill] sm:$0xff] %v4040_v37  ;;  %v336_v37 = vmul.f32 %v3981_v26, %v3290_v27 }
 0x2d4   : > { %v1659_v50 = vrot.slane %v1650_v42, 3  ;;  %v1657_v6 = vrot.slane %v1649_v7, 3  ;;  %v4064_v7 = vld [vmem:[%s3189_s26 + $0xc8] sm:$0xff] }
 0x2d5   : > { %5125 = vst [vmem:[#allocation103_spill] sm:$0xff] %v4064_v7 }
 0x2d6   : > { %1603 = vrot.lane.b32.xlu0 %v1596_v57, %s2893_s28  ;;  %1601 = vrot.lane.b32.xlu1 %v1594_v17, %s2893_s28  ;;  %v1660_v57 = vsel %vm483_vm4, %v1656_v61, %v1659_v50  ;;  %v1658_v17 = vsel %vm483_vm4, %v1655_v47, %v1657_v6  ;;  %v4042_v41 = vpop.permute.xlu1 %1348 }
 0x2d7   : > { %5122 = vst [vmem:[#allocation100_spill] sm:$0xff] %v4042_v41 }
 0x2da   : > { %1631 = vrot.lane.b32.xlu0 %v1624_v45, %s2893_s28  ;;  %1629 = vrot.lane.b32.xlu1 %v1623_v2, %s2893_s28  ;;  %v4044_v39 = vpop.permute.xlu1 %1371  ;;  %v4051_v2 = vld [vmem:[%s3189_s26 + $0x68] sm:$0xff] }
 0x2db   : > { %5123 = vst [vmem:[#allocation101_spill] sm:$0xff] %v4051_v2  ;;  %v381_v36 = vmul.f32 %v4051_v2, %v3273_v15  ;;  %v334_v42 = vmul.f32 %v4051_v2, %v3290_v27 }
 0x2dd   : > { %v391_v9 = vrot.slane %v381_v36, 1 }
 0x2de   : > { %1635 = vrot.lane.b32.xlu0 %v1628_v34, %s2893_s28  ;;  %1633 = vrot.lane.b32.xlu1 %v1626_v59, %s2893_s28  ;;  %v4046_v3 = vpop.permute.xlu1 %1375  ;;  %v392_v34 = vrot.slane %v383_v51, 1  ;;  %v444_v59 = vmul.f32 %v3981_v26, %v3294_v29  ;;  %v668_v51 = vsel %vm641_vm5, %v3743_v24, %v3680_v31  ;;  %v342_v24 = vmul.f32 %v4064_v7, %v3290_v27 }
 0x2e0   : > { %v393_v6 = vsel %vm365_vm2, %v391_v9, %v392_v34  ;;  %v766_v9 = vsel %vm641_vm5, %v3830_v38, %v3765_v43 }
 0x2e1   : > { %v399_v36 = vadd.f32 %v393_v6, %v334_v42  ;;  %v674_v42 = vadd.f32 %v668_v51, %v3446_v40  ;;  %v574_v40 = vmul.f32 %v3981_v26, %v3218_v48  ;;  %v401_v51 = vadd.f32 %v392_v34, %v336_v37 }
 0x2e2   : > { %1663 = vrot.lane.b32.xlu0 %v1656_v61, %s2893_s28  ;;  %1661 = vrot.lane.b32.xlu1 %v1655_v47, %s2893_s28  ;;  %v4048_v45 = vpop.permute.xlu1 %1397  ;;  %v403_v61 = vmul.f32 %v4064_v7, %v3273_v15  ;;  %v4070_v47 = vmul.f32 %v3987_v35, %v3273_v15  ;;  %v669_v15 = vsel %vm641_vm5, %v3749_v10, %v3686_v14 }
 0x2e3   : > { %v772_v27 = vadd.f32 %v766_v9, %v674_v42  ;;  %v4112_v10 = vmul.f32 %v3987_v35, %v3292_v28 }
 0x2e4   : > { %5126 = vst [vmem:[#allocation104_spill] sm:$0xff] %v4070_v47  ;;  %v5130_v2 = vrot.slane %v4070_v47, 1  ;;  %v5150_v47 = vld [vmem:[#allocation44_spill] sm:$0xff] }
 0x2e5   : > { %5131 = vst [vmem:[#allocation108_spill] sm:$0xff] %v4112_v10 }
 0x2e6   : > { %1667 = vrot.lane.b32.xlu0 %v1660_v57, %s2893_s28  ;;  %1665 = vrot.lane.b32.xlu1 %v1658_v17, %s2893_s28  ;;  %v4057_v58 = vpop.permute.xlu1 %1401  ;;  %v448_v57 = vrot.slane %v444_v59, 2  ;;  %v499_v17 = vmul.f32 %v3981_v26, %v3292_v28 }
 0x2e7   : > { %5124 = vst [vmem:[#allocation102_spill] sm:$0xff] %v4057_v58  ;;  %v413_v58 = vrot.slane %v403_v61, 1  ;;  %v4095_v61 = vmul.f32 %v3987_v35, %v3294_v29 }
 0x2e8   : > { %v452_v6 = vadd.f32 %v448_v57, %v399_v36  ;;  %v507_v41 = vrot.slane %v499_v17, 3  ;;  %v576_v17 = vmul.f32 %v3562_v11, %v3218_v48  ;;  %v695_v36 = vsel %vm641_vm5, %v3759_v54, %v3700_v19 }
 0x2e9   : > { %5129 = vst [vmem:[#allocation107_spill] sm:$0xff] %v4095_v61  ;;  %v415_v38 = vsel %vm365_vm2, %v413_v58, %v5130_v2  ;;  %v767_v2 = vsel %vm641_vm5, %v3783_v22, %v3735_v23  ;;  %v676_v58 = vadd.f32 %v669_v15, %v3452_v33  ;;  %v4979_v34 = vrot.slane %v4095_v61, 2 }
 0x2ea   : > { %v4072_v50 = vpop.permute.xlu1 %1437  ;;  %v421_v37 = vadd.f32 %v415_v38, %v342_v24  ;;  %v842_v22 = vsel %vm641_vm5, %v3717_v16, %v3769_v55  ;;  %v582_v15 = vrot.slane %v574_v40, 4  ;;  %v454_v24 = vadd.f32 %v448_v57, %v401_v51 }
 0x2eb   : > { %5127 = vst [vmem:[#allocation105_spill] sm:$0xff] %v4072_v50  ;;  %v501_v50 = vmul.f32 %v3292_v28, %v3562_v11  ;;  %v774_v33 = vadd.f32 %v767_v2, %v676_v58  ;;  %v845_v42 = vadd.f32 %v842_v22, %v772_v27  ;;  %v585_v38 = vrot.slane %v576_v17, 4 }
 0x2ec   : > { %v464_v54 = vadd.f32 %v4979_v34, %v421_v37  ;;  %v702_v16 = vadd.f32 %v695_v36, %v3542_v12  ;;  %v642_v27 = vsel %vm641_vm5, %v3733_v60, %v3665_v46  ;;  %v928_v40 = vsel %vm641_vm5, %v3745_v25, %v3799_v20  ;;  %v5134_v37 = vld [vmem:[#allocation46_spill] sm:$0xff]  ;;  %v5136_v36 = vld [vmem:[#allocation39_spill] sm:$0xff]  ;;  %v5143_v34 = vld [vmem:[#allocation69_spill] sm:$0xff] }
 0x2ed   : > { %v510_v29 = vrot.slane %v501_v50, 3  ;;  %v517_v50 = vadd.f32 %v507_v41, %v452_v6  ;;  %v4980_v6 = vrot.slane %v4112_v10, 3  ;;  %v934_v12 = vadd.f32 %v928_v40, %v845_v42  ;;  %v5141_v40 = vld [vmem:[#allocation37_spill] sm:$0xff]  ;;  %v5148_v10 = vld [vmem:[#allocation72_spill] sm:$0xff]  ;;  %v5180_v46 = vld [vmem:[#allocation59_spill] sm:$0xff] }
 0x2ee   : > { %v4088_v59 = vpop.permute.xlu1 %1441  ;;  %v4153_v60 = vmul.f32 %v3987_v35, %v3218_v48  ;;  %v5183_v48 = vld [vmem:[#allocation87_spill] sm:$0xff] }
 0x2ef   : > { %5128 = vst [vmem:[#allocation106_spill] sm:$0xff] %v4088_v59  ;;  %v694_v59 = vsel %vm641_vm5, %v3753_v32, %v3693_v56  ;;  %v798_v32 = vsel %vm641_vm5, %v3839_v5, %v3767_v8  ;;  %v799_v5 = vsel %vm641_vm5, %v3789_v49, %v3737_v30  ;;  %v592_v57 = vadd.f32 %v582_v15, %v517_v50  ;;  %v5146_v30 = vld [vmem:[#allocation35_spill] sm:$0xff] }
 0x2f0   : > { %v700_v11 = vadd.f32 %v694_v59, %v3528_v4  ;;  %v511_v59 = vsel %vm483_vm4, %v507_v41, %v510_v29  ;;  %v929_v29 = vsel %vm641_vm5, %v3775_v1, %v3864_v18  ;;  %v847_v49 = vadd.f32 %v842_v22, %v774_v33  ;;  %v5132_v41 = vld [vmem:[#allocation29_spill] sm:$0xff]  ;;  %v5137_v22 = vld [vmem:[#allocation63_spill] sm:$0xff] }
 0x2f1   : > { %v859_v51 = vsel %vm641_vm5, %v5132_v41, %v3773_v63  ;;  %v806_v17 = vadd.f32 %v799_v5, %v702_v16  ;;  %v519_v2 = vadd.f32 %v511_v59, %v454_v24  ;;  %5133 = vst [vmem:[#allocation29_spill] sm:$0xff] %v4153_v60  ;;  %v586_v1 = vsel %vm558_vm3, %v582_v15, %v585_v38  ;;  %v5138_v24 = vld [vmem:[#allocation20_spill] sm:$0xff]  ;;  %v5139_v59 = vld [vmem:[#allocation25_spill] sm:$0xff]  ;;  %v5142_v41 = vld [vmem:[#allocation58_spill] sm:$0xff] }
 0x2f2   : > { %v4129_v9 = vpop.permute.xlu1 %1469  ;;  %v804_v4 = vadd.f32 %v798_v32, %v700_v11  ;;  %v5135_v32 = vld [vmem:[#allocation71_spill] sm:$0xff]  ;;  %v539_v11 = vadd.f32 %v4980_v6, %v464_v54  ;;  %v734_v33 = vsel %vm641_vm5, %v5137_v22, %v5136_v36  ;;  %v936_v42 = vadd.f32 %v929_v29, %v847_v49  ;;  %v5145_v6 = vld [vmem:[#allocation53_spill] sm:$0xff] }
 0x2f3   : > { %v1033_v25 = vsel %vm641_vm5, %v5135_v32, %v5134_v37  ;;  %v648_v5 = vadd.f32 %v642_v27, %v5138_v24  ;;  %v1032_v32 = vsel %vm641_vm5, %v5142_v41, %v5141_v40  ;;  %v5144_v15 = vld [vmem:[#allocation43_spill] sm:$0xff]  ;;  %v864_v54 = vadd.f32 %v859_v51, %v806_v17  ;;  %v5151_v17 = vld [vmem:[#allocation21_spill] sm:$0xff] }
 0x2f4   : > { %v862_v58 = vadd.f32 %v859_v51, %v804_v4  ;;  %v5140_v4 = vld [vmem:[#allocation33_spill] sm:$0xff]  ;;  %v961_v38 = vsel %vm641_vm5, %v5144_v15, %v5143_v34  ;;  %v960_v22 = vsel %vm641_vm5, %v5146_v30, %v5145_v6  ;;  %v1040_v29 = vadd.f32 %v1033_v25, %v936_v42  ;;  %v5152_v25 = vld [vmem:[#allocation40_spill] sm:$0xff] }
 0x2f5   : > { %v643_v16 = vsel %vm641_vm5, %v5140_v4, %v5139_v59  ;;  %v1038_v49 = vadd.f32 %v1032_v32, %v934_v12  ;;  %v4986_v27 = vrot.slane %v4153_v60, 4  ;;  %v740_v24 = vadd.f32 %v734_v33, %v648_v5  ;;  %v5147_v4 = vld [vmem:[#allocation47_spill] sm:$0xff] }
 0x2f6   : > { %v4158_v50 = vpop.permute.xlu1 %1473  ;;  %v966_v19 = vadd.f32 %v960_v22, %v862_v58  ;;  %v1065_v61 = vsel %vm641_vm5, %v5148_v10, %v5147_v4  ;;  %v594_v41 = vadd.f32 %v586_v1, %v519_v2  ;;  %v5149_v59 = vld [vmem:[#allocation31_spill] sm:$0xff]  ;;  %v968_v51 = vadd.f32 %v961_v38, %v864_v54  ;;  %v5155_v10 = vld [vmem:[#allocation38_spill] sm:$0xff]  ;;  %v5156_v2 = vld [vmem:[#allocation61_spill] sm:$0xff] }
 0x2f7   : > { %v735_v15 = vsel %vm641_vm5, %v5150_v47, %v5149_v59  ;;  %v650_v34 = vadd.f32 %v643_v16, %v5151_v17  ;;  %v675_v30 = vadd.f32 %v3680_v31, %v592_v57  ;;  %v614_v12 = vadd.f32 %v4986_v27, %v539_v11  ;;  %v5153_v33 = vld [vmem:[#allocation27_spill] sm:$0xff]  ;;  %v5158_v38 = vld [vmem:[#allocation30_spill] sm:$0xff]  ;;  %v5161_v59 = vld [vmem:[#allocation73_spill] sm:$0xff] }
 0x2f8   : > { %v825_v58 = vsel %vm641_vm5, %v5153_v33, %v5152_v25  ;;  %v1064_v1 = vsel %vm641_vm5, %v5156_v2, %v5155_v10  ;;  %v5157_v5 = vld [vmem:[#allocation23_spill] sm:$0xff]  ;;  %v1072_v32 = vadd.f32 %v1065_v61, %v968_v51  ;;  %v1104_v16 = vadd.f32 %v5158_v38, %v1038_v49  ;;  %v5162_v25 = vld [vmem:[#allocation49_spill] sm:$0xff]  ;;  %v5164_v49 = vld [vmem:[#allocation48_spill] sm:$0xff] }
 0x2f9   : > { %v1106_v47 = vadd.f32 %v5157_v5, %v1040_v29  ;;  %v742_v54 = vadd.f32 %v735_v15, %v650_v34  ;;  %v828_v31 = vadd.f32 %v825_v58, %v740_v24  ;;  %v773_v57 = vadd.f32 %v3765_v43, %v675_v30  ;;  %v5159_v22 = vld [vmem:[#allocation51_spill] sm:$0xff]  ;;  %v5163_v29 = vld [vmem:[#allocation34_spill] sm:$0xff] }
 0x2fa   : > { %v4193_v42 = vpop.permute.xlu1 %1501  ;;  %v1070_v11 = vadd.f32 %v1064_v1, %v966_v19  ;;  %v5160_v27 = vld [vmem:[#allocation75_spill] sm:$0xff]  ;;  %v677_v4 = vadd.f32 %v3686_v14, %v594_v41  ;;  %v701_v60 = vadd.f32 %v3693_v56, %v614_v12  ;;  %v896_v61 = vsel %vm641_vm5, %v5163_v29, %v5162_v25  ;;  %v5165_v24 = vld [vmem:[#allocation54_spill] sm:$0xff]  ;;  %v5166_v1 = vld [vmem:[#allocation76_spill] sm:$0xff] }
 0x2fb   : > { %5154 = vst [vmem:[#allocation46_spill] sm:$0xff] %v4193_v42  ;;  %v1160_v17 = vadd.f32 %v5159_v22, %v1106_v47  ;;  %v1158_v33 = vadd.f32 %v5160_v27, %v1104_v16  ;;  %v1120_v34 = vadd.f32 %v5164_v49, %v1072_v32  ;;  %v830_v43 = vadd.f32 %v825_v58, %v742_v54  ;;  %v5168_v56 = vld [vmem:[#allocation67_spill] sm:$0xff]  ;;  %v5169_v12 = vld [vmem:[#allocation41_spill] sm:$0xff]  ;;  %v5170_v16 = vld [vmem:[#allocation52_spill] sm:$0xff] }
 0x2fc   : > { %v1118_v2 = vadd.f32 %v5161_v59, %v1070_v11  ;;  %v902_v51 = vadd.f32 %v896_v61, %v828_v31  ;;  %v846_v30 = vadd.f32 %v3769_v55, %v773_v57  ;;  %v897_v47 = vsel %vm641_vm5, %v5169_v12, %v5168_v56  ;;  %v5171_v29 = vld [vmem:[#allocation57_spill] sm:$0xff]  ;;  %v5172_v49 = vld [vmem:[#allocation80_spill] sm:$0xff]  ;;  %v5177_v25 = vld [vmem:[#allocation70_spill] sm:$0xff] }
 0x2fd   : > { %v1198_v15 = vadd.f32 %v5165_v24, %v1158_v33  ;;  %v1200_v19 = vadd.f32 %v5165_v24, %v1160_v17  ;;  %v1177_v11 = vadd.f32 %v5170_v16, %v1120_v34  ;;  %v775_v17 = vadd.f32 %v3735_v23, %v677_v4  ;;  %v5173_v58 = vld [vmem:[#allocation36_spill] sm:$0xff]  ;;  %v5178_v16 = vld [vmem:[#allocation62_spill] sm:$0xff]  ;;  %v5179_v56 = vld [vmem:[#allocation83_spill] sm:$0xff] }
 0x2fe   : > { %v1175_v14 = vadd.f32 %v5166_v1, %v1118_v2  ;;  %v4214_v41 = vpop.permute.xlu1 %1505  ;;  %v5174_v54 = vld [vmem:[#allocation56_spill] sm:$0xff]  ;;  %v805_v57 = vadd.f32 %v3767_v8, %v701_v60  ;;  %v5175_v2 = vld [vmem:[#allocation78_spill] sm:$0xff]  ;;  %v935_v23 = vadd.f32 %v3799_v20, %v846_v30  ;;  %v904_v4 = vadd.f32 %v897_v47, %v830_v43  ;;  %v5182_v60 = vld [vmem:[#allocation81_spill] sm:$0xff] }
 0x2ff   : > { %5167 = vst [vmem:[#allocation71_spill] sm:$0xff] %v4214_v41  ;;  %v1248_v32 = vadd.f32 %v5171_v29, %v1198_v15  ;;  %v1250_v33 = vadd.f32 %v5172_v49, %v1200_v19  ;;  %v1000_v31 = vsel %vm641_vm5, %v5174_v54, %v5173_v58  ;;  %v5176_v41 = vld [vmem:[#allocation45_spill] sm:$0xff]  ;;  %v1210_v34 = vadd.f32 %v5175_v2, %v1177_v11  ;;  %v5186_v43 = vld [vmem:[#allocation84_spill] sm:$0xff] }
 0x300   : > { %v1208_v61 = vadd.f32 %v5175_v2, %v1175_v14  ;;  %v1001_v12 = vsel %vm641_vm5, %v5177_v25, %v5176_v41  ;;  %v1006_v36 = vadd.f32 %v1000_v31, %v902_v51  ;;  %v5184_v41 = vld [vmem:[#allocation88_spill] sm:$0xff]  ;;  %v848_v20 = vadd.f32 %v3769_v55, %v775_v17  ;;  %v5187_v30 = vld [vmem:[#allocation93_spill] sm:$0xff]  ;;  %v5188_v31 = vld [vmem:[#allocation94_spill] sm:$0xff] }
 0x301   : > { %v1305_v15 = vadd.f32 %v5178_v16, %v1248_v32  ;;  %v1307_v19 = vadd.f32 %v5179_v56, %v1250_v33  ;;  %v1267_v14 = vadd.f32 %v5182_v60, %v1210_v34  ;;  %v863_v32 = vadd.f32 %v3773_v63, %v805_v57  ;;  %v5185_v33 = vld [vmem:[#allocation64_spill] sm:$0xff] }
 0x302   : > { %v1265_v54 = vadd.f32 %v5180_v46, %v1208_v61  ;;  %v1008_v28 = vadd.f32 %v1001_v12, %v904_v4  ;;  %v1039_v34 = vadd.f32 %v5141_v40, %v935_v23  ;;  %v5191_v12 = vld [vmem:[#allocation90_spill] sm:$0xff]  ;;  %v5195_v63 = vld [vmem:[#allocation96_spill] sm:$0xff] }
 0x303   : > { %v1383_v25 = vadd.f32 %v5183_v48, %v1305_v15  ;;  %v1385_v11 = vadd.f32 %v5184_v41, %v1307_v19  ;;  %v1324_v51 = vadd.f32 %v5186_v43, %v1267_v14  ;;  %v5190_v15 = vld [vmem:[#allocation89_spill] sm:$0xff]  ;;  %v937_v14 = vadd.f32 %v3864_v18, %v848_v20  ;;  %v5193_v23 = vld [vmem:[#allocation74_spill] sm:$0xff] }
 0x304   : > { %v1322_v7 = vadd.f32 %v5185_v33, %v1265_v54  ;;  %v967_v40 = vadd.f32 %v5145_v6, %v863_v32 }
 0x305   : > { %v1481_v47 = vadd.f32 %v5187_v30, %v1383_v25  ;;  %v1483_v61 = vadd.f32 %v5188_v31, %v1385_v11  ;;  %v1411_v4 = vadd.f32 %v5191_v12, %v1324_v51  ;;  %v5192_v25 = vld [vmem:[#allocation22_spill] sm:$0xff]  ;;  %v5194_v11 = vld [vmem:[#allocation95_spill] sm:$0xff] }
 0x306   : > { %v1409_v19 = vadd.f32 %v5190_v15, %v1322_v7  ;;  %v5196_v12 = vld [vmem:[#allocation50_spill] sm:$0xff]  ;;  %v1071_v32 = vadd.f32 %v5155_v10, %v967_v40 }
 0x307   : > { %v1515_v51 = vadd.f32 %v5195_v63, %v1411_v4  ;;  %v4284_v4 = vld [vmem:[%s3189_s26 + $0x38] sm:$0x3] }
 0x308   : > { %v1513_v43 = vadd.f32 %v5194_v11, %v1409_v19 }
 0x330   : > { %v4236_v58 = vpop.permute.xlu0 %1532  ;;  %v4238_v8 = vpop.permute.xlu1 %1530 }
 0x331   : > { %5181 = vst [vmem:[#allocation63_spill] sm:$0xff] %v4236_v58  ;;  %v5189_v58 = vld [vmem:[#allocation28_spill] sm:$0xff] }
 0x332   : > { %v1090_v42 = vadd.f32 %v5189_v58, %v1006_v36  ;;  %v1092_v36 = vadd.f32 %v5192_v25, %v1008_v28  ;;  %v5197_v58 = vld [vmem:[#allocation77_spill] sm:$0xff] }
 0x334   : > { %v1550_v60 = vpop.permute.xlu0 %1549  ;;  %v1548_v57 = vpop.permute.xlu1 %1547  ;;  %v1141_v7 = vadd.f32 %v5193_v23, %v1090_v42  ;;  %v5200_v23 = vld [vmem:[#allocation79_spill] sm:$0xff] }
 0x335   : > { %v4254_v54 = vsel %vm1350_vm6, %v1548_v57, %v1550_v60  ;;  %v4256_v55 = vadd.f32 %v1548_v57, %v1481_v47  ;;  %v4258_v17 = vadd.f32 %v1548_v57, %v1483_v61  ;;  %v1041_v60 = vadd.f32 %v5134_v37, %v937_v14  ;;  %v5199_v14 = vld [vmem:[#allocation55_spill] sm:$0xff] }
 0x336   : > { %v1143_v47 = vadd.f32 %v5196_v12, %v1092_v36  ;;  %v1188_v61 = vadd.f32 %v5197_v58, %v1141_v7  ;;  %v1105_v37 = vadd.f32 %v5158_v38, %v1039_v34 }
 0x337   : > { %v1107_v63 = vadd.f32 %v5157_v5, %v1041_v60  ;;  %v1119_v5 = vadd.f32 %v5161_v59, %v1071_v32  ;;  %v5204_v32 = vld [vmem:[#allocation91_spill] sm:$0xff] }
 0x338   : > { %v4269_v57 = vpop.permute.xlu0 %1684  ;;  %v1565_v18 = vpop.permute.xlu1 %1564  ;;  %v1231_v36 = vadd.f32 %v5199_v14, %v1188_v61  ;;  %v1190_v7 = vadd.f32 %v5197_v58, %v1143_v47  ;;  %v1159_v10 = vadd.f32 %v5160_v27, %v1105_v37  ;;  %v5202_v47 = vld [vmem:[#allocation82_spill] sm:$0xff] }
 0x339   : > { %v4271_v20 = vadd.f32 %v1565_v18, %v1513_v43  ;;  %v4273_v28 = vadd.f32 %v1565_v18, %v1515_v51  ;;  %v1688_v6 = vmul.f32 %v4269_v57, %v3835_v52  ;;  %v1687_v42 = vmul.f32 %v3974_v0, %v4269_v57 }
 0x33a   : > { %v1690_v19 = vmul.f32 %v4269_v57, %v4000_v44  ;;  %v1689_v43 = vmul.f32 %v4284_v4, %v4269_v57  ;;  %v1233_v25 = vadd.f32 %v5200_v23, %v1190_v7  ;;  %v5201_v44 = vld [vmem:[#allocation60_spill] sm:$0xff]  ;;  %v1161_v27 = vadd.f32 %v5159_v22, %v1107_v63 }
 0x33b   : > { %5198 = vst [vmem:[#allocation20_spill] sm:$0xff] %v4273_v28  ;;  %v1696_v51 = vrot.slane %v1688_v6, 4  ;;  %v1695_v28 = vrot.slane %v1687_v42, 4  ;;  %v1288_v0 = vadd.f32 %v5201_v44, %v1231_v36  ;;  %v1199_v60 = vadd.f32 %v5165_v24, %v1159_v10  ;;  %v5203_v42 = vld [vmem:[#allocation85_spill] sm:$0xff] }
 0x33c   : > { %v4292_v40 = vpop.permute.xlu0 %2668  ;;  %v1567_v38 = vpop.permute.xlu1 %1566  ;;  %v1699_v34 = vrot.slane %v1690_v19, 4  ;;  %v1697_v12 = vrot.slane %v1689_v43, 4  ;;  %v1290_v6 = vadd.f32 %v5202_v47, %v1233_v25  ;;  %v1720_v19 = vmul.f32 %v3851_v62, %v4269_v57  ;;  %v4319_v25 = vld [vmem:[%s3189_s26 + $0x98] sm:$0x3] }
 0x33d   : > { %v4297_v61 = vsel %vm1350_vm6, %v1565_v18, %v1567_v38  ;;  %1703 = vrot.lane.b32.xlu0 %v1696_v51, %s2893_s28  ;;  %1701 = vrot.lane.b32.xlu1 %v1695_v28, %s2893_s28  ;;  %v1357_v37 = vadd.f32 %v5203_v42, %v1288_v0  ;;  %v1719_v18 = vmul.f32 %v3981_v26, %v4269_v57 }
 0x33e   : > { %v1700_v59 = vsel %vm558_vm3, %v1696_v51, %v1699_v34  ;;  %v1698_v63 = vsel %vm558_vm3, %v1695_v28, %v1697_v12  ;;  %v1722_v22 = vmul.f32 %v4011_v21, %v4269_v57  ;;  %v1721_v0 = vmul.f32 %v4319_v25, %v4269_v57  ;;  %v5205_v28 = vld [vmem:[#allocation86_spill] sm:$0xff] }
 0x33f   : > { %v1449_v7 = vadd.f32 %v5204_v32, %v1357_v37  ;;  %v1176_v10 = vadd.f32 %v5166_v1, %v1119_v5  ;;  %v1249_v51 = vadd.f32 %v5171_v29, %v1199_v60  ;;  %v1201_v12 = vadd.f32 %v5165_v24, %v1161_v27  ;;  %v5206_v60 = vld [vmem:[#allocation92_spill] sm:$0xff] }
 0x340   : > { %v4310_v43 = vpop.permute.xlu0 %2141  ;;  %v4312_v36 = vpop.permute.xlu1 %2673  ;;  %v1359_v38 = vadd.f32 %v5205_v28, %v1290_v6  ;;  %v1377_v34 = vsel %vm1350_vm6, %v5183_v48, %v4044_v39  ;;  %v1728_v44 = vrot.slane %v1720_v19, 4  ;;  %v1727_v37 = vrot.slane %v1719_v18, 4 }
 0x341   : > { %1707 = vrot.lane.b32.xlu0 %v1700_v59, %s2893_s28  ;;  %1705 = vrot.lane.b32.xlu1 %v1698_v63, %s2893_s28  ;;  %v1537_v47 = vadd.f32 %v4238_v8, %v1449_v7  ;;  %v1251_v59 = vadd.f32 %v5172_v49, %v1201_v12  ;;  %v1306_v63 = vadd.f32 %v5178_v16, %v1249_v51  ;;  %v1731_v5 = vrot.slane %v1722_v22, 4 }
 0x342   : > { %v1729_v29 = vrot.slane %v1721_v0, 4  ;;  %v1451_v24 = vadd.f32 %v5206_v60, %v1359_v38  ;;  %v1209_v48 = vadd.f32 %v5175_v2, %v1176_v10  ;;  %v1378_v16 = vsel %vm1350_vm6, %v5184_v41, %v4046_v3  ;;  %v4362_v41 = vld [vmem:[%s3189_s26 + $0xf8] sm:$0x3] }
 0x343   : > { %v1308_v39 = vadd.f32 %v5179_v56, %v1251_v59  ;;  %v1384_v49 = vadd.f32 %v1377_v34, %v1306_v63  ;;  %v1475_v19 = vsel %vm1350_vm6, %v5187_v30, %v4129_v9  ;;  %v1752_v18 = vmul.f32 %v3869_v53, %v4269_v57 }
 0x344   : > { %v1600_v32 = vpop.permute.xlu0 %1599  ;;  %v1598_v1 = vpop.permute.xlu1 %1597  ;;  %v1751_v22 = vmul.f32 %v3987_v35, %v4269_v57  ;;  %v1732_v56 = vsel %vm558_vm3, %v1728_v44, %v1731_v5  ;;  %v1730_v7 = vsel %vm558_vm3, %v1727_v37, %v1729_v29  ;;  %v1754_v3 = vmul.f32 %v4024_v13, %v4269_v57 }
 0x345   : > { %v4338_v27 = vsel %vm1350_vm6, %v1598_v1, %v1600_v32  ;;  %v4340_v6 = vadd.f32 %v1598_v1, %v1537_v47  ;;  %1735 = vrot.lane.b32.xlu0 %v1728_v44, %s2893_s28  ;;  %1733 = vrot.lane.b32.xlu1 %v1727_v37, %s2893_s28  ;;  %v1539_v47 = vadd.f32 %v4238_v8, %v1451_v24  ;;  %v1760_v34 = vrot.slane %v1752_v18, 4  ;;  %v5208_v18 = vld [vmem:[#allocation65_spill] sm:$0xff] }
 0x346   : > { %v1753_v9 = vmul.f32 %v4362_v41, %v4269_v57  ;;  %v1266_v44 = vadd.f32 %v5180_v46, %v1209_v48  ;;  %v1386_v51 = vadd.f32 %v1378_v16, %v1308_v39  ;;  %v1482_v12 = vadd.f32 %v1475_v19, %v1384_v49  ;;  %v5207_v39 = vld [vmem:[#allocation46_spill] sm:$0xff] }
 0x347   : > { %v1403_v38 = vsel %vm1350_vm6, %v5190_v15, %v4048_v45  ;;  %v1476_v57 = vsel %vm1350_vm6, %v5188_v31, %v4158_v50  ;;  %v1759_v37 = vrot.slane %v1751_v22, 4  ;;  %v2671_v63 = vunpack.i.h.bf16 %v4292_v40 }
 0x348   : > { %v1604_v0 = vpop.permute.xlu0 %1603  ;;  %v1602_v32 = vpop.permute.xlu1 %1601  ;;  %v1555_v59 = vadd.f32 %v4254_v54, %v1482_v12  ;;  %v1763_v29 = vrot.slane %v1754_v3, 4  ;;  %v1761_v46 = vrot.slane %v1753_v9, 4  ;;  %v1323_v24 = vadd.f32 %v5185_v33, %v1266_v44 }
 0x349   : > { %v4367_v30 = vsel %vm1350_vm6, %v1602_v32, %v1604_v0  ;;  %v4369_v10 = vadd.f32 %v1602_v32, %v1539_v47  ;;  %1739 = vrot.lane.b32.xlu0 %v1732_v56, %s2893_s28  ;;  %1737 = vrot.lane.b32.xlu1 %v1730_v7, %s2893_s28  ;;  %v1484_v50 = vadd.f32 %v1476_v57, %v1386_v51  ;;  %v5209_v57 = vld [vmem:[#allocation97_spill] sm:$0xff] }
 0x34a   : > { %v1410_v15 = vadd.f32 %v1403_v38, %v1323_v24  ;;  %v1507_v49 = vsel %vm1350_vm6, %v5194_v11, %v5207_v39  ;;  %v1762_v47 = vsel %vm558_vm3, %v1759_v37, %v1761_v46  ;;  %v1792_v22 = vmul.f32 %v2671_v63, %v5208_v18  ;;  %v4405_v11 = vld [vmem:[%s3189_s26 + $0x8] sm:$0xff]  ;;  %v5212_v24 = vld [vmem:[#allocation68_spill] sm:$0xff] }
 0x34b   : > { %v1557_v33 = vadd.f32 %v4254_v54, %v1484_v50  ;;  %v1791_v54 = vmul.f32 %v4405_v11, %v2671_v63  ;;  %v1794_v38 = vmul.f32 %v2671_v63, %v3835_v52  ;;  %v2670_v46 = vunpack.i.l.bf16 %v4292_v40  ;;  %v5213_v50 = vld [vmem:[#allocation103_spill] sm:$0xff] }
 0x34c   : > { %v1632_v1 = vpop.permute.xlu0 %1631  ;;  %v1630_v5 = vpop.permute.xlu1 %1629  ;;  %v1514_v56 = vadd.f32 %v1507_v49, %v1410_v15  ;;  %v1844_v15 = vmul.f32 %v5213_v50, %v2671_v63  ;;  %v1847_v40 = vmul.f32 %v2671_v63, %v3869_v53 }
 0x34d   : > { %v1637_v48 = vsel %vm1350_vm6, %v1630_v5, %v1632_v1  ;;  %v4385_v45 = vadd.f32 %v1630_v5, %v4256_v55  ;;  %1767 = vrot.lane.b32.xlu0 %v1760_v34, %s2893_s28  ;;  %1765 = vrot.lane.b32.xlu1 %v1759_v37, %s2893_s28  ;;  %v1764_v55 = vsel %vm558_vm3, %v1760_v34, %v1763_v29  ;;  %v5210_v37 = vld [vmem:[#allocation66_spill] sm:$0xff]  ;;  %v5211_v1 = vld [vmem:[#allocation101_spill] sm:$0xff] }
 0x34e   : > { %v4389_v31 = vadd.f32 %v1637_v48, %v1555_v59  ;;  %v1572_v3 = vadd.f32 %v4297_v61, %v1514_v56  ;;  %v1793_v34 = vmul.f32 %v5209_v57, %v2671_v63  ;;  %v1819_v59 = vmul.f32 %v2671_v63, %v5210_v37 }
 0x34f   : > { %v1821_v5 = vmul.f32 %v2671_v63, %v3851_v62  ;;  %v1820_v29 = vmul.f32 %v3981_v26, %v2671_v63  ;;  %v1845_v48 = vmul.f32 %v2671_v63, %v5212_v24  ;;  %v1879_v39 = vmul.f32 %v2670_v46, %v5208_v18 }
 0x350   : > { %v1636_v16 = vpop.permute.xlu0 %1635  ;;  %v1634_v19 = vpop.permute.xlu1 %1633  ;;  %v1881_v49 = vmul.f32 %v2670_v46, %v3835_v52  ;;  %v1911_v52 = vmul.f32 %v2670_v46, %v5210_v37  ;;  %v1913_v18 = vmul.f32 %v2670_v46, %v3851_v62  ;;  %v5214_v62 = vld [vmem:[#allocation16_spill] sm:$0xff]  ;;  %v1942_v24 = vmul.f32 %v5213_v50, %v2670_v46  ;;  %v5216_v50 = vld [vmem:[#allocation17_spill] sm:$0xff] }
 0x351   : > { %v1638_v0 = vsel %vm1350_vm6, %v1634_v19, %v1636_v16  ;;  %v4400_v32 = vadd.f32 %v1634_v19, %v4258_v17  ;;  %1771 = vrot.lane.b32.xlu0 %v1764_v55, %s2893_s28  ;;  %1769 = vrot.lane.b32.xlu1 %v1762_v47, %s2893_s28  ;;  %v1880_v16 = vmul.f32 %v5209_v57, %v2670_v46  ;;  %v1889_v55 = vrot.slane %v1879_v39, 1 }
 0x352   : > { %v4408_v7 = vadd.f32 %v1638_v0, %v1557_v33  ;;  %v1878_v33 = vmul.f32 %v4405_v11, %v2670_v46  ;;  %v1846_v19 = vmul.f32 %v3987_v35, %v2671_v63  ;;  %v1890_v47 = vrot.slane %v1881_v49, 1 }
 0x353   : > { %v1887_v0 = vrot.slane %v1880_v16, 1  ;;  %v358_v37 = vmul.f32 %v4405_v11, %v5214_v62  ;;  %v1950_v16 = vrot.slane %v1942_v24, 1 }
 0x354   : > { %v1664_v9 = vpop.permute.xlu0 %1663  ;;  %v1662_v44 = vpop.permute.xlu1 %1661 }
 0x355   : > { %v1669_v51 = vsel %vm1350_vm6, %v1662_v44, %v1664_v9  ;;  %v4413_v17 = vadd.f32 %v1662_v44, %v4271_v20  ;;  %1801 = vrot.lane.b32.xlu0 %v1792_v22, %s2895_s22  ;;  %1799 = vrot.lane.b32.xlu1 %v1791_v54, %s2895_s22  ;;  %v1818_v20 = vmul.f32 %v5211_v1, %v2671_v63  ;;  %v1886_v22 = vrot.slane %v1878_v33, 1 }
 0x356   : > { %v4417_v12 = vadd.f32 %v1669_v51, %v1572_v3  ;;  %v1891_v54 = vsel %vm365_vm2, %v1889_v55, %v1890_v47  ;;  %v1910_v3 = vmul.f32 %v5211_v1, %v2670_v46  ;;  %v1912_v63 = vmul.f32 %v3981_v26, %v2670_v46  ;;  %v2686_v1 = vld [vmem:[%s3189_s26 + $0xd0] sm:$0xff] }
 0x357   : > { %v1888_v56 = vsel %vm365_vm2, %v1886_v22, %v1887_v0  ;;  %v1921_v9 = vrot.slane %v1911_v52, 1  ;;  %v1922_v44 = vrot.slane %v1913_v18, 1  ;;  %v369_v39 = vrot.slane %v358_v37, 1  ;;  %v4479_v52 = vld [vmem:[%s3189_s26 + $0x28] sm:$0xff] }
 0x358   : > { %v1918_v51 = vrot.slane %v1910_v3, 1  ;;  %v326_v55 = vmul.f32 %v4405_v11, %v5216_v50  ;;  %v5217_v3 = vld [vmem:[#allocation18_spill] sm:$0xff]  ;;  %v4492_v37 = vld [vmem:[%s3189_s26 + $0x88] sm:$0xff] }
 0x359   : > { %1805 = vrot.lane.b32.xlu0 %v1794_v38, %s2895_s22  ;;  %1803 = vrot.lane.b32.xlu1 %v1793_v34, %s2895_s22  ;;  %v1919_v38 = vrot.slane %v1912_v63, 1  ;;  %v360_v34 = vmul.f32 %v5209_v57, %v5214_v62  ;;  %v476_v11 = vmul.f32 %v5209_v57, %v5217_v3 }
 0x35d   : > { %1828 = vrot.lane.b32.xlu0 %v1819_v59, %s2895_s22  ;;  %1826 = vrot.lane.b32.xlu1 %v1818_v20, %s2895_s22  ;;  %v1923_v59 = vsel %vm365_vm2, %v1921_v9, %v1922_v44  ;;  %v1943_v20 = vmul.f32 %v2686_v1, %v2670_v46  ;;  %v328_v9 = vmul.f32 %v5209_v57, %v5216_v50 }
 0x35f   : > { %v1953_v49 = vrot.slane %v1943_v20, 1  ;;  %v5218_v20 = vld [vmem:[#allocation15_spill] sm:$0xff] }
 0x361   : > { %1832 = vrot.lane.b32.xlu0 %v1821_v5, %s2895_s22  ;;  %1830 = vrot.lane.b32.xlu1 %v1820_v29, %s2895_s22  ;;  %v1920_v5 = vsel %vm365_vm2, %v1918_v51, %v1919_v38  ;;  %v1945_v29 = vmul.f32 %v2670_v46, %v3869_v53  ;;  %v5215_v53 = vld [vmem:[#allocation19_spill] sm:$0xff] }
 0x363   : > { %v1954_v33 = vrot.slane %v1945_v29, 1 }
 0x365   : > { %1854 = vrot.lane.b32.xlu0 %v1845_v48, %s2895_s22  ;;  %1852 = vrot.lane.b32.xlu1 %v1844_v15, %s2895_s22  ;;  %v1944_v48 = vmul.f32 %v3987_v35, %v2670_v46  ;;  %v370_v15 = vrot.slane %v360_v34, 1  ;;  %v432_v46 = vmul.f32 %v5209_v57, %v5215_v53  ;;  %v1955_v22 = vsel %vm365_vm2, %v1953_v49, %v1954_v33 }
 0x366   : > { %v478_v34 = vmul.f32 %v4284_v4, %v5217_v3 }
 0x367   : > { %v379_v29 = vadd.f32 %v370_v15, %v328_v9  ;;  %v5220_v9 = vld [vmem:[#allocation24_spill] sm:$0xff] }
 0x369   : > { %1858 = vrot.lane.b32.xlu0 %v1847_v40, %s2895_s22  ;;  %1856 = vrot.lane.b32.xlu1 %v1846_v19, %s2895_s22  ;;  %v1951_v40 = vrot.slane %v1944_v48, 1  ;;  %v2675_v19 = vunpack.i.l.bf16 %v4312_v36  ;;  %v488_v48 = vrot.slane %v478_v34, 3 }
 0x36b   : > { %v1982_v18 = vmul.f32 %v4479_v52, %v2675_v19  ;;  %v1998_v1 = vmul.f32 %v3981_v26, %v2675_v19  ;;  %v2015_v53 = vmul.f32 %v3987_v35, %v2675_v19 }
 0x36d   : > { %1894 = vrot.lane.b32.xlu0 %v1891_v54, %s2895_s22  ;;  %1892 = vrot.lane.b32.xlu1 %v1888_v56, %s2895_s22  ;;  %v1981_v54 = vmul.f32 %v5209_v57, %v2675_v19  ;;  %v436_v56 = vrot.slane %v432_v46, 2 }
 0x36f   : > { %v1985_v51 = vrot.slane %v1981_v54, 2 }
 0x371   : > { %1898 = vrot.lane.b32.xlu0 %v1890_v47, %s2895_s22  ;;  %1896 = vrot.lane.b32.xlu1 %v1887_v0, %s2895_s22  ;;  %v371_v47 = vsel %vm365_vm2, %v369_v39, %v370_v15  ;;  %v1952_v0 = vsel %vm365_vm2, %v1950_v16, %v1951_v40  ;;  %v4501_v39 = vunpack.i.h.bf16 %v4312_v36  ;;  %v4504_v16 = vld [vmem:[%s3189_s26 + $0xe8] sm:$0xff]  ;;  %v553_v15 = vmul.f32 %v4284_v4, %v5218_v20 }
 0x372   : > { %v377_v63 = vadd.f32 %v371_v47, %v326_v55  ;;  %v442_v55 = vadd.f32 %v436_v56, %v379_v29 }
 0x373   : > { %v563_v54 = vrot.slane %v553_v15, 4 }
 0x374   : > { %v440_v62 = vadd.f32 %v436_v56, %v377_v63  ;;  %v2042_v56 = vmul.f32 %v4284_v4, %v4501_v39 }
 0x375   : > { %1926 = vrot.lane.b32.xlu0 %v1923_v59, %s2895_s22  ;;  %1924 = vrot.lane.b32.xlu1 %v1920_v5, %s2895_s22  ;;  %v1999_v59 = vmul.f32 %v4492_v37, %v2675_v19  ;;  %v551_v5 = vmul.f32 %v5209_v57, %v5218_v20 }
 0x377   : > { %v2003_v49 = vrot.slane %v1999_v59, 2  ;;  %v560_v46 = vrot.slane %v551_v5, 4 }
 0x379   : > { %1930 = vrot.lane.b32.xlu0 %v1922_v44, %s2895_s22  ;;  %1928 = vrot.lane.b32.xlu1 %v1919_v38, %s2895_s22  ;;  %v1986_v44 = vrot.slane %v1982_v18, 2  ;;  %v485_v38 = vrot.slane %v476_v11, 3  ;;  %v2041_v18 = vmul.f32 %v4479_v52, %v4501_v39  ;;  %v5219_v11 = vld [vmem:[#allocation98_spill] sm:$0xff]  ;;  %v564_v5 = vsel %vm558_vm3, %v560_v46, %v563_v54 }
 0x37a   : > { %v2043_v63 = vmul.f32 %v4501_v39, %v5219_v11 }
 0x37b   : > { %v495_v24 = vadd.f32 %v485_v38, %v440_v62  ;;  %v489_v36 = vsel %vm483_vm4, %v485_v38, %v488_v48  ;;  %v344_v38 = vmul.f32 %v3987_v35, %v5216_v50  ;;  %v5221_v62 = vld [vmem:[#allocation39_spill] sm:$0xff]  ;;  %v2049_v59 = vrot.slane %v2041_v18, 3  ;;  %v5224_v50 = vld [vmem:[#allocation25_spill] sm:$0xff] }
 0x37c   : > { %v2052_v29 = vrot.slane %v2043_v63, 3  ;;  %v598_v18 = vmul.f32 %v4362_v41, %v5218_v20 }
 0x37d   : > { %1958 = vrot.lane.b32.xlu0 %v1955_v22, %s2895_s22  ;;  %1956 = vrot.lane.b32.xlu1 %v1952_v0, %s2895_s22  ;;  %v570_v47 = vadd.f32 %v560_v46, %v495_v24  ;;  %v2019_v0 = vrot.slane %v2015_v53, 2  ;;  %v2050_v24 = vrot.slane %v2042_v56, 3  ;;  %v2072_v46 = vmul.f32 %v3981_v26, %v4501_v39  ;;  %v5227_v26 = vld [vmem:[#allocation107_spill] sm:$0xff]  ;;  %v5229_v56 = vld [vmem:[#allocation108_spill] sm:$0xff] }
 0x37e   : > { %v5228_v11 = vrot.slane %v5227_v26, 2 }
 0x381   : > { %1962 = vrot.lane.b32.xlu0 %v1954_v33, %s2895_s22  ;;  %1960 = vrot.lane.b32.xlu1 %v1951_v40, %s2895_s22  ;;  %v2002_v33 = vrot.slane %v1998_v1, 2  ;;  %v2016_v40 = vmul.f32 %v4504_v16, %v2675_v19  ;;  %v2040_v19 = vmul.f32 %v5209_v57, %v4501_v39  ;;  %v523_v57 = vmul.f32 %v4362_v41, %v5217_v3  ;;  %v5225_v3 = vld [vmem:[#allocation40_spill] sm:$0xff] }
 0x383   : > { %v2020_v22 = vrot.slane %v2016_v40, 2  ;;  %v2048_v1 = vrot.slane %v2040_v19, 3  ;;  %v532_v35 = vrot.slane %v523_v57, 3  ;;  %v5226_v19 = vld [vmem:[#allocation31_spill] sm:$0xff]  ;;  %v2080_v57 = vrot.slane %v2072_v46, 3 }
 0x385   : > { %1989 = vrot.lane.b32.xlu0 %v1986_v44, %s2895_s22  ;;  %1987 = vrot.lane.b32.xlu1 %v1985_v51, %s2895_s22  ;;  %v649_v44 = vadd.f32 %v5220_v9, %v570_v47  ;;  %v497_v51 = vadd.f32 %v489_v36, %v442_v55  ;;  %v2073_v55 = vmul.f32 %v4492_v37, %v4501_v39  ;;  %v5230_v9 = vrot.slane %v5229_v56, 3 }
 0x386   : > { %v2053_v47 = vsel %vm483_vm4, %v2049_v59, %v2052_v29  ;;  %v2051_v36 = vsel %vm483_vm4, %v2048_v1, %v2050_v24  ;;  %v5233_v24 = vld [vmem:[#allocation36_spill] sm:$0xff] }
 0x387   : > { %v741_v34 = vadd.f32 %v5221_v62, %v649_v44  ;;  %v572_v48 = vadd.f32 %v564_v5, %v497_v51  ;;  %v5231_v44 = vld [vmem:[#allocation49_spill] sm:$0xff]  ;;  %v5232_v5 = vld [vmem:[#allocation67_spill] sm:$0xff] }
 0x389   : > { %2006 = vrot.lane.b32.xlu0 %v2003_v49, %s2895_s22  ;;  %2004 = vrot.lane.b32.xlu1 %v2002_v33, %s2895_s22  ;;  %v5222_v49 = vld [vmem:[#allocation104_spill] sm:$0xff]  ;;  %v651_v53 = vadd.f32 %v5224_v50, %v572_v48  ;;  %v829_v15 = vadd.f32 %v5225_v3, %v741_v34  ;;  %v607_v34 = vrot.slane %v598_v18, 4 }
 0x38a   : > { %v5223_v33 = vrot.slane %v5222_v49, 1  ;;  %v2105_v49 = vmul.f32 %v4504_v16, %v4501_v39 }
 0x38b   : > { %v743_v54 = vadd.f32 %v5226_v19, %v651_v53  ;;  %v903_v51 = vadd.f32 %v5231_v44, %v829_v15  ;;  %v2107_v53 = vmul.f32 %v4501_v39, %v4024_v13  ;;  %v5234_v15 = vld [vmem:[#allocation29_spill] sm:$0xff]  ;;  %v5238_v13 = vld [vmem:[#allocation26_spill] sm:$0xff]  ;;  %v5241_v44 = vld [vmem:[#allocation32_spill] sm:$0xff] }
 0x38c   : > { %v423_v40 = vadd.f32 %v5223_v33, %v344_v38  ;;  %v2081_v38 = vrot.slane %v2073_v55, 3  ;;  %v4565_v33 = vld [vmem:[%s3189_s26 + $0xe0] sm:$0xff]  ;;  %v5235_v55 = vrot.slane %v5234_v15, 4  ;;  %v2113_v19 = vrot.slane %v2105_v49, 3  ;;  %v5245_v15 = vld [vmem:[#allocation60_spill] sm:$0xff] }
 0x38d   : > { %2023 = vrot.lane.b32.xlu0 %v2020_v22, %s2895_s22  ;;  %2021 = vrot.lane.b32.xlu1 %v2019_v0, %s2895_s22  ;;  %v2075_v22 = vmul.f32 %v4501_v39, %v4011_v21  ;;  %v2074_v0 = vmul.f32 %v4319_v25, %v4501_v39  ;;  %v533_v21 = vsel %vm483_vm4, %v5230_v9, %v532_v35  ;;  %v5240_v9 = vld [vmem:[#allocation74_spill] sm:$0xff] }
 0x38e   : > { %v466_v63 = vadd.f32 %v5228_v11, %v423_v40  ;;  %v1007_v48 = vadd.f32 %v5233_v24, %v903_v51  ;;  %v2104_v40 = vmul.f32 %v4565_v33, %v4501_v39  ;;  %v608_v46 = vsel %vm558_vm3, %v5235_v55, %v607_v34  ;;  %v2691_v34 = vld [vmem:[%s3189_s26 + $0x20] sm:$0xff] }
 0x38f   : > { %v2084_v62 = vrot.slane %v2075_v22, 3  ;;  %v2082_v20 = vrot.slane %v2074_v0, 3  ;;  %v5237_v0 = vld [vmem:[#allocation28_spill] sm:$0xff] }
 0x390   : > { %v1091_v18 = vadd.f32 %v5237_v0, %v1007_v48  ;;  %v2146_v48 = vmul.f32 %v4284_v4, %v4310_v43 }
 0x391   : > { %2056 = vrot.lane.b32.xlu0 %v2049_v59, %s2895_s22  ;;  %2054 = vrot.lane.b32.xlu1 %v2048_v1, %s2895_s22  ;;  %v831_v59 = vadd.f32 %v5225_v3, %v743_v54  ;;  %v541_v1 = vadd.f32 %v533_v21, %v466_v63  ;;  %v2085_v35 = vsel %vm483_vm4, %v2081_v38, %v2084_v62  ;;  %v2112_v54 = vrot.slane %v2104_v40, 3  ;;  %v5239_v63 = vld [vmem:[#allocation22_spill] sm:$0xff] }
 0x392   : > { %v2083_v50 = vsel %vm483_vm4, %v2080_v57, %v2082_v20  ;;  %v2106_v3 = vmul.f32 %v4362_v41, %v4501_v39  ;;  %v2116_v39 = vrot.slane %v2107_v53, 3  ;;  %v1142_v21 = vadd.f32 %v5240_v9, %v1091_v18  ;;  %v4626_v9 = vpop.permute.xlu0 %1667 }
 0x393   : > { %v905_v29 = vadd.f32 %v5232_v5, %v831_v59  ;;  %v616_v22 = vadd.f32 %v608_v46, %v541_v1  ;;  %v2145_v20 = vmul.f32 %v4479_v52, %v4310_v43  ;;  %v2144_v59 = vmul.f32 %v2691_v34, %v4310_v43  ;;  %v5243_v52 = vld [vmem:[#allocation42_spill] sm:$0xff] }
 0x394   : > { %v2114_v11 = vrot.slane %v2106_v3, 3  ;;  %v1189_v62 = vadd.f32 %v5197_v58, %v1142_v21  ;;  %v2117_v1 = vsel %vm483_vm4, %v2113_v19, %v2116_v39  ;;  %v2154_v18 = vrot.slane %v2146_v48, 4  ;;  %v5252_v39 = vld [vmem:[#allocation63_spill] sm:$0xff]  ;;  %v4628_v21 = vpop.permute.xlu1 %1665 }
 0x395   : > { %2060 = vrot.lane.b32.xlu0 %v2053_v47, %s2895_s22  ;;  %2058 = vrot.lane.b32.xlu1 %v2051_v36, %s2895_s22  ;;  %v5236_v47 = vld [vmem:[#allocation45_spill] sm:$0xff]  ;;  %v703_v26 = vadd.f32 %v5238_v13, %v616_v22  ;;  %v2153_v46 = vrot.slane %v2145_v20, 4  ;;  %v2152_v4 = vrot.slane %v2144_v59, 4 }
 0x396   : > { %v1009_v36 = vadd.f32 %v5236_v47, %v905_v29  ;;  %v2115_v5 = vsel %vm483_vm4, %v2112_v54, %v2114_v11  ;;  %v2692_v29 = vld [vmem:[%s3189_s26 + $0x40] sm:$0x3]  ;;  %v1232_v49 = vadd.f32 %v5199_v14, %v1189_v62  ;;  %v5246_v47 = vld [vmem:[#allocation100_spill] sm:$0xff]  ;;  %v5247_v14 = vld [vmem:[#allocation105_spill] sm:$0xff]  ;;  %v1534_v11 = vsel %vm1350_vm6, %v4238_v8, %v5252_v39 }
 0x397   : > { %v807_v51 = vadd.f32 %v5241_v44, %v703_v26  ;;  %v2147_v24 = vmul.f32 %v2692_v29, %v4310_v43  ;;  %v5251_v26 = vld [vmem:[#allocation106_spill] sm:$0xff]  ;;  %v2177_v44 = vmul.f32 %v4492_v37, %v4310_v43  ;;  %v2178_v8 = vmul.f32 %v4319_v25, %v4310_v43  ;;  %v5253_v37 = vld [vmem:[#allocation47_spill] sm:$0xff] }
 0x398   : > { %v1093_v56 = vadd.f32 %v5239_v63, %v1009_v36  ;;  %v1289_v55 = vadd.f32 %v5245_v15, %v1232_v49  ;;  %v5248_v36 = vld [vmem:[#allocation91_spill] sm:$0xff]  ;;  %v2694_v62 = vld [vmem:[%s3189_s26 + $0xa0] sm:$0x3] }
 0x399   : > { %2088 = vrot.lane.b32.xlu0 %v2081_v38, %s2895_s22  ;;  %2086 = vrot.lane.b32.xlu1 %v2080_v57, %s2895_s22  ;;  %v5242_v38 = vld [vmem:[#allocation50_spill] sm:$0xff]  ;;  %v1443_v22 = vsel %vm1350_vm6, %v5248_v36, %v5247_v14  ;;  %v2156_v0 = vrot.slane %v2147_v24, 4  ;;  %v2179_v20 = vmul.f32 %v2694_v62, %v4310_v43  ;;  %v2185_v49 = vrot.slane %v2177_v44, 4  ;;  %v5259_v44 = vld [vmem:[#allocation84_spill] sm:$0xff] }
 0x39a   : > { %v1144_v57 = vadd.f32 %v5242_v38, %v1093_v56  ;;  %v2210_v14 = vmul.f32 %v4362_v41, %v4310_v43 }
 0x39c   : > { %v1191_v40 = vadd.f32 %v5197_v58, %v1144_v57  ;;  %v1352_v58 = vsel %vm1350_vm6, %v5205_v28, %v5246_v47  ;;  %v1444_v28 = vsel %vm1350_vm6, %v5206_v60, %v5251_v26  ;;  %v2157_v57 = vsel %vm558_vm3, %v2153_v46, %v2156_v0  ;;  %v2695_v47 = vld [vmem:[%s3189_s26 + $0x100] sm:$0x3] }
 0x39d   : > { %2092 = vrot.lane.b32.xlu0 %v2085_v35, %s2895_s22  ;;  %2090 = vrot.lane.b32.xlu1 %v2083_v50, %s2895_s22  ;;  %v865_v35 = vadd.f32 %v5243_v52, %v807_v51  ;;  %v5244_v50 = vld [vmem:[#allocation99_spill] sm:$0xff]  ;;  %v2693_v51 = vld [vmem:[%s3189_s26 + $0x80] sm:$0xff]  ;;  %v2155_v60 = vsel %vm558_vm3, %v2152_v4, %v2154_v18  ;;  %v5255_v18 = vld [vmem:[#allocation52_spill] sm:$0xff]  ;;  %v2218_v26 = vrot.slane %v2210_v14, 4  ;;  %s2762_s26 = scalar_lea.vmem %s2761_s21, 768 }
 0x39e   : > { %v1351_v53 = vsel %vm1350_vm6, %v5203_v42, %v5244_v50  ;;  %v1234_v3 = vadd.f32 %v5200_v23, %v1191_v40  ;;  %v5250_v23 = vld [vmem:[#allocation69_spill] sm:$0xff]  ;;  %v2176_v38 = vmul.f32 %v2693_v51, %v4310_v43  ;;  %v2186_v50 = vrot.slane %v2178_v8, 4  ;;  %p2764_p8 = scmp.lt.s32.totalorder %s2762_s26, %s2756_s0 }
 0x39f   : > { %v1358_v42 = vadd.f32 %v1351_v53, %v1289_v55  ;;  %v969_v13 = vadd.f32 %v5250_v23, %v865_v35  ;;  %v2188_v35 = vrot.slane %v2179_v20, 4 }
 0x3a0   : > { %v2184_v40 = vrot.slane %v2176_v38, 4  ;;  %v5260_v38 = vld [vmem:[#allocation71_spill] sm:$0xff]  ;;  %p2765_p12 = por %p2764_p8, %p2763_p5 }
 0x3a1   : > { %2120 = vrot.lane.b32.xlu0 %v2113_v19, %s2895_s22  ;;  %2118 = vrot.lane.b32.xlu1 %v2112_v54, %s2895_s22  ;;  %v5249_v19 = vld [vmem:[#allocation82_spill] sm:$0xff]  ;;  %v1450_v56 = vadd.f32 %v1443_v22, %v1358_v42 }
 0x3a2   : > { %v1291_v54 = vadd.f32 %v5249_v19, %v1234_v3  ;;  %v2187_v0 = vsel %vm558_vm3, %v2184_v40, %v2186_v50  ;;  %p2766_p4 = pnand %p2765_p12, %p2759_p9 }
 0x3a3   : > { %v1538_v59 = vadd.f32 %v1534_v11, %v1450_v56 }
 0x3a4   : > { %v1360_v63 = vadd.f32 %v1352_v58, %v1291_v54  ;;  %v2211_v58 = vmul.f32 %v2695_v47, %v4310_v43 }
 0x3a5   : > { %2124 = vrot.lane.b32.xlu0 %v2117_v1, %s2895_s22  ;;  %2122 = vrot.lane.b32.xlu1 %v2115_v5, %s2895_s22  ;;  %v1073_v1 = vadd.f32 %v5253_v37, %v969_v13  ;;  %v1612_v5 = vadd.f32 %v4338_v27, %v1538_v59  ;;  %v5254_v27 = vld [vmem:[#allocation48_spill] sm:$0xff] }
 0x3a6   : > { %v1452_v34 = vadd.f32 %v1444_v28, %v1360_v63  ;;  %v2220_v13 = vrot.slane %v2211_v58, 4  ;;  %v5256_v28 = vld [vmem:[#allocation81_spill] sm:$0xff]  ;;  %v5257_v63 = vld [vmem:[#allocation102_spill] sm:$0xff] }
 0x3a7   : > { %v1121_v3 = vadd.f32 %v5254_v27, %v1073_v1 }
 0x3a8   : > { %v1540_v29 = vadd.f32 %v1534_v11, %v1452_v34 }
 0x3a9   : > { %2160 = vrot.lane.b32.xlu0 %v2153_v46, %s2895_s22  ;;  %2158 = vrot.lane.b32.xlu1 %v2152_v4, %s2895_s22  ;;  %v2209_v4 = vmul.f32 %v4504_v16, %v4310_v43  ;;  %v1178_v19 = vadd.f32 %v5255_v18, %v1121_v3 }
 0x3aa   : > { %v1614_v15 = vadd.f32 %v4367_v30, %v1540_v29  ;;  %v2189_v30 = vsel %vm558_vm3, %v2185_v49, %v2188_v35 }
 0x3ad   : > { %2164 = vrot.lane.b32.xlu0 %v2157_v57, %s2895_s22  ;;  %2162 = vrot.lane.b32.xlu1 %v2155_v60, %s2895_s22  ;;  %v5261_v57 = vld [vmem:[#allocation96_spill] sm:$0xff] }
 0x3af   : > { %v1704_v24 = vpop.permute.xlu0 %1703  ;;  %v1702_v48 = vpop.permute.xlu1 %1701 }
 0x3b0   : > { %v1709_v52 = vsel %vm1350_vm6, %v1702_v48, %v1704_v24  ;;  %v4646_v25 = vadd.f32 %v1702_v48, %v4340_v6  ;;  %v2208_v6 = vmul.f32 %v4565_v33, %v4310_v43  ;;  %v1211_v33 = vadd.f32 %v5175_v2, %v1178_v19  ;;  %v5258_v2 = vld [vmem:[#allocation90_spill] sm:$0xff] }
 0x3b1   : > { %v4648_v53 = vadd.f32 %v1709_v52, %v1612_v5  ;;  %2192 = vrot.lane.b32.xlu0 %v2185_v49, %s2895_s22  ;;  %2190 = vrot.lane.b32.xlu1 %v2184_v40, %s2895_s22  ;;  %v2217_v43 = vrot.slane %v2209_v4, 4  ;;  %v1404_v56 = vsel %vm1350_vm6, %v5258_v2, %v5257_v63  ;;  %v1670_v24 = vsel %vm1350_vm6, %v4628_v21, %v4626_v9 }
 0x3b2   : > { %v2216_v41 = vrot.slane %v2208_v6, 4  ;;  %v1268_v39 = vadd.f32 %v5256_v28, %v1211_v33 }
 0x3b3   : > { %v1708_v55 = vpop.permute.xlu0 %1707  ;;  %v1706_v46 = vpop.permute.xlu1 %1705  ;;  %v2221_v8 = vsel %vm558_vm3, %v2217_v43, %v2220_v13 }
 0x3b4   : > { %v1710_v36 = vsel %vm1350_vm6, %v1706_v46, %v1708_v55  ;;  %v1717_v22 = vadd.f32 %v1706_v46, %v4369_v10  ;;  %v1325_v51 = vadd.f32 %v5259_v44, %v1268_v39  ;;  %v2219_v34 = vsel %vm558_vm3, %v2216_v41, %v2218_v26 }
 0x3b5   : > { %v1718_v16 = vadd.f32 %v1710_v36, %v1614_v15  ;;  %2196 = vrot.lane.b32.xlu0 %v2189_v30, %s2895_s22  ;;  %2194 = vrot.lane.b32.xlu1 %v2187_v0, %s2895_s22 }
 0x3b6   : > { %v1412_v59 = vadd.f32 %v1404_v56, %v1325_v51 }
 0x3b7   : > { %v1736_v54 = vpop.permute.xlu0 %1735  ;;  %v1734_v42 = vpop.permute.xlu1 %1733 }
 0x3b8   : > { %v1741_v23 = vsel %vm1350_vm6, %v1734_v42, %v1736_v54  ;;  %v1747_v10 = vadd.f32 %v1734_v42, %v4385_v45  ;;  %v1508_v45 = vsel %vm1350_vm6, %v5261_v57, %v5260_v38 }
 0x3b9   : > { %v1748_v11 = vadd.f32 %v1741_v23, %v4389_v31  ;;  %2224 = vrot.lane.b32.xlu0 %v2217_v43, %s2895_s22  ;;  %2222 = vrot.lane.b32.xlu1 %v2216_v41, %s2895_s22  ;;  %v1516_v1 = vadd.f32 %v1508_v45, %v1412_v59 }
 0x3bb   : > { %v1740_v60 = vpop.permute.xlu0 %1739  ;;  %v1738_v62 = vpop.permute.xlu1 %1737  ;;  %v1574_v49 = vadd.f32 %v4297_v61, %v1516_v1 }
 0x3bc   : > { %v1742_v20 = vsel %vm1350_vm6, %v1738_v62, %v1740_v60  ;;  %v1749_v31 = vadd.f32 %v1738_v62, %v4400_v32 }
 0x3bd   : > { %v1750_v37 = vadd.f32 %v1742_v20, %v4408_v7  ;;  %2228 = vrot.lane.b32.xlu0 %v2221_v8, %s2895_s22  ;;  %2226 = vrot.lane.b32.xlu1 %v2219_v34, %s2895_s22  ;;  %v5262_v7 = vld [vmem:[#allocation20_spill] sm:$0xff]  ;;  %v1678_v35 = vadd.f32 %v1670_v24, %v1574_v49 }
 0x3be   : > { %v1677_v52 = vadd.f32 %v4628_v21, %v5262_v7 }
 0x3bf   : > { %v1768_v5 = vpop.permute.xlu0 %1767  ;;  %v1766_v29 = vpop.permute.xlu1 %1765 }
 0x3c0   : > { %v1773_v32 = vsel %vm1350_vm6, %v1766_v29, %v1768_v5  ;;  %v1779_v48 = vadd.f32 %v1766_v29, %v4413_v17 }
 0x3c1   : > { %v1780_v40 = vadd.f32 %v1773_v32, %v4417_v12 }
 0x3c3   : > { %v1772_v50 = vpop.permute.xlu0 %1771  ;;  %v1770_v27 = vpop.permute.xlu1 %1769 }
 0x3c4   : > { %v1774_v3 = vsel %vm1350_vm6, %v1770_v27, %v1772_v50  ;;  %v1781_v15 = vadd.f32 %v1770_v27, %v1677_v52 }
 0x3c5   : > { %v1782_v55 = vadd.f32 %v1774_v3, %v1678_v35 }
 0x3c7   : > { %v1802_v9 = vpop.permute.xlu0 %1801  ;;  %v1800_v46 = vpop.permute.xlu1 %1799 }
 0x3c8   : > { %v1808_v4 = vsel %vm1807_vm7, %v1800_v46, %v1802_v9  ;;  %v1814_v17 = vadd.f32 %v1800_v46, %v4646_v25 }
 0x3c9   : > { %v1815_v61 = vadd.f32 %v1808_v4, %v4648_v53 }
 0x3cb   : > { %v1806_v12 = vpop.permute.xlu0 %1805  ;;  %v1804_v6 = vpop.permute.xlu1 %1803 }
 0x3cc   : > { %v1809_v21 = vsel %vm1807_vm7, %v1804_v6, %v1806_v12  ;;  %v1816_v47 = vadd.f32 %v1804_v6, %v1717_v22 }
 0x3cd   : > { %v1817_v58 = vadd.f32 %v1809_v21, %v1718_v16 }
 0x3cf   : > { %v1829_v14 = vpop.permute.xlu0 %1828  ;;  %v1827_v36 = vpop.permute.xlu1 %1826 }
 0x3d0   : > { %v1834_v30 = vsel %vm1807_vm7, %v1827_v36, %v1829_v14  ;;  %v4705_v0 = vadd.f32 %v1827_v36, %v1747_v10 }
 0x3d1   : > { %v4707_v18 = vadd.f32 %v1834_v30, %v1748_v11 }
 0x3d3   : > { %v1833_v19 = vpop.permute.xlu0 %1832  ;;  %v1831_v33 = vpop.permute.xlu1 %1830 }
 0x3d4   : > { %v1835_v25 = vsel %vm1807_vm7, %v1831_v33, %v1833_v19  ;;  %v4710_v54 = vadd.f32 %v1831_v33, %v1749_v31 }
 0x3d5   : > { %v4712_v53 = vadd.f32 %v1835_v25, %v1750_v37 }
 0x3d7   : > { %v1855_v42 = vpop.permute.xlu0 %1854  ;;  %v1853_v43 = vpop.permute.xlu1 %1852 }
 0x3d8   : > { %v1860_v22 = vsel %vm1807_vm7, %v1853_v43, %v1855_v42  ;;  %v4715_v16 = vadd.f32 %v1853_v43, %v1779_v48 }
 0x3d9   : > { %v4717_v41 = vadd.f32 %v1860_v22, %v1780_v40 }
 0x3db   : > { %v1859_v23 = vpop.permute.xlu0 %1858  ;;  %v1857_v10 = vpop.permute.xlu1 %1856 }
 0x3dc   : > { %v1861_v13 = vsel %vm1807_vm7, %v1857_v10, %v1859_v23  ;;  %v4720_v26 = vadd.f32 %v1857_v10, %v1781_v15 }
 0x3dd   : > { %v4722_v28 = vadd.f32 %v1861_v13, %v1782_v55 }
 0x3df   : > { %v1895_v39 = vpop.permute.xlu0 %1894  ;;  %v1893_v11 = vpop.permute.xlu1 %1892 }
 0x3e0   : > { %v1900_v35 = vsel %vm1807_vm7, %v1893_v11, %v1895_v39  ;;  %v1906_v50 = vadd.f32 %v1893_v11, %v1814_v17 }
 0x3e1   : > { %v1907_v3 = vadd.f32 %v1900_v35, %v1815_v61 }
 0x3e3   : > { %v1899_v63 = vpop.permute.xlu0 %1898  ;;  %v1897_v2 = vpop.permute.xlu1 %1896 }
 0x3e4   : > { %v1901_v9 = vsel %vm1807_vm7, %v1897_v2, %v1899_v63  ;;  %v1908_v6 = vadd.f32 %v1897_v2, %v1816_v47 }
 0x3e5   : > { %v1909_v14 = vadd.f32 %v1901_v9, %v1817_v58 }
 0x3e7   : > { %v1927_v56 = vpop.permute.xlu0 %1926  ;;  %v1925_v44 = vpop.permute.xlu1 %1924 }
 0x3e8   : > { %v1932_v36 = vsel %vm1807_vm7, %v1925_v44, %v1927_v56  ;;  %v1938_v23 = vadd.f32 %v1925_v44, %v4705_v0 }
 0x3e9   : > { %v1939_v58 = vadd.f32 %v1932_v36, %v4707_v18 }
 0x3eb   : > { %v1931_v51 = vpop.permute.xlu0 %1930  ;;  %v1929_v38 = vpop.permute.xlu1 %1928 }
 0x3ec   : > { %v1933_v13 = vsel %vm1807_vm7, %v1929_v38, %v1931_v51 }
 0x3ed   : > { %v1941_v18 = vadd.f32 %v1933_v13, %v4712_v53 }
 0x3ef   : > { %v4724_v57 = vpop.permute.xlu0 %1958  ;;  %v4726_v45 = vpop.permute.xlu1 %1956 }
 0x3f0   : > { %v1964_v51 = vsel %vm1807_vm7, %v4726_v45, %v4724_v57  ;;  %v1970_v53 = vadd.f32 %v4726_v45, %v4715_v16 }
 0x3f3   : > { %v4728_v60 = vpop.permute.xlu0 %1962  ;;  %v4730_v62 = vpop.permute.xlu1 %1960 }
 0x3f7   : > { %v1990_v20 = vpop.permute.xlu0 %1989  ;;  %v1988_v31 = vpop.permute.xlu1 %1987 }
 0x3f8   : > { %v1991_v27 = vsel %vm1807_vm7, %v1988_v31, %v1990_v20  ;;  %v1994_v46 = vadd.f32 %v1988_v31, %v1906_v50  ;;  %v1996_v33 = vadd.f32 %v1988_v31, %v1908_v6 }
 0x3f9   : > { %v1995_v12 = vadd.f32 %v1991_v27, %v1907_v3  ;;  %v1997_v43 = vadd.f32 %v1991_v27, %v1909_v14  ;;  %v1971_v3 = vadd.f32 %v1964_v51, %v4717_v41 }
 0x3fb   : > { %v2007_v8 = vpop.permute.xlu0 %2006  ;;  %v2005_v34 = vpop.permute.xlu1 %2004 }
 0x3fc   : > { %v2008_v10 = vsel %vm1807_vm7, %v2005_v34, %v2007_v8  ;;  %v2011_v2 = vadd.f32 %v2005_v34, %v1938_v23  ;;  %v1940_v8 = vadd.f32 %v1929_v38, %v4710_v54 }
 0x3fd   : > { %v2012_v44 = vadd.f32 %v2008_v10, %v1939_v58  ;;  %v2014_v38 = vadd.f32 %v2008_v10, %v1941_v18 }
 0x3ff   : > { %v4732_v59 = vpop.permute.xlu0 %2023  ;;  %v4734_v37 = vpop.permute.xlu1 %2021 }
 0x400   : > { %v2025_v57 = vsel %vm1807_vm7, %v4734_v37, %v4732_v59  ;;  %v2028_v16 = vadd.f32 %v4734_v37, %v1970_v53 }
 0x403   : > { %v2057_v1 = vpop.permute.xlu0 %2056  ;;  %v2055_v5 = vpop.permute.xlu1 %2054 }
 0x404   : > { %v2062_v4 = vsel %vm1807_vm7, %v2055_v5, %v2057_v1  ;;  %v2068_v21 = vadd.f32 %v2055_v5, %v1994_v46 }
 0x405   : > { %v2069_v30 = vadd.f32 %v2062_v4, %v1995_v12  ;;  %v2029_v4 = vadd.f32 %v2025_v57, %v1971_v3  ;;  %v1972_v12 = vadd.f32 %v4730_v62, %v4720_v26 }
 0x407   : > { %v2061_v29 = vpop.permute.xlu0 %2060  ;;  %v2059_v24 = vpop.permute.xlu1 %2058 }
 0x408   : > { %v2063_v61 = vsel %vm1807_vm7, %v2059_v24, %v2061_v29  ;;  %v2070_v47 = vadd.f32 %v2059_v24, %v1996_v33 }
 0x409   : > { %v2071_v39 = vadd.f32 %v2063_v61, %v1997_v43 }
 0x40b   : > { %v2089_v32 = vpop.permute.xlu0 %2088  ;;  %v2087_v48 = vpop.permute.xlu1 %2086 }
 0x40c   : > { %v2094_v56 = vsel %vm1807_vm7, %v2087_v48, %v2089_v32  ;;  %v2100_v1 = vadd.f32 %v2087_v48, %v2011_v2  ;;  %v2013_v32 = vadd.f32 %v2005_v34, %v1940_v8  ;;  %v1965_v34 = vsel %vm1807_vm7, %v4730_v62, %v4728_v60 }
 0x40d   : > { %v2101_v5 = vadd.f32 %v2094_v56, %v2012_v44  ;;  %v1973_v6 = vadd.f32 %v1965_v34, %v4722_v28 }
 0x40f   : > { %v2093_v49 = vpop.permute.xlu0 %2092  ;;  %v2091_v40 = vpop.permute.xlu1 %2090  ;;  %v2031_v62 = vadd.f32 %v2025_v57, %v1973_v6 }
 0x410   : > { %v2095_v35 = vsel %vm1807_vm7, %v2091_v40, %v2093_v49  ;;  %v2102_v27 = vadd.f32 %v2091_v40, %v2013_v32 }
 0x411   : > { %v2103_v49 = vadd.f32 %v2095_v35, %v2014_v38 }
 0x413   : > { %v4736_v7 = vpop.permute.xlu0 %2120  ;;  %v4738_v52 = vpop.permute.xlu1 %2118 }
 0x414   : > { %v2126_v45 = vsel %vm1807_vm7, %v4738_v52, %v4736_v7  ;;  %v2132_v60 = vadd.f32 %v4738_v52, %v2028_v16  ;;  %v2030_v7 = vadd.f32 %v4734_v37, %v1972_v12 }
 0x417   : > { %v4742_v15 = vpop.permute.xlu0 %2124  ;;  %v4744_v55 = vpop.permute.xlu1 %2122 }
 0x41b   : > { %v2161_v17 = vpop.permute.xlu0 %2160  ;;  %v2159_v19 = vpop.permute.xlu1 %2158 }
 0x41c   : > { %v2166_v25 = vsel %vm1807_vm7, %v2159_v19, %v2161_v17  ;;  %v2172_v42 = vadd.f32 %v2159_v19, %v2068_v21  ;;  %v2133_v21 = vadd.f32 %v2126_v45, %v2029_v4  ;;  %v2134_v19 = vadd.f32 %v4744_v55, %v2030_v7 }
 0x41d   : > { %v2173_v22 = vadd.f32 %v2166_v25, %v2069_v30  ;;  %v2127_v30 = vsel %vm1807_vm7, %v4744_v55, %v4742_v15 }
 0x41e   : > { %2244 = vrot.lane.b32.xlu1 %v2172_v42, %s2894_s4  ;;  %v2135_v28 = vadd.f32 %v2127_v30, %v2031_v62 }
 0x41f   : > { %v2165_v11 = vpop.permute.xlu0 %2164  ;;  %2246 = vrot.lane.b32.xlu0 %v2173_v22, %s2894_s4  ;;  %v2163_v63 = vpop.permute.xlu1 %2162 }
 0x420   : > { %v2167_v20 = vsel %vm1807_vm7, %v2163_v63, %v2165_v11  ;;  %v2174_v0 = vadd.f32 %v2163_v63, %v2070_v47 }
 0x421   : > { %v2175_v31 = vadd.f32 %v2167_v20, %v2071_v39 }
 0x422   : > { %2248 = vrot.lane.b32.xlu1 %v2174_v0, %s2894_s4 }
 0x423   : > { %v2193_v29 = vpop.permute.xlu0 %2192  ;;  %2250 = vrot.lane.b32.xlu0 %v2175_v31, %s2894_s4  ;;  %v2191_v24 = vpop.permute.xlu1 %2190 }
 0x424   : > { %v2198_v50 = vsel %vm1807_vm7, %v2191_v24, %v2193_v29  ;;  %v2204_v54 = vadd.f32 %v2191_v24, %v2100_v1 }
 0x425   : > { %v2205_v48 = vadd.f32 %v2198_v50, %v2101_v5 }
 0x426   : > { %2263 = vrot.lane.b32.xlu1 %v2204_v54, %s2894_s4 }
 0x427   : > { %v2197_v9 = vpop.permute.xlu0 %2196  ;;  %2265 = vrot.lane.b32.xlu0 %v2205_v48, %s2894_s4  ;;  %v2195_v46 = vpop.permute.xlu1 %2194 }
 0x428   : > { %v2199_v59 = vsel %vm1807_vm7, %v2195_v46, %v2197_v9  ;;  %v2206_v40 = vadd.f32 %v2195_v46, %v2102_v27 }
 0x429   : > { %v2207_v41 = vadd.f32 %v2199_v59, %v2103_v49 }
 0x42a   : > { %2267 = vrot.lane.b32.xlu1 %v2206_v40, %s2894_s4 }
 0x42b   : > { %v2225_v14 = vpop.permute.xlu0 %2224  ;;  %2269 = vrot.lane.b32.xlu0 %v2207_v41, %s2894_s4  ;;  %v2223_v36 = vpop.permute.xlu1 %2222 }
 0x42c   : > { %v2230_v17 = vsel %vm1807_vm7, %v2223_v36, %v2225_v14  ;;  %v2236_v26 = vadd.f32 %v2223_v36, %v2132_v60 }
 0x42d   : > { %v2237_v52 = vadd.f32 %v2230_v17, %v2133_v21 }
 0x42e   : > { %2282 = vrot.lane.b32.xlu1 %v2236_v26, %s2894_s4 }
 0x42f   : > { %v2229_v33 = vpop.permute.xlu0 %2228  ;;  %2284 = vrot.lane.b32.xlu0 %v2237_v52, %s2894_s4  ;;  %v2227_v37 = vpop.permute.xlu1 %2226 }
 0x430   : > { %v2231_v61 = vsel %vm1807_vm7, %v2227_v37, %v2229_v33  ;;  %v2238_v25 = vadd.f32 %v2227_v37, %v2134_v19 }
 0x431   : > { %v2239_v15 = vadd.f32 %v2231_v61, %v2135_v28 }
 0x432   : > { %2286 = vrot.lane.b32.xlu1 %v2238_v25, %s2894_s4 }
 0x433   : > { %2288 = vrot.lane.b32.xlu0 %v2239_v15, %s2894_s4 }
 0x490   : > { %v2245_v55 = vpop.permute.xlu1 %2244 }
 0x491   : > { %v2247_v42 = vpop.permute.xlu0 %2246 }
 0x492   : > { %v2253_v43 = vsel %vm2252_vm8, %v2245_v55, %v2247_v42 }
 0x493   : > { %2257 = vst [vmem:[%s3159_s23 - $0x6] sm:$0xc0] %v2253_v43 }
 0x494   : > { %v2249_v22 = vpop.permute.xlu1 %2248 }
 0x495   : > { %v2251_v23 = vpop.permute.xlu0 %2250 }
 0x496   : > { %v2254_v10 = vsel %vm2252_vm8, %v2249_v22, %v2251_v23 }
 0x497   : > { %2258 = vst [vmem:[%s3159_s23 + $0x2] sm:$0x3f] %v2254_v10 }
 0x498   : > { %v2264_v47 = vpop.permute.xlu1 %2263 }
 0x499   : > { %v2266_v58 = vpop.permute.xlu0 %2265 }
 0x49a   : > { %v2271_v13 = vsel %vm2252_vm8, %v2264_v47, %v2266_v58 }
 0x49b   : > { %2487 = vst [vmem:[%s3159_s23 + $0x2] sm:$0xc0] %v2271_v13 }
 0x49c   : > { %v2268_v39 = vpop.permute.xlu1 %2267 }
 0x49d   : > { %v2270_v11 = vpop.permute.xlu0 %2269 }
 0x49e   : > { %v2272_v63 = vsel %vm2252_vm8, %v2268_v39, %v2270_v11 }
 0x49f   : > { %2488 = vst [vmem:[%s3159_s23 + $0xa] sm:$0x3f] %v2272_v63 }
 0x4a0   : > { %v2283_v2 = vpop.permute.xlu1 %2282 }
 0x4a1   : > { %v2285_v56 = vpop.permute.xlu0 %2284 }
 0x4a2   : > { %v2290_v20 = vsel %vm2252_vm8, %v2283_v2, %v2285_v56 }
 0x4a3   : > { %2489 = vst [vmem:[%s3159_s23 + $0xa] sm:$0xc0] %v2290_v20 }
 0x4a4   : > { %v2287_v0 = vpop.permute.xlu1 %2286 }
 0x4a5   : > { %v2289_v44 = vpop.permute.xlu0 %2288 }
 0x4a6   : > { %v2291_v31 = vsel %vm2252_vm8, %v2287_v0, %v2289_v44 }
 0x4a7   : > { %2490 = vst [vmem:[%s3159_s23 + $0x12] sm:$0x3f] %v2291_v31 }
 0x4a8   : > { %2769 = shalt.err (!%p2766_p4)
}
 0x4a9   : > { %s2770_s23 = scalar_lea.hbm %s4819_s5, 384  ;;  %s2774_s4 = scalar_lea.hbm %s4886_s2, 1536 }
 0x4aa   : > { %p2771_p13 = scmp.ne.s32.totalorder %s4819_s5, %s2770_s23  ;;  %p2775_p11 = scmp.lt.u32.totalorder %s4819_s5, %s4886_s2 }
 0x4ab   : > { %p2776_p6 = scmp.lt.u32.totalorder %s2774_s4, %s2770_s23  ;;  %p2778_p1 = scmp.lt.u32.totalorder %s2770_s23, %s4819_s5 }
 0x4ac   : > { %p2772_p0 = pnand %p2771_p13, %p5263_p10 }
 0x4ad   : > { %p2777_p2 = por %p2776_p6, %p2775_p11 }
 0x4ae   : > { %p2773_p3 = pneg %p2772_p0 }
 0x4af   : > { %p2779_p7 = por %p2778_p1, %p2777_p2 }
 0x4b1   : > { %p2780_p9 = pnand %p2779_p7, %p2773_p3 }
 0x4b3   : > { %2783 = shalt.err (!%p2780_p9)
}
 0x4b4   : > { %s2897_s27 = smov 128   ;;  %s2898_s3 = smov 256  }
 0x4b5   : > { %s2899_s16 = smov 8  }
 0x4b6   : > { %2521 = dma.vmem_to_hbm [thread:$0]  (%p5263_p10), %s4814_s25, 384, %s4819_s5, %s2298_s15, %s2897_s27, %s2898_s3, %s2899_s16  }
 0x4b7 PF: > { %s5264_s24 = sld [smem:[#allocation14_spill]]  ;;  %p2535_p5 = scmp.ge.s32.totalorder %s2882_s19, 2 }
 0x4b8   : > { %s2327_s0 = sand.u32 1, %s2842_s9  }
 0x4b9   : > { %s2328_s8 = scalar_lea.sflag [#allocation5], %s2327_s0 }
 0x4bd   : > { %p5265_p8 = scmp.ne.s32.totalorder %s5264_s24, 0 }
 0x4bf   : > { %p2531_p12 = pnand %p2535_p5, %p5265_p8 }
 0x4c1   : > { %2837 = dma.done.wait (!%p2531_p12), %s2328_s8, 384  }
 0x4c2   : > { %2839 = vsyncadd (!%p2531_p12), %s2328_s8, 4294966912  ;;  %s21_s19 = sadd.s32 1, %s2882_s19   ;;  %s5266_s6 = sld [smem:[#allocation12_spill]] }
 0x4c3   : > { %p18_p4 = scmp.ge.s32.totalorder %s21_s19, 6   ;;  %s5267_s25 = sld [smem:[#allocation13_spill]] }
 0x4c4   : > { %s5268_s9 = smov %s2846_s10  ;;  %s5269_s10 = smov %s2850_s11 }
 0x4c5   : > { %s5270_s11 = smov %s3091_s20  ;;  %s5271_s12 = smov %s2858_s13 }
 0x4c6   : > { %s5272_s13 = smov %s2862_s14  ;;  %s5273_s14 = smov %s3088_s7 }
 0x4c7   : > { %s5274_s15 = smov %s2874_s17  ;;  %s5275_s16 = smov %s2878_s18 }
 0x4c8   : > { %s5276_s17 = smov %s5266_s6  ;;  %20 = sbr.rel (!%p18_p4) target bundleno = 13 (0xd), region = 119 }
 0x4c9   : > { %s5277_s18 = smov %s5267_s25 }
 0x4cf   :  { %2333 = vsyncpa [#allocation4], 1 }
 0x4d0   :  { %2335 = vsyncpa [#allocation4 + $0x1], 1 }
 0x4d1   :  { %2336 = vsyncpa [#allocation7], 1 }
 0x4d2   :  { %2338 = vsyncpa [#allocation7 + $0x1], 1 }
 0x4d3   :  { %2339 = vsyncpa [#allocation5], 1 }
 0x4d4   :  { %2341 = vsyncpa [#allocation5 + $0x1], 1 }

</bundles_post_ra>
